<compile_context>
chip_gen: v6e
topology: v6e:2x2x1
jax: 0.10.0
libtpu: 0.0.40
codegen_flags: <defaults>
</compile_context>

<pallas_src>
import math

import numpy as np

import jax
import jax.numpy as jnp
from jax import lax
from jax.experimental import pallas as pl
from jax.experimental.pallas import tpu as pltpu


# ----------------------------------------------------------------------------
# Wrapper-side weight preprocessing (pure layout work, done once at trace time)
# ----------------------------------------------------------------------------
def _band_matrices(w_hwio, W):
    """3x3 conv (stride 1, pad 1) -> per-kh block-banded matmul matrices.

    w_hwio: (3, 3, CI, CO).  Returns T of shape (3, W*CI, W*CO) with
      T[kh, wi*CI + ci, w*CO + co] = w_hwio[kh, kw, ci, co]  where wi = w+kw-1,
    entries with wi outside [0, W) omitted (== zero padding along width).
    """
    KH, KW, CI, CO = w_hwio.shape
    wi = np.arange(W)[None, :, None]
    wo = np.arange(W)[None, None, :]
    kw = np.arange(KW)[:, None, None]
    sel = (wi == wo + kw - 1).astype(np.float32)                  # (KW, W, W)
    t = jnp.einsum('kab,hkio->haibo', jnp.asarray(sel), w_hwio)   # (KH,W,CI,W,CO)
    return t.reshape(KH, W * CI, W * CO)


def _block_diag(ws, W):
    """1x1 shortcut conv (CI, CO) -> block-diagonal (W*CI, W*CO) matrix."""
    CI, CO = ws.shape
    eye = jnp.eye(W, dtype=ws.dtype)
    t = jnp.einsum('ab,io->aibo', eye, ws)                        # (W,CI,W,CO)
    return t.reshape(W * CI, W * CO)


# ----------------------------------------------------------------------------
# Pallas kernel: one grid step == B_TILE batch images, fully fused in VMEM.
# ----------------------------------------------------------------------------
def _make_resblock_kernel(H, W, CIN, COUT, b_tile, precision):
    hp2 = H + 2
    R = b_tile * hp2                 # matmul M dimension (rows per grid step)
    WCO = W * COUT

    def kernel(x_ref, t2_ref, b2_ref, t3_ref, b3s_ref, ts_ref, o_ref):
        def mm(a, b):
            return jnp.dot(a, b, preferred_element_type=jnp.float32,
                           precision=precision)

        x_raw = x_ref[...]                       # (R, W*CIN), zero halo rows
        x_act = jnp.maximum(x_raw, 0.0)          # relu(x), computed once

        # 1x1 shortcut on raw x; conv3 bias + shortcut bias pre-summed.
        out = mm(x_raw, ts_ref[...]) + b3s_ref[...]

        # conv2: 3 banded whole-plane dots (one per kh tap), independent and
        # summed once.  Row shifts via XLU rolls; wrap-around / cross-image
        # leakage only corrupts per-image halo rows (masked below).
        c2 = (mm(pltpu.roll(x_act, shift=1, axis=0), t2_ref[0])
              + mm(x_act, t2_ref[1])
              + mm(pltpu.roll(x_act, shift=R - 1, axis=0), t2_ref[2]))
        c2 = c2 + b2_ref[...]

        # relu + re-zero per-image halo rows: they represent conv3's zero row
        # padding but currently hold garbage from the rolled dots.
        row = lax.broadcasted_iota(jnp.int32, (R, WCO), 0) % hp2
        halo = jnp.logical_or(row == 0, row == hp2 - 1)
        h = jnp.where(halo, 0.0, jnp.maximum(c2, 0.0))

        # conv3: same banded structure, accumulated onto shortcut + biases.
        out = out + (mm(pltpu.roll(h, shift=1, axis=0), t3_ref[0])
                     + mm(h, t3_ref[1])
                     + mm(pltpu.roll(h, shift=R - 1, axis=0), t3_ref[2]))

        # single lane-dense unmasked (R, W*COUT) store
        o_ref[...] = out.astype(o_ref.dtype)

    return kernel


def resblock_forward(x_nhwc, w2, b2, w3, b3, ws, bs, *, b_tile=None,
                     precision=lax.Precision.HIGHEST):
    """x_nhwc: (N,H,W,CIN) f32; w2:(3,3,CIN,COUT); w3:(3,3,COUT,COUT); ws:(CIN,COUT)."""
    # TODO(synk): lax.Precision.HIGH (bf16_3x) is not accepted by the Mosaic
    # dot lowering; pass precision=lax.Precision.DEFAULT here when a looser
    # (~1e-2) tolerance is acceptable to cut MXU passes (matters most on v5e).
    N, H, W, CIN = x_nhwc.shape
    COUT = w2.shape[-1]
    hp2 = H + 2

    # ---- batch tile: images stacked along the matmul M dimension -----------
    align = 8 // math.gcd(hp2, 8)        # keep block row count a multiple of 8
    if b_tile is None:
        # Target M ~ 128-160 rows (fills the MXU on v5e, half-fills v6e/v7x)
        # while keeping >= 2 grid steps when the batch allows (v7x: 2 TCs).
        b_tile = max(1, min(max(1, 160 // hp2), pl.cdiv(N, 2)))
    b_tile = align * pl.cdiv(b_tile, align)
    n_pad = b_tile * pl.cdiv(N, b_tile)          # pad batch to a whole tile
    R = b_tile * hp2

    # ---- weight/bias repacking (kw shifts + width zero-padding folded in) --
    t2 = _band_matrices(w2, W)                      # (3, W*CIN,  W*COUT)
    t3 = _band_matrices(w3, W)                      # (3, W*COUT, W*COUT)
    ts = _block_diag(ws, W)                         # (W*CIN, W*COUT)
    b2t = jnp.tile(b2, W).reshape(1, W * COUT)
    b3st = jnp.tile(b3 + bs, W).reshape(1, W * COUT)   # conv3 + shortcut bias

    # ---- flatten batch/rows in the wrapper: 2-D, lane-dense, row halos -----
    x_rp = jnp.pad(x_nhwc, ((0, n_pad - N), (1, 1), (0, 0), (0, 0)))
    x_flat = x_rp.reshape(n_pad * hp2, W * CIN)

    kernel = _make_resblock_kernel(H, W, CIN, COUT, b_tile, precision)

    # TODO(synk): for larger W/C, switch to a K=3*CIN im2col formulation, mark
    # the constant-index weight specs pipeline_mode=pl.Buffered(1), and set
    # vmem_limit_bytes explicitly (v7x has only 64 MiB VMEM per TensorCore).
    grid_spec = pltpu.PrefetchScalarGridSpec(
        num_scalar_prefetch=0,
        grid=(n_pad // b_tile,),
        in_specs=[
            pl.BlockSpec((R, W * CIN), lambda i: (i, 0)),
            pl.BlockSpec((3, W * CIN, W * COUT), lambda i: (0, 0, 0)),
            pl.BlockSpec((1, W * COUT), lambda i: (0, 0)),
            pl.BlockSpec((3, W * COUT, W * COUT), lambda i: (0, 0, 0)),
            pl.BlockSpec((1, W * COUT), lambda i: (0, 0)),
            pl.BlockSpec((W * CIN, W * COUT), lambda i: (0, 0)),
        ],
        out_specs=pl.BlockSpec((R, W * COUT), lambda i: (i, 0)),
    )

    out_flat = pl.pallas_call(
        kernel,
        out_shape=jax.ShapeDtypeStruct((n_pad * hp2, W * COUT), jnp.float32),
        grid_spec=grid_spec,
        compiler_params=pltpu.CompilerParams(
            dimension_semantics=("parallel",)),      # steps -> 2 TCs on v7x
    )(x_flat, t2, b2t, t3, b3st, ts)

    # drop per-image halo rows and batch padding
    return out_flat.reshape(n_pad, hp2, W, COUT)[:N, 1:H + 1]


# ----------------------------------------------------------------------------
# Pure-JAX reference (NHWC / HWIO), mirrors the PyTorch forward.
# ----------------------------------------------------------------------------
def reference_forward(x, w2, b2, w3, b3, ws, bs):
    dn = ('NHWC', 'HWIO', 'NHWC')
    hp = lax.Precision.HIGHEST
    h = jax.nn.relu(x)
    h = lax.conv_general_dilated(h, w2, (1, 1), ((1, 1), (1, 1)),
                                 dimension_numbers=dn, precision=hp) + b2
    h = jax.nn.relu(h)
    h = lax.conv_general_dilated(h, w3, (1, 1), ((1, 1), (1, 1)),
                                 dimension_numbers=dn, precision=hp) + b3
    cin, cout = ws.shape
    short = lax.conv_general_dilated(x, ws.reshape(1, 1, cin, cout), (1, 1),
                                     ((0, 0), (0, 0)),
                                     dimension_numbers=dn, precision=hp) + bs
    return h + short


if __name__ == "__main__":
    # resblock(depth=4, channels=8, stride=1, bn='', kernel_size=3, bias=True)
    N, DEPTH, CH, HH, WW = 2, 4, 8, 16, 16
    ks = jax.random.split(jax.random.PRNGKey(0), 7)

    x_nchw = jax.random.normal(ks[0], (N, DEPTH, HH, WW), jnp.float32)
    w2 = 0.2 * jax.random.normal(ks[1], (3, 3, DEPTH, CH), jnp.float32)  # HWIO
    b2 = 0.1 * jax.random.normal(ks[2], (CH,), jnp.float32)
    w3 = 0.2 * jax.random.normal(ks[3], (3, 3, CH, CH), jnp.float32)
    b3 = 0.1 * jax.random.normal(ks[4], (CH,), jnp.float32)
    ws = 0.2 * jax.random.normal(ks[5], (DEPTH, CH), jnp.float32)        # 1x1
    bs = 0.1 * jax.random.normal(ks[6], (CH,), jnp.float32)

    x_nhwc = jnp.transpose(x_nchw, (0, 2, 3, 1))             # NCHW -> NHWC

    out_nhwc = jax.block_until_ready(
        resblock_forward(x_nhwc, w2, b2, w3, b3, ws, bs))
    out_nchw = jnp.transpose(out_nhwc, (0, 3, 1, 2))         # back to NCHW

    ref_nhwc = reference_forward(x_nhwc, w2, b2, w3, b3, ws, bs)
    err = float(jnp.max(jnp.abs(out_nhwc - ref_nhwc)))
    assert out_nchw.shape == (N, CH, HH, WW), out_nchw.shape
    assert err < 1e-3, f"max abs error vs reference: {err}"

    print("KERNEL_OK")
</pallas_src>

<mosaic_0001>
module attributes {stable_mosaic.version = 11 : i64} {
  func.func @kernel(%arg0: i32, %arg1: memref<72x64xf32, #tpu.memory_space<vmem>>, %arg2: memref<3x64x128xf32, #tpu.memory_space<vmem>>, %arg3: memref<1x128xf32, #tpu.memory_space<vmem>>, %arg4: memref<3x128x128xf32, #tpu.memory_space<vmem>>, %arg5: memref<1x128xf32, #tpu.memory_space<vmem>>, %arg6: memref<64x128xf32, #tpu.memory_space<vmem>>, %arg7: memref<72x128xf32, #tpu.memory_space<vmem>>) attributes {dimension_semantics = [#tpu.dimension_semantics<parallel>], iteration_bounds = array<i64: 1>, scalar_prefetch = 0 : i64, scratch_operands = 0 : i64, tpu.core_type = #tpu.core_type<tc>, window_params = [{transform_indices = @transform_0, window_bounds = array<i64: 72, 64>}, {pipeline_mode = #tpu.pipeline_mode<synchronous>, transform_indices = @transform_1, window_bounds = array<i64: 3, 64, 128>}, {pipeline_mode = #tpu.pipeline_mode<synchronous>, transform_indices = @transform_2, window_bounds = array<i64: 1, 128>}, {pipeline_mode = #tpu.pipeline_mode<synchronous>, transform_indices = @transform_3, window_bounds = array<i64: 3, 128, 128>}, {pipeline_mode = #tpu.pipeline_mode<synchronous>, transform_indices = @transform_4, window_bounds = array<i64: 1, 128>}, {pipeline_mode = #tpu.pipeline_mode<synchronous>, transform_indices = @transform_5, window_bounds = array<i64: 64, 128>}, {transform_indices = @transform_6, window_bounds = array<i64: 72, 128>}]} {
    %c0 = arith.constant 0 : index
    %c0_0 = arith.constant 0 : index
    %0 = vector.load %arg1[%c0, %c0_0] : memref<72x64xf32, #tpu.memory_space<vmem>>, vector<72x64xf32>
    %cst = arith.constant 0.000000e+00 : f32
    %1 = vector.broadcast %cst : f32 to vector<72x64xf32>
    %2 = arith.maximumf %0, %1 : vector<72x64xf32>
    %c0_1 = arith.constant 0 : index
    %c0_2 = arith.constant 0 : index
    %3 = vector.load %arg6[%c0_1, %c0_2] : memref<64x128xf32, #tpu.memory_space<vmem>>, vector<64x128xf32>
    %cst_3 = arith.constant dense<0.000000e+00> : vector<72x128xf32>
    %4 = tpu.matmul %0, %3, %cst_3 {dimension_numbers = #tpu.dot_dimension_numbers<[1], [0], [0], [1], [0, 0, 1, 1], [], []>, precision = #tpu.contract_precision<fp32>} : vector<72x64xf32>, vector<64x128xf32>, vector<72x128xf32> -> vector<72x128xf32>
    %c0_4 = arith.constant 0 : index
    %c0_5 = arith.constant 0 : index
    %5 = vector.load %arg5[%c0_4, %c0_5] : memref<1x128xf32, #tpu.memory_space<vmem>>, vector<1x128xf32>
    %6 = vector.broadcast %5 : vector<1x128xf32> to vector<72x128xf32>
    %7 = arith.addf %4, %6 : vector<72x128xf32>
    %c1_i32 = arith.constant 1 : i32
    %8 = tpu.dynamic_rotate %2 by %c1_i32 dim 0 : vector<72x64xf32>, i32 -> vector<72x64xf32>
    %c0_6 = arith.constant 0 : index
    %c0_7 = arith.constant 0 : index
    %c0_8 = arith.constant 0 : index
    %9 = vector.load %arg2[%c0_6, %c0_7, %c0_8] : memref<3x64x128xf32, #tpu.memory_space<vmem>>, vector<1x64x128xf32>
    %10 = vector.shape_cast %9 : vector<1x64x128xf32> to vector<64x128xf32>
    %cst_9 = arith.constant dense<0.000000e+00> : vector<72x128xf32>
    %11 = tpu.matmul %8, %10, %cst_9 {dimension_numbers = #tpu.dot_dimension_numbers<[1], [0], [0], [1], [0, 0, 1, 1], [], []>, precision = #tpu.contract_precision<fp32>} : vector<72x64xf32>, vector<64x128xf32>, vector<72x128xf32> -> vector<72x128xf32>
    %c1 = arith.constant 1 : index
    %c0_10 = arith.constant 0 : index
    %c0_11 = arith.constant 0 : index
    %12 = vector.load %arg2[%c1, %c0_10, %c0_11] : memref<3x64x128xf32, #tpu.memory_space<vmem>>, vector<1x64x128xf32>
    %13 = vector.shape_cast %12 : vector<1x64x128xf32> to vector<64x128xf32>
    %cst_12 = arith.constant dense<0.000000e+00> : vector<72x128xf32>
    %14 = tpu.matmul %2, %13, %cst_12 {dimension_numbers = #tpu.dot_dimension_numbers<[1], [0], [0], [1], [0, 0, 1, 1], [], []>, precision = #tpu.contract_precision<fp32>} : vector<72x64xf32>, vector<64x128xf32>, vector<72x128xf32> -> vector<72x128xf32>
    %15 = arith.addf %11, %14 : vector<72x128xf32>
    %c71_i32 = arith.constant 71 : i32
    %16 = tpu.dynamic_rotate %2 by %c71_i32 dim 0 : vector<72x64xf32>, i32 -> vector<72x64xf32>
    %c2 = arith.constant 2 : index
    %c0_13 = arith.constant 0 : index
    %c0_14 = arith.constant 0 : index
    %17 = vector.load %arg2[%c2, %c0_13, %c0_14] : memref<3x64x128xf32, #tpu.memory_space<vmem>>, vector<1x64x128xf32>
    %18 = vector.shape_cast %17 : vector<1x64x128xf32> to vector<64x128xf32>
    %cst_15 = arith.constant dense<0.000000e+00> : vector<72x128xf32>
    %19 = tpu.matmul %16, %18, %cst_15 {dimension_numbers = #tpu.dot_dimension_numbers<[1], [0], [0], [1], [0, 0, 1, 1], [], []>, precision = #tpu.contract_precision<fp32>} : vector<72x64xf32>, vector<64x128xf32>, vector<72x128xf32> -> vector<72x128xf32>
    %20 = arith.addf %15, %19 : vector<72x128xf32>
    %c0_16 = arith.constant 0 : index
    %c0_17 = arith.constant 0 : index
    %21 = vector.load %arg3[%c0_16, %c0_17] : memref<1x128xf32, #tpu.memory_space<vmem>>, vector<1x128xf32>
    %22 = vector.broadcast %21 : vector<1x128xf32> to vector<72x128xf32>
    %23 = arith.addf %20, %22 : vector<72x128xf32>
    %24 = tpu.iota {dimensions = array<i32: 0>} : vector<72x128xi32>
    %c18_i32 = arith.constant 18 : i32
    %c0_i32 = arith.constant 0 : i32
    %25 = arith.cmpi eq, %c18_i32, %c0_i32 : i32
    %c1_i32_18 = arith.constant 1 : i32
    %26 = arith.select %25, %c1_i32_18, %c18_i32 : i32
    %27 = vector.broadcast %26 : i32 to vector<72x128xi32>
    %28 = arith.remsi %24, %27 : vector<72x128xi32>
    %c0_i32_19 = arith.constant 0 : i32
    %29 = vector.broadcast %c0_i32_19 : i32 to vector<72x128xi32>
    %30 = arith.cmpi ne, %28, %29 : vector<72x128xi32>
    %c0_i32_20 = arith.constant 0 : i32
    %31 = vector.broadcast %c0_i32_20 : i32 to vector<72x128xi32>
    %32 = arith.cmpi slt, %28, %31 : vector<72x128xi32>
    %c0_i32_21 = arith.constant 0 : i32
    %33 = arith.cmpi slt, %26, %c0_i32_21 : i32
    %34 = vector.broadcast %33 : i1 to vector<72x128xi1>
    %35 = vector.broadcast %34 : vector<72x128xi1> to vector<72x128xi1>
    %36 = arith.xori %32, %35 : vector<72x128xi1>
    %37 = arith.andi %36, %30 : vector<72x128xi1>
    %38 = vector.broadcast %26 : i32 to vector<72x128xi32>
    %39 = arith.addi %28, %38 : vector<72x128xi32>
    %40 = arith.select %37, %39, %28 : vector<72x128xi1>, vector<72x128xi32>
    %c0_i32_22 = arith.constant 0 : i32
    %41 = vector.broadcast %c0_i32_22 : i32 to vector<72x128xi32>
    %42 = arith.cmpi eq, %40, %41 : vector<72x128xi32>
    %c17_i32 = arith.constant 17 : i32
    %43 = vector.broadcast %c17_i32 : i32 to vector<72x128xi32>
    %44 = arith.cmpi eq, %40, %43 : vector<72x128xi32>
    %45 = arith.ori %42, %44 : vector<72x128xi1>
    %cst_23 = arith.constant 0.000000e+00 : f32
    %46 = vector.broadcast %cst_23 : f32 to vector<72x128xf32>
    %47 = arith.maximumf %23, %46 : vector<72x128xf32>
    %cst_24 = arith.constant 0.000000e+00 : f32
    %48 = vector.broadcast %cst_24 : f32 to vector<72x128xf32>
    %49 = arith.select %45, %48, %47 : vector<72x128xi1>, vector<72x128xf32>
    %c1_i32_25 = arith.constant 1 : i32
    %50 = tpu.dynamic_rotate %49 by %c1_i32_25 dim 0 : vector<72x128xf32>, i32 -> vector<72x128xf32>
    %c0_26 = arith.constant 0 : index
    %c0_27 = arith.constant 0 : index
    %c0_28 = arith.constant 0 : index
    %51 = vector.load %arg4[%c0_26, %c0_27, %c0_28] : memref<3x128x128xf32, #tpu.memory_space<vmem>>, vector<1x128x128xf32>
    %52 = vector.shape_cast %51 : vector<1x128x128xf32> to vector<128x128xf32>
    %cst_29 = arith.constant dense<0.000000e+00> : vector<72x128xf32>
    %53 = tpu.matmul %50, %52, %cst_29 {dimension_numbers = #tpu.dot_dimension_numbers<[1], [0], [0], [1], [0, 0, 1, 1], [], []>, precision = #tpu.contract_precision<fp32>} : vector<72x128xf32>, vector<128x128xf32>, vector<72x128xf32> -> vector<72x128xf32>
    %c1_30 = arith.constant 1 : index
    %c0_31 = arith.constant 0 : index
    %c0_32 = arith.constant 0 : index
    %54 = vector.load %arg4[%c1_30, %c0_31, %c0_32] : memref<3x128x128xf32, #tpu.memory_space<vmem>>, vector<1x128x128xf32>
    %55 = vector.shape_cast %54 : vector<1x128x128xf32> to vector<128x128xf32>
    %cst_33 = arith.constant dense<0.000000e+00> : vector<72x128xf32>
    %56 = tpu.matmul %49, %55, %cst_33 {dimension_numbers = #tpu.dot_dimension_numbers<[1], [0], [0], [1], [0, 0, 1, 1], [], []>, precision = #tpu.contract_precision<fp32>} : vector<72x128xf32>, vector<128x128xf32>, vector<72x128xf32> -> vector<72x128xf32>
    %57 = arith.addf %53, %56 : vector<72x128xf32>
    %c71_i32_34 = arith.constant 71 : i32
    %58 = tpu.dynamic_rotate %49 by %c71_i32_34 dim 0 : vector<72x128xf32>, i32 -> vector<72x128xf32>
    %c2_35 = arith.constant 2 : index
    %c0_36 = arith.constant 0 : index
    %c0_37 = arith.constant 0 : index
    %59 = vector.load %arg4[%c2_35, %c0_36, %c0_37] : memref<3x128x128xf32, #tpu.memory_space<vmem>>, vector<1x128x128xf32>
    %60 = vector.shape_cast %59 : vector<1x128x128xf32> to vector<128x128xf32>
    %cst_38 = arith.constant dense<0.000000e+00> : vector<72x128xf32>
    %61 = tpu.matmul %58, %60, %cst_38 {dimension_numbers = #tpu.dot_dimension_numbers<[1], [0], [0], [1], [0, 0, 1, 1], [], []>, precision = #tpu.contract_precision<fp32>} : vector<72x128xf32>, vector<128x128xf32>, vector<72x128xf32> -> vector<72x128xf32>
    %62 = arith.addf %57, %61 : vector<72x128xf32>
    %63 = arith.addf %7, %62 : vector<72x128xf32>
    %c0_39 = arith.constant 0 : index
    %c0_40 = arith.constant 0 : index
    %64 = vector.load %arg7[%c0_39, %c0_40] : memref<72x128xf32, #tpu.memory_space<vmem>>, vector<72x128xf32>
    tpu.vector_store %arg7[%c0_39, %c0_40], %63 {strides = array<i32>} : memref<72x128xf32, #tpu.memory_space<vmem>>, vector<72x128xf32>,
    return
  }
  func.func @transform_0(%arg0: i32) -> (i32, i32) {
    %c0_i32 = arith.constant 0 : i32
    %c0_i32_0 = arith.constant 0 : i32
    return %arg0, %c0_i32 : i32, i32
  }
  func.func @transform_1(%arg0: i32) -> (i32, i32, i32) {
    %c0_i32 = arith.constant 0 : i32
    %c0_i32_0 = arith.constant 0 : i32
    %c0_i32_1 = arith.constant 0 : i32
    %c0_i32_2 = arith.constant 0 : i32
    return %c0_i32, %c0_i32_0, %c0_i32_1 : i32, i32, i32
  }
  func.func @transform_2(%arg0: i32) -> (i32, i32) {
    %c0_i32 = arith.constant 0 : i32
    %c0_i32_0 = arith.constant 0 : i32
    %c0_i32_1 = arith.constant 0 : i32
    return %c0_i32, %c0_i32_0 : i32, i32
  }
  func.func @transform_3(%arg0: i32) -> (i32, i32, i32) {
    %c0_i32 = arith.constant 0 : i32
    %c0_i32_0 = arith.constant 0 : i32
    %c0_i32_1 = arith.constant 0 : i32
    %c0_i32_2 = arith.constant 0 : i32
    return %c0_i32, %c0_i32_0, %c0_i32_1 : i32, i32, i32
  }
  func.func @transform_4(%arg0: i32) -> (i32, i32) {
    %c0_i32 = arith.constant 0 : i32
    %c0_i32_0 = arith.constant 0 : i32
    %c0_i32_1 = arith.constant 0 : i32
    return %c0_i32, %c0_i32_0 : i32, i32
  }
  func.func @transform_5(%arg0: i32) -> (i32, i32) {
    %c0_i32 = arith.constant 0 : i32
    %c0_i32_0 = arith.constant 0 : i32
    %c0_i32_1 = arith.constant 0 : i32
    return %c0_i32, %c0_i32_0 : i32, i32
  }
  func.func @transform_6(%arg0: i32) -> (i32, i32) {
    %c0_i32 = arith.constant 0 : i32
    %c0_i32_0 = arith.constant 0 : i32
    return %arg0, %c0_i32 : i32, i32
  }
}

</mosaic_0001>

<bundles_post_ra>
// kernel: tpu_custom_call.1
= control target key start
LH: loop header
LB: loop body
LE: loop exit
PB: predicated region body
PF: predicated region fallthrough
CT: control target
= control target key end

     0   :  { %11 = vsyncpa [#allocation3], 0  ;;  %s14849_s0 = inlined_call_operand.vmem [shape: f32[72,64], index: 0, kind: input, shape index: {}]   ;;  %s14850_s1 = inlined_call_operand.hbm [shape: f32[3,64,128], index: 1, kind: input, shape index: {}]   ;;  %s14851_s2 = inlined_call_operand.vmem [shape: f32[1,128], index: 2, kind: input, shape index: {}]   ;;  %s14852_s3 = inlined_call_operand.hbm [shape: f32[3,128,128], index: 3, kind: input, shape index: {}]   ;;  %s14853_s4 = inlined_call_operand.vmem [shape: f32[1,128], index: 4, kind: input, shape index: {}]   ;;  %s14854_s5 = inlined_call_operand.vmem [shape: f32[64,128], index: 5, kind: input, shape index: {}]   ;;  %s14855_s6 = inlined_call_operand.hbm [shape: f32[72,128], index: 6, kind: output, shape index: {}]  }
   0x1   :  { %12 = vsyncpa [#allocation6], 0 }
   0x2   :  { %13 = vsyncpa [#allocation4], 0  ;;  %s10137_s21 = smov [#allocation2]  }
   0x3   :  { %s21_s22 = sshll.u32 %s10137_s21, 4  ;;  %s22_s22 = int_to_ptr.vmem [resolvable:$true] %s21_s22 }
   0x4   :  { %s10079_s23 = scalar_lea.vmem %s22_s22, 3072  ;;  %p10084_p1 = scmp.lt.s32.totalorder %s22_s22, %s22_s22 }
   0x5   :  { %p10080_p0 = scmp.ne.s32.totalorder %s22_s22, %s10079_s23  ;;  %p10085_p2 = scmp.lt.s32.totalorder %s10079_s23, %s10079_s23 }
   0x7   :  { %p10086_p3 = por %p10085_p2, %p10084_p1 }
   0x9   :  { %p10087_p4 = pnand %p10086_p3, %p10080_p0 }
   0xb   :  { %10090 = shalt.err (!%p10087_p4)
}
   0xc   :  { %s10138_s24 = smov 128   ;;  %s10139_s25 = smov 8  }
   0xd   :  { %27 = dma.hbm_to_vmem [thread:$0]  %s14850_s1, 3072, %s22_s22, [#allocation3], %s10138_s24, %s10138_s24, %s10139_s25  }
   0xe   :  { %s10140_s28 = smov [#allocation5]  }
   0xf   :  { %s35_s29 = sshll.u32 %s10140_s28, 4  ;;  %s36_s29 = int_to_ptr.vmem [resolvable:$true] %s35_s29 }
  0x10   :  { %s10099_s30 = scalar_lea.vmem %s36_s29, 6144  ;;  %p10104_p6 = scmp.lt.s32.totalorder %s36_s29, %s36_s29 }
  0x11   :  { %p10100_p5 = scmp.ne.s32.totalorder %s36_s29, %s10099_s30  ;;  %p10105_p7 = scmp.lt.s32.totalorder %s10099_s30, %s10099_s30 }
  0x13   :  { %p10106_p8 = por %p10105_p7, %p10104_p6 }
  0x15   :  { %p10107_p9 = pnand %p10106_p8, %p10100_p5 }
  0x17   :  { %10110 = shalt.err (!%p10107_p9)
}
  0x18   :  { %41 = dma.hbm_to_vmem [thread:$0]  %s14852_s3, 6144, %s36_s29, [#allocation6], %s10138_s24, %s10138_s24, %s10139_s25  }
  0x19   :  { %10131 = dma.done.wait [#allocation3], 3072  }
  0x1a   :  { %10132 = vsyncadd [#allocation3], 4294964224 }
  0x1b   :  { %10133 = dma.done.wait [#allocation6], 6144  }
  0x1c   :  { %10134 = vsyncadd [#allocation6], 4294961152  ;;  %v14882_v0 = vmov 0.0   ;;  %vm10142_vm0 = vmmov 0   ;;  %v77_v1 = vld [vmem:[%s14854_s5 + $0x38] sm:$0xff]  ;;  %v76_v2 = vld [vmem:[%s14854_s5 + $0x30] sm:$0xff] }
  0x1d   :  { %7952 = vmatprep.subr.mxu0 %v14882_v0  ;;  %7995 = vmatprep.subr.mxu1 %v14882_v0  ;;  %v75_v3 = vld [vmem:[%s14854_s5 + $0x28] sm:$0xff]  ;;  %vm85_vm1 = vcmask 523264   ;;  %v10206_v4 = vand.u32 4294901760, %v77_v1  ;;  %v10208_v5 = vand.u32 4294901760, %v76_v2  ;;  %v74_v7 = vld [vmem:[%s14854_s5 + $0x20] sm:$0xff]  ;;  %v73_v8 = vld [vmem:[%s14854_s5 + $0x18] sm:$0xff] }
  0x1e   :  { %7968 = vmatprep.mubr.msk.f32.mxu0 %vm10142_vm0, %v14882_v0  ;;  %8011 = vmatprep.mubr.msk.f32.mxu1 %vm10142_vm0, %v14882_v0  ;;  %v10210_v6 = vand.u32 4294901760, %v75_v3  ;;  %v72_v9 = vld [vmem:[%s14854_s5 + $0x10] sm:$0xff]  ;;  %v10221_v10 = vand.u32 4294901760, %v74_v7  ;;  %v10226_v11 = vld [vmem:[%s14849_s0] sm:$0xff]  ;;  %v71_v14 = vld [vmem:[%s14854_s5 + $0x8] sm:$0xff]  ;;  %v10245_v17 = vand.u32 4294901760, %v73_v8 }
  0x1f   :  { %7953 = vmatpush3.msra.mxu0 %v10206_v4  ;;  %v10230_v12 = vsub.f32 %v77_v1, %v10206_v4  ;;  %v10233_v13 = vsub.f32 %v76_v2, %v10208_v5  ;;  %v70_v16 = vld [vmem:[%s14854_s5] sm:$0xff]  ;;  %v10247_v18 = vand.u32 4294901760, %v72_v9  ;;  %v87_v20 = vsel %vm85_vm1, %v10226_v11, 0  ;;  %v10289_v34 = vld [vmem:[%s14849_s0 + $0x8] sm:$0xff]  ;;  %v10321_v48 = vld [vmem:[%s14849_s0 + $0x10] sm:$0xff] }
  0x20   :  { %v10239_v15 = vsub.f32 %v75_v3, %v10210_v6  ;;  %7954 = vmatprep.subr.mxu0 %v14882_v0  ;;  %v10250_v19 = vsub.f32 %v74_v7, %v10221_v10  ;;  %v10258_v24 = vand.u32 4294901760, %v87_v20  ;;  %v10261_v25 = vand.u32 4294901760, %v71_v14  ;;  %v10343_v58 = vld [vmem:[%s14849_s0 + $0x18] sm:$0xff]  ;;  %v10353_v61 = vld [vmem:[%s14849_s0 + $0x20] sm:$0xff]  ;;  %v10371_v7 = vld [vmem:[%s14849_s0 + $0x28] sm:$0xff] }
  0x21   :  { %7955 = vmatpush3.msra.mxu0 %v10208_v5  ;;  %v295_v21 = vand.u32 4294901760, %v10230_v12  ;;  %v302_v22 = vand.u32 4294901760, %v10233_v13  ;;  %v10263_v26 = vand.u32 4294901760, %v70_v16  ;;  %v10281_v32 = vsub.f32 %v73_v8, %v10245_v17 }
  0x22   :  { %v309_v23 = vand.u32 4294901760, %v10239_v15  ;;  %7956 = vmatprep.subr.mxu0 %v14882_v0  ;;  %v316_v27 = vand.u32 4294901760, %v10250_v19  ;;  %v10277_v31 = vsub.f32 %v87_v20, %v10258_v24  ;;  %v10284_v33 = vsub.f32 %v72_v9, %v10247_v18 }
  0x23   :  { %7957 = vmatpush3.msra.mxu0 %v10210_v6  ;;  %v296_v28 = vsub.f32 %v10230_v12, %v295_v21  ;;  %v303_v29 = vsub.f32 %v10233_v13, %v302_v22  ;;  %v323_v40 = vand.u32 4294901760, %v10281_v32  ;;  %v90_v43 = vsel %vm85_vm1, %v10289_v34, 0 }
  0x24   :  { %v310_v30 = vsub.f32 %v10239_v15, %v309_v23  ;;  %7958 = vmatprep.subr.mxu0 %v14882_v0  ;;  %v317_v37 = vsub.f32 %v10250_v19, %v316_v27  ;;  %v188_v38 = vand.u32 4294901760, %v10277_v31  ;;  %v330_v41 = vand.u32 4294901760, %v10284_v33 }
  0x25   :  { %7959 = vmatpush3.msra.mxu0 %v10221_v10  ;;  %v297_v35 = vand.u32 4294901760, %v296_v28  ;;  %v304_v36 = vand.u32 4294901760, %v303_v29  ;;  %v10306_v44 = vsub.f32 %v71_v14, %v10261_v25  ;;  %v10309_v45 = vsub.f32 %v70_v16, %v10263_v26  ;;  %v10387_v29 = vld [vmem:[%s14849_s0 + $0x30] sm:$0xff] }
  0x26   :  { %7960 = vmatprep.subr.mxu0 %v14882_v0  ;;  %v311_v39 = vand.u32 4294901760, %v310_v30  ;;  %v189_v42 = vsub.f32 %v10277_v31, %v188_v38  ;;  %v324_v46 = vsub.f32 %v10281_v32, %v323_v40  ;;  %v10316_v47 = vand.u32 4294901760, %v90_v43 }
  0x27   :  { %7961 = vmatpush3.msra.mxu0 %v10245_v17  ;;  %7996 = vmatpush3.msra.mxu1 %v297_v35  ;;  %v318_v49 = vand.u32 4294901760, %v317_v37  ;;  %v331_v50 = vsub.f32 %v10284_v33, %v330_v41  ;;  %v337_v51 = vand.u32 4294901760, %v10306_v44  ;;  %v14856_v52 = vand.u32 4294901760, %v10309_v45 }
  0x28   :  { %7962 = vmatprep.subr.mxu0 %v14882_v0  ;;  %7997 = vmatprep.subr.mxu1 %v14882_v0  ;;  %v190_v53 = vand.u32 4294901760, %v189_v42  ;;  %v10332_v54 = vsub.f32 %v90_v43, %v10316_v47  ;;  %v325_v55 = vand.u32 4294901760, %v324_v46  ;;  %v93_v57 = vsel %vm85_vm1, %v10321_v48, 0 }
  0x29   :  { %7963 = vmatpush3.msra.mxu0 %v10247_v18  ;;  %7998 = vmatpush3.msra.mxu1 %v304_v36  ;;  %v338_v56 = vsub.f32 %v10306_v44, %v337_v51  ;;  %v10348_v60 = vand.u32 4294901760, %v93_v57  ;;  %v332_v62 = vand.u32 4294901760, %v331_v50  ;;  %v345_v63 = vsub.f32 %v10309_v45, %v14856_v52 }
  0x2a   :  { %7964 = vmatprep.subr.mxu0 %v14882_v0  ;;  %7999 = vmatprep.subr.mxu1 %v14882_v0  ;;  %v198_v59 = vand.u32 4294901760, %v10332_v54  ;;  %v96_v3 = vsel %vm85_vm1, %v10343_v58, 0  ;;  %v99_v14 = vsel %vm85_vm1, %v10353_v61, 0  ;;  %v102_v36 = vsel %vm85_vm1, %v10371_v7, 0 }
  0x2b   :  { %7965 = vmatpush3.msra.mxu0 %v10261_v25  ;;  %8000 = vmatpush3.msra.mxu1 %v311_v39  ;;  %v10364_v2 = vsub.f32 %v93_v57, %v10348_v60  ;;  %v339_v8 = vand.u32 4294901760, %v338_v56  ;;  %v10375_v9 = vand.u32 4294901760, %v96_v3  ;;  %v10382_v28 = vand.u32 4294901760, %v99_v14 }
  0x2c   :  { %7966 = vmatprep.subr.mxu0 %v14882_v0  ;;  %8001 = vmatprep.subr.mxu1 %v14882_v0  ;;  %v199_v1 = vsub.f32 %v10332_v54, %v198_v59  ;;  %v346_v30 = vand.u32 4294901760, %v345_v63  ;;  %v10402_v42 = vand.u32 4294901760, %v102_v36  ;;  %v105_v46 = vsel %vm85_vm1, %v10387_v29, 0 }
  0x2d   :  { %7967 = vmatpush3.msra.mxu0 %v10263_v26  ;;  %8002 = vmatpush3.msra.mxu1 %v318_v49  ;;  %v208_v20 = vand.u32 4294901760, %v10364_v2  ;;  %v10391_v35 = vsub.f32 %v96_v3, %v10375_v9  ;;  %v10400_v39 = vsub.f32 %v99_v14, %v10382_v28  ;;  %v10412_v49 = vld [vmem:[%s14849_s0 + $0x38] sm:$0xff]  ;;  %v10420_v56 = vand.u32 4294901760, %v105_v46 }
  0x2e   :  { %7969 = vmatmul.mubr.f32.vlgmr.msra.gmra.mxu0 %v190_v53  ;;  %8003 = vmatprep.subr.mxu1 %v14882_v0  ;;  %v200_v16 = vand.u32 4294901760, %v199_v1  ;;  %v108_v3 = vsel %vm85_vm1, %v10412_v49, 0 }
  0x2f   :  { %8004 = vmatpush3.msra.mxu1 %v325_v55  ;;  %7971 = vmatprep.mubr.msk.f32.mxu0 %vm10142_vm0, %v14882_v0  ;;  %v209_v37 = vsub.f32 %v10364_v2, %v208_v20  ;;  %v218_v43 = vand.u32 4294901760, %v10391_v35  ;;  %v228_v53 = vand.u32 4294901760, %v10400_v39  ;;  %v10418_v55 = vsub.f32 %v102_v36, %v10402_v42 }
  0x30   :  { %8005 = vmatprep.subr.mxu1 %v14882_v0  ;;  %8038 = vmatprep.subr.mxu0 %v14882_v0  ;;  %v10432_v1 = vsub.f32 %v105_v46, %v10420_v56 }
  0x31   :  { %8006 = vmatpush3.msra.mxu1 %v332_v62  ;;  %8039 = vmatpush3.msra.mxu0 %v10230_v12  ;;  %v210_v50 = vand.u32 4294901760, %v209_v37  ;;  %v219_v57 = vsub.f32 %v10391_v35, %v218_v43  ;;  %v229_v62 = vsub.f32 %v10400_v39, %v228_v53  ;;  %v238_v63 = vand.u32 4294901760, %v10418_v55  ;;  %v1029_v12 = vld [vmem:[#allocation2 + $0x68] sm:$0xff] }
  0x32   :  { %7972 = vmatmul.mubr.f32.gmra.mxu0 %v200_v16  ;;  %8007 = vmatprep.subr.mxu1 %v14882_v0  ;;  %v10444_v16 = vand.u32 4294901760, %v108_v3  ;;  %v248_v46 = vand.u32 4294901760, %v10432_v1 }
  0x33   :  { %8008 = vmatpush3.msra.mxu1 %v339_v8  ;;  %7974 = vmatprep.mubr.msk.f32.mxu0 %vm10142_vm0, %v14882_v0  ;;  %v10439_v8 = vld [vmem:[%s14849_s0 + $0x40] sm:$0xff]  ;;  %v220_v14 = vand.u32 4294901760, %v219_v57  ;;  %v239_v37 = vsub.f32 %v10418_v55, %v238_v63 }
  0x34   :  { %8009 = vmatprep.subr.mxu1 %v14882_v0  ;;  %8040 = vmatprep.subr.mxu0 %v14882_v0  ;;  %v111_v36 = vsel %vm85_vm1, %v10439_v8, 0 }
  0x35   :  { %8010 = vmatpush3.msra.mxu1 %v346_v30  ;;  %8041 = vmatpush3.msra.mxu0 %v10233_v13  ;;  %v230_v30 = vand.u32 4294901760, %v229_v62  ;;  %v10461_v57 = vand.u32 4294901760, %v111_v36  ;;  %v240_v62 = vand.u32 4294901760, %v239_v37 }
  0x36   :  { %7975 = vmatmul.mubr.f32.gmra.mxu0 %v210_v50  ;;  %8012 = vmatmul.mubr.f32.vlgmr.msra.gmra.mxu1 %v10258_v24  ;;  %v10459_v50 = vsub.f32 %v108_v3, %v10444_v16  ;;  %v249_v3 = vsub.f32 %v10432_v1, %v248_v46 }
  0x37   :  { %8081 = vmatprep.subr.mxu1 %v14882_v0  ;;  %7977 = vmatprep.mubr.msk.f32.mxu0 %vm10142_vm0, %v14882_v0  ;;  %v10477_v52 = vsub.f32 %v111_v36, %v10461_v57 }
  0x38   :  { %8082 = vmatpush3.msra.mxu1 %v10206_v4  ;;  %8014 = vmatprep.mubr.msk.f32.mxu1 %vm10142_vm0, %v14882_v0 }
  0x39   :  { %8083 = vmatprep.subr.mxu1 %v14882_v0  ;;  %8042 = vmatprep.subr.mxu0 %v14882_v0  ;;  %v268_v37 = vand.u32 4294901760, %v10477_v52 }
  0x3a   :  { %7978 = vmatmul.mubr.f32.gmra.mxu0 %v220_v14  ;;  %8015 = vmatmul.mubr.f32.gmra.mxu1 %v10316_v47  ;;  %v258_v14 = vand.u32 4294901760, %v10459_v50 }
  0x3b   :  { %8084 = vmatpush3.msra.mxu1 %v10208_v5  ;;  %7980 = vmatprep.mubr.msk.f32.mxu0 %vm10142_vm0, %v14882_v0 }
  0x3c   :  { %8017 = vmatprep.mubr.msk.f32.mxu1 %vm10142_vm0, %v14882_v0  ;;  %8043 = vmatpush3.msra.mxu0 %v10239_v15  ;;  %v259_v36 = vsub.f32 %v10459_v50, %v258_v14  ;;  %v1003_v15 = vlaneseq }
  0x3d   :  { %8085 = vmatprep.subr.mxu1 %v14882_v0  ;;  %8044 = vmatprep.subr.mxu0 %v14882_v0 }
  0x3e   :  { %7981 = vmatmul.mubr.f32.gmra.mxu0 %v230_v30  ;;  %8018 = vmatmul.mubr.f32.gmra.mxu1 %v10348_v60  ;;  %v250_v30 = vand.u32 4294901760, %v249_v3  ;;  %v269_v3 = vsub.f32 %v10477_v52, %v268_v37 }
  0x3f   :  { %8086 = vmatpush3.msra.mxu1 %v10210_v6  ;;  %7983 = vmatprep.mubr.msk.f32.mxu0 %vm10142_vm0, %v14882_v0 }
  0x40   :  { %8020 = vmatprep.mubr.msk.f32.mxu1 %vm10142_vm0, %v14882_v0  ;;  %8045 = vmatpush3.msra.mxu0 %v10250_v19  ;;  %v10632_v19 = vand.u32 4294901760, %v1029_v12 }
  0x41   :  { %8087 = vmatprep.subr.mxu1 %v14882_v0  ;;  %8046 = vmatprep.subr.mxu0 %v14882_v0 }
  0x42   :  { %7984 = vmatmul.mubr.f32.gmra.mxu0 %v240_v62  ;;  %8021 = vmatmul.mubr.f32.gmra.mxu1 %v10375_v9  ;;  %v260_v62 = vand.u32 4294901760, %v259_v36  ;;  %v1024_v36 = vld [vmem:[#allocation2 + $0x40] sm:$0xff] }
  0x43   :  { %7986 = vmatprep.mubr.msk.f32.mxu0 %vm10142_vm0, %v14882_v0  ;;  %8023 = vmatprep.mubr.msk.f32.mxu1 %vm10142_vm0, %v14882_v0 }
  0x44   :  { %8088 = vmatpush3.msra.mxu1 %v10221_v10  ;;  %8047 = vmatpush3.msra.mxu0 %v10281_v32  ;;  %v10655_v32 = vsub.f32 %v1029_v12, %v10632_v19 }
  0x45   :  { %8089 = vmatprep.subr.mxu1 %v14882_v0  ;;  %8048 = vmatprep.subr.mxu0 %v14882_v0 }
  0x46   :  { %7987 = vmatmul.mubr.f32.gmra.mxu0 %v250_v30  ;;  %8024 = vmatmul.mubr.f32.gmra.mxu1 %v10382_v28  ;;  %v270_v30 = vand.u32 4294901760, %v269_v3  ;;  %v10749_v3 = vmax.f32 %v10353_v61, 0.0 }
  0x47   :  { %7989 = vmatprep.mubr.msk.f32.mxu0 %vm10142_vm0, %v14882_v0  ;;  %8026 = vmatprep.mubr.msk.f32.mxu1 %vm10142_vm0, %v14882_v0 }
  0x48   :  { %8090 = vmatpush3.msra.mxu1 %v10245_v17  ;;  %8049 = vmatpush3.msra.mxu0 %v10284_v33  ;;  %v998_v61 = vrot.slane %v10749_v3, 7 }
  0x49   :  { %8091 = vmatprep.subr.mxu1 %v14882_v0  ;;  %8050 = vmatprep.subr.mxu0 %v14882_v0 }
  0x4a   :  { %7990 = vmatmul.mubr.f32.gmra.mxu0 %v260_v62  ;;  %8027 = vmatmul.mubr.f32.gmra.mxu1 %v10402_v42 }
  0x4b   :  { %7992 = vmatprep.mubr.msk.f32.mxu0 %vm10142_vm0, %v14882_v0  ;;  %8029 = vmatprep.mubr.msk.f32.mxu1 %vm10142_vm0, %v14882_v0 }
  0x4c   :  { %8092 = vmatpush3.msra.mxu1 %v10247_v18  ;;  %8051 = vmatpush3.msra.mxu0 %v10306_v44 }
  0x4d   :  { %8052 = vmatprep.subr.mxu0 %v14882_v0  ;;  %8093 = vmatprep.subr.mxu1 %v14882_v0 }
  0x4e   :  { %7993 = vmatmul.mubr.f32.gmra.mxu0 %v270_v30  ;;  %8030 = vmatmul.mubr.f32.gmra.mxu1 %v10420_v56 }
  0x4f   :  { %8032 = vmatprep.mubr.msk.f32.mxu1 %vm10142_vm0, %v14882_v0  ;;  %8053 = vmatpush3.msra.mxu0 %v10309_v45 }
  0x50   :  { %8054 = vmatprep.mubr.msk.f32.mxu0 %vm10142_vm0, %v14882_v0  ;;  %8094 = vmatpush3.msra.mxu1 %v10261_v25 }
  0x51   :  { %8095 = vmatprep.subr.mxu1 %v14882_v0  ;;  %8124 = vmatprep.subr.mxu0 %v14882_v0 }
  0x52   :  { %8033 = vmatmul.mubr.f32.gmra.mxu1 %v10444_v16  ;;  %8055 = vmatmul.mubr.f32.vlgmr.msra.gmra.mxu0 %v10277_v31 }
  0x53   :  { %8035 = vmatprep.mubr.msk.f32.mxu1 %vm10142_vm0, %v14882_v0  ;;  %8057 = vmatprep.mubr.msk.f32.mxu0 %vm10142_vm0, %v14882_v0 }
  0x54   :  { %8096 = vmatpush3.msra.mxu1 %v10263_v26  ;;  %8125 = vmatpush3.msra.mxu0 %v295_v21  ;;  %v1028_v21 = vld [vmem:[#allocation2 + $0x60] sm:$0xff] }
  0x55   :  { %8167 = vmatprep.subr.mxu1 %v14882_v0  ;;  %8126 = vmatprep.subr.mxu0 %v14882_v0  ;;  %v10657_v33 = vand.u32 4294901760, %v1028_v21 }
  0x56   :  { %8036 = vmatmul.mubr.f32.gmra.mxu1 %v10461_v57  ;;  %8058 = vmatmul.mubr.f32.gmra.mxu0 %v10332_v54  ;;  %v1026_v54 = vld [vmem:[#allocation2 + $0x50] sm:$0xff] }
  0x57   :  { %8060 = vmatprep.mubr.msk.f32.mxu0 %vm10142_vm0, %v14882_v0  ;;  %8097 = vmatprep.mubr.msk.f32.mxu1 %vm10142_vm0, %v14882_v0 }
  0x58   :  { %8127 = vmatpush3.msra.mxu0 %v302_v22 }
  0x59   :  { %8128 = vmatprep.subr.mxu0 %v14882_v0 }
  0x5a   :  { %8061 = vmatmul.mubr.f32.gmra.mxu0 %v10364_v2  ;;  %8098 = vmatmul.mubr.f32.vlgmr.msra.gmra.mxu1 %v188_v38 }
  0x5b   :  { %8168 = vmatpush3.msra.mxu1 %v10206_v4  ;;  %8063 = vmatprep.mubr.msk.f32.mxu0 %vm10142_vm0, %v14882_v0  ;;  %v1031_v4 = vld [vmem:[#allocation2 + $0x78] sm:$0xff] }
  0x5c   :  { %8100 = vmatprep.mubr.msk.f32.mxu1 %vm10142_vm0, %v14882_v0  ;;  %8169 = vmatprep.subr.mxu1 %v14882_v0 }
  0x5d   :  { %8170 = vmatpush3.msra.mxu1 %v10208_v5  ;;  %8129 = vmatpush3.msra.mxu0 %v309_v23  ;;  %v1030_v5 = vld [vmem:[#allocation2 + $0x70] sm:$0xff]  ;;  %v10643_v23 = vmax.f32 %v10226_v11, 0.0  ;;  %v1027_v11 = vld [vmem:[#allocation2 + $0x58] sm:$0xff] }
  0x5e   :  { %8064 = vmatmul.mubr.f32.gmra.mxu0 %v10391_v35  ;;  %8101 = vmatmul.mubr.f32.gmra.mxu1 %v198_v59 }
  0x5f   :  { %8066 = vmatprep.mubr.msk.f32.mxu0 %vm10142_vm0, %v14882_v0  ;;  %8103 = vmatprep.mubr.msk.f32.mxu1 %vm10142_vm0, %v14882_v0  ;;  %v14858_v38 = vrot.slane %v10643_v23, 7 }
  0x60   :  { %8171 = vmatprep.subr.mxu1 %v14882_v0  ;;  %8130 = vmatprep.subr.mxu0 %v14882_v0 }
  0x61   :  { %8172 = vmatpush3.msra.mxu1 %v10210_v6  ;;  %8131 = vmatpush3.msra.mxu0 %v316_v27  ;;  %v10605_v6 = vand.u32 4294901760, %v1031_v4  ;;  %v10650_v27 = vshrl.u32 %v1003_v15, 7 }
  0x62   :  { %8067 = vmatmul.mubr.f32.gmra.mxu0 %v10400_v39  ;;  %8104 = vmatmul.mubr.f32.gmra.mxu1 %v208_v20 }
  0x63   :  { %8069 = vmatprep.mubr.msk.f32.mxu0 %vm10142_vm0, %v14882_v0  ;;  %8106 = vmatprep.mubr.msk.f32.mxu1 %vm10142_vm0, %v14882_v0  ;;  %v10622_v13 = vsub.f32 %v1031_v4, %v10605_v6  ;;  %vm1005_vm2 = vcmp.lt.s32.totalorder %v10650_v27, 1  ;;  %vm2857_vm3 = vcmp.lt.s32.totalorder %v10650_v27, 7 }
  0x64   :  { %8173 = vmatprep.subr.mxu1 %v14882_v0  ;;  %8132 = vmatprep.subr.mxu0 %v14882_v0 }
  0x65   :  { %8174 = vmatpush3.msra.mxu1 %v10221_v10  ;;  %8133 = vmatpush3.msra.mxu0 %v323_v40  ;;  %v10612_v10 = vand.u32 4294901760, %v1030_v5  ;;  %v1241_v22 = vand.u32 4294901760, %v10622_v13 }
  0x66   :  { %8070 = vmatmul.mubr.f32.gmra.mxu0 %v10418_v55  ;;  %8107 = vmatmul.mubr.f32.gmra.mxu1 %v218_v43  ;;  %v1033_v55 = vsel %vm85_vm1, %v10643_v23, 0 }
  0x67   :  { %8072 = vmatprep.mubr.msk.f32.mxu0 %vm10142_vm0, %v14882_v0  ;;  %8109 = vmatprep.mubr.msk.f32.mxu1 %vm10142_vm0, %v14882_v0  ;;  %v10745_v62 = vand.u32 4294901760, %v1033_v55 }
  0x68   :  { %8175 = vmatprep.subr.mxu1 %v14882_v0  ;;  %8134 = vmatprep.subr.mxu0 %v14882_v0 }
  0x69   :  { %8176 = vmatpush3.msra.mxu1 %v10245_v17  ;;  %8135 = vmatpush3.msra.mxu0 %v330_v41  ;;  %v15061_v17 = vand.u32 4294901760, %v10309_v45  ;;  %v10673_v41 = vand.u32 4294901760, %v1027_v11  ;;  %v1255_v45 = vand.u32 4294901760, %v10655_v32 }
  0x6a   :  { %8073 = vmatmul.mubr.f32.gmra.mxu0 %v10432_v1  ;;  %8110 = vmatmul.mubr.f32.gmra.mxu1 %v228_v53  ;;  %v1025_v53 = vld [vmem:[#allocation2 + $0x48] sm:$0xff] }
  0x6b   :  { %8075 = vmatprep.mubr.msk.f32.mxu0 %vm10142_vm0, %v14882_v0  ;;  %8112 = vmatprep.mubr.msk.f32.mxu1 %vm10142_vm0, %v14882_v0  ;;  %v1256_v35 = vsub.f32 %v10655_v32, %v1255_v45  ;;  %v10708_v43 = vsub.f32 %v1027_v11, %v10673_v41 }
  0x6c   :  { %8177 = vmatprep.subr.mxu1 %v14882_v0  ;;  %8136 = vmatprep.subr.mxu0 %v14882_v0 }
  0x6d   :  { %8178 = vmatpush3.msra.mxu1 %v10247_v18  ;;  %8137 = vmatpush3.msra.mxu0 %v337_v51  ;;  %v10630_v18 = vsub.f32 %v1030_v5, %v10612_v10  ;;  %v10681_v51 = vsub.f32 %v1028_v21, %v10657_v33  ;;  %v10761_v5 = vand.u32 4294901760, %v1024_v36 }
  0x6e   :  { %8076 = vmatmul.mubr.f32.gmra.mxu0 %v10459_v50  ;;  %8113 = vmatmul.mubr.f32.gmra.mxu1 %v238_v63  ;;  %v10717_v63 = vmax.f32 %v10343_v58, 0.0  ;;  %v10730_v58 = vand.u32 4294901760, %v1025_v53  ;;  %v10733_v50 = vmax.f32 %v10321_v48, 0.0 }
  0x6f   :  { %8078 = vmatprep.mubr.msk.f32.mxu0 %vm10142_vm0, %v14882_v0  ;;  %8115 = vmatprep.mubr.msk.f32.mxu1 %vm10142_vm0, %v14882_v0  ;;  %v1248_v31 = vand.u32 4294901760, %v10630_v18  ;;  %v14866_v39 = vand.u32 4294901760, %v10681_v51 }
  0x70   :  { %8138 = vmatprep.subr.mxu0 %v14882_v0  ;;  %8179 = vmatprep.subr.mxu1 %v14882_v0  ;;  %v14857_v48 = vrot.slane %v10733_v50, 7  ;;  %v10759_v4 = vsub.f32 %v1025_v53, %v10730_v58 }
  0x71   :  { %8139 = vmatpush3.msra.mxu0 %v15061_v17  ;;  %8180 = vmatpush3.msra.mxu1 %v10261_v25  ;;  %v10646_v25 = vmax.f32 %v10439_v8, 0.0  ;;  %v1249_v44 = vsub.f32 %v10630_v18, %v1248_v31  ;;  %v1263_v8 = vsub.f32 %v10681_v51, %v14866_v39  ;;  %v10779_v17 = vmax.f32 %v10371_v7, 0.0 }
  0x72   :  { %8079 = vmatmul.mubr.f32.gmra.mxu0 %v10477_v52  ;;  %8116 = vmatmul.mubr.f32.gmra.mxu1 %v248_v46  ;;  %v10700_v52 = vand.u32 4294901760, %v1026_v54  ;;  %v14862_v46 = vand.u32 4294901760, %v10708_v43  ;;  %v14860_v7 = vand.u32 4294901760, %v10759_v4 }
  0x73   :  { %8118 = vmatprep.mubr.msk.f32.mxu1 %vm10142_vm0, %v14882_v0  ;;  %8140 = vmatprep.mubr.msk.f32.mxu0 %vm10142_vm0, %v14882_v0  ;;  %v1002_v40 = vrot.slane %v10646_v25, 7  ;;  %v1250_v20 = vand.u32 4294901760, %v1249_v44  ;;  %v999_v44 = vrot.slane %v10779_v17, 7 }
  0x74   :  { %8181 = vmatprep.subr.mxu1 %v14882_v0  ;;  %8210 = vmatprep.subr.mxu0 %v14882_v0  ;;  %v10723_v1 = vsub.f32 %v1026_v54, %v10700_v52  ;;  %v1270_v30 = vsub.f32 %v10708_v43, %v14862_v46  ;;  %v10796_v54 = vmax.f32 %v10387_v29, 0.0  ;;  %v1039_v29 = vsel %vm85_vm1, %v10733_v50, 0 }
  0x75   :  { %8182 = vmatpush3.msra.mxu1 %v10263_v26  ;;  %v1242_v26 = vsub.f32 %v10622_v13, %v1241_v22  ;;  %v10693_v59 = vsel %vm1005_vm2, %v1002_v40, %v14858_v38  ;;  %v1048_v38 = vsel %vm85_vm1, %v10779_v17, 0 }
  0x76   :  { %8119 = vmatmul.mubr.f32.gmra.mxu1 %v258_v14  ;;  %8141 = vmatmul.mubr.f32.vlgmr.msra.gmra.mxu0 %v10258_v24  ;;  %v997_v14 = vrot.slane %v10717_v63, 7  ;;  %v1271_v21 = vand.u32 4294901760, %v1270_v30 }
  0x77   :  { %8121 = vmatprep.mubr.msk.f32.mxu1 %vm10142_vm0, %v14882_v0  ;;  %8143 = vmatprep.mubr.msk.f32.mxu0 %vm10142_vm0, %v14882_v0  ;;  %v1243_v2 = vand.u32 4294901760, %v1242_v26  ;;  %v10791_v26 = vsub.f32 %v1024_v36, %v10761_v5  ;;  %v1042_v36 = vsel %vm85_vm1, %v10717_v63, 0 }
  0x78   :  { %8211 = vmatpush3.msra.mxu0 %v10605_v6  ;;  %8253 = vmatprep.subr.mxu1 %v14882_v0  ;;  %v10770_v12 = vsel %vm1005_vm2, %v14857_v48, %v997_v14  ;;  %v1045_v48 = vsel %vm85_vm1, %v10749_v3, 0 }
  0x79   :  { %8212 = vmatprep.subr.mxu0 %v14882_v0 }
  0x7a   :  { %8122 = vmatmul.mubr.f32.gmra.mxu1 %v268_v37  ;;  %8144 = vmatmul.mubr.f32.gmra.mxu0 %v10316_v47  ;;  %v10739_v37 = vmax.f32 %v10289_v34, 0.0  ;;  %v14861_v34 = vand.u32 4294901760, %v10723_v1 }
  0x7b   :  { %8146 = vmatprep.mubr.msk.f32.mxu0 %vm10142_vm0, %v14882_v0  ;;  %8183 = vmatprep.mubr.msk.f32.mxu1 %vm10142_vm0, %v14882_v0 }
  0x7c   :  { %8213 = vmatpush3.msra.mxu0 %v10612_v10  ;;  %v1036_v15 = vsel %vm85_vm1, %v10739_v37, 0  ;;  %v1277_v11 = vsub.f32 %v10723_v1, %v14861_v34  ;;  %v10883_v34 = vand.u32 4294901760, %v1045_v48 }
  0x7d   :  { %8214 = vmatprep.subr.mxu0 %v14882_v0 }
  0x7e   :  { %8147 = vmatmul.mubr.f32.gmra.mxu0 %v10348_v60  ;;  %8184 = vmatmul.mubr.f32.vlgmr.msra.gmra.mxu1 %v10258_v24  ;;  %v1257_v24 = vand.u32 4294901760, %v1256_v35  ;;  %v1000_v35 = vrot.slane %v10796_v54, 7 }
  0x7f   :  { %8254 = vmatpush3.msra.mxu1 %v1243_v2  ;;  %8149 = vmatprep.mubr.msk.f32.mxu0 %vm10142_vm0, %v14882_v0  ;;  %v10800_v2 = vand.u32 4294901760, %v1036_v15 }
  0x80   :  { %8186 = vmatprep.mubr.msk.f32.mxu1 %vm10142_vm0, %v14882_v0  ;;  %8255 = vmatprep.subr.mxu1 %v14882_v0 }
  0x81   :  { %8256 = vmatpush3.msra.mxu1 %v1250_v20  ;;  %8215 = vmatpush3.msra.mxu0 %v10632_v19  ;;  %v10804_v20 = vsel %vm1005_vm2, %v997_v14, %v998_v61  ;;  %v10826_v14 = vand.u32 4294901760, %v1039_v29 }
  0x82   :  { %8150 = vmatmul.mubr.f32.gmra.mxu0 %v10375_v9  ;;  %8187 = vmatmul.mubr.f32.gmra.mxu1 %v10316_v47  ;;  %v1264_v47 = vand.u32 4294901760, %v1263_v8  ;;  %v10824_v8 = vsub.f32 %v1036_v15, %v10800_v2 }
  0x83   :  { %8152 = vmatprep.mubr.msk.f32.mxu0 %vm10142_vm0, %v14882_v0  ;;  %8189 = vmatprep.mubr.msk.f32.mxu1 %vm10142_vm0, %v14882_v0 }
  0x84   :  { %8257 = vmatprep.subr.mxu1 %v14882_v0  ;;  %8216 = vmatprep.subr.mxu0 %v14882_v0 }
  0x85   :  { %8258 = vmatpush3.msra.mxu1 %v1257_v24  ;;  %8217 = vmatpush3.msra.mxu0 %v10657_v33  ;;  %v14859_v24 = vand.u32 4294901760, %v10791_v26 }
  0x86   :  { %8153 = vmatmul.mubr.f32.gmra.mxu0 %v10382_v28  ;;  %8190 = vmatmul.mubr.f32.gmra.mxu1 %v10348_v60  ;;  %v10784_v60 = vsub.f32 %v1033_v55, %v10745_v62  ;;  %v1284_v55 = vsub.f32 %v10759_v4, %v14860_v7 }
  0x87   :  { %8155 = vmatprep.mubr.msk.f32.mxu0 %vm10142_vm0, %v14882_v0  ;;  %8192 = vmatprep.mubr.msk.f32.mxu1 %vm10142_vm0, %v14882_v0  ;;  %v1291_v15 = vsub.f32 %v10791_v26, %v14859_v24 }
  0x88   :  { %8259 = vmatprep.subr.mxu1 %v14882_v0  ;;  %8218 = vmatprep.subr.mxu0 %v14882_v0  ;;  %v1134_v53 = vand.u32 4294901760, %v10784_v60 }
  0x89   :  { %8260 = vmatpush3.msra.mxu1 %v1264_v47  ;;  %8219 = vmatpush3.msra.mxu0 %v10673_v41  ;;  %v10832_v47 = vsel %vm1005_vm2, %v998_v61, %v999_v44  ;;  %v1285_v61 = vand.u32 4294901760, %v1284_v55  ;;  %v10861_v55 = vsel %vm1005_vm2, %v999_v44, %v1000_v35 }
  0x8a   :  { %8156 = vmatmul.mubr.f32.gmra.mxu0 %v10402_v42  ;;  %8193 = vmatmul.mubr.f32.gmra.mxu1 %v10375_v9  ;;  %v1278_v9 = vand.u32 4294901760, %v1277_v11  ;;  %v1135_v30 = vsub.f32 %v10784_v60, %v1134_v53  ;;  %v1144_v11 = vand.u32 4294901760, %v10824_v8 }
  0x8b   :  { %8158 = vmatprep.mubr.msk.f32.mxu0 %vm10142_vm0, %v14882_v0  ;;  %8195 = vmatprep.mubr.msk.f32.mxu1 %vm10142_vm0, %v14882_v0 }
  0x8c   :  { %8261 = vmatprep.subr.mxu1 %v14882_v0  ;;  %8220 = vmatprep.subr.mxu0 %v14882_v0  ;;  %v1145_v24 = vsub.f32 %v10824_v8, %v1144_v11 }
  0x8d   :  { %8262 = vmatpush3.msra.mxu1 %v1271_v21  ;;  %8221 = vmatpush3.msra.mxu0 %v10700_v52  ;;  %v10850_v21 = vand.u32 4294901760, %v1042_v36 }
  0x8e   :  { %8159 = vmatmul.mubr.f32.gmra.mxu0 %v10420_v56  ;;  %8196 = vmatmul.mubr.f32.gmra.mxu1 %v10382_v28  ;;  %v10839_v28 = vmax.f32 %v10412_v49, 0.0 }
  0x8f   :  { %8161 = vmatprep.mubr.msk.f32.mxu0 %vm10142_vm0, %v14882_v0  ;;  %8198 = vmatprep.mubr.msk.f32.mxu1 %vm10142_vm0, %v14882_v0  ;;  %v10873_v44 = vsub.f32 %v1042_v36, %v10850_v21  ;;  %v10896_v36 = vand.u32 4294901760, %v1048_v38 }
  0x90   :  { %8263 = vmatprep.subr.mxu1 %v14882_v0  ;;  %8222 = vmatprep.subr.mxu0 %v14882_v0  ;;  %v1001_v49 = vrot.slane %v10839_v28, 7 }
  0x91   :  { %8264 = vmatpush3.msra.mxu1 %v1278_v9  ;;  %8223 = vmatpush3.msra.mxu0 %v10730_v58  ;;  %v10857_v9 = vsub.f32 %v1039_v29, %v10826_v14  ;;  %v1292_v29 = vand.u32 4294901760, %v1291_v15  ;;  %v10903_v15 = vsub.f32 %v1045_v48, %v10883_v34  ;;  %v10921_v48 = vsub.f32 %v1048_v38, %v10896_v36 }
  0x92   :  { %8162 = vmatmul.mubr.f32.gmra.mxu0 %v10444_v16  ;;  %8199 = vmatmul.mubr.f32.gmra.mxu1 %v10402_v42  ;;  %v1136_v42 = vand.u32 4294901760, %v1135_v30  ;;  %v10887_v30 = vsel %vm1005_vm2, %v1000_v35, %v1001_v49  ;;  %v1146_v35 = vand.u32 4294901760, %v1145_v24 }
  0x93   :  { %8164 = vmatprep.mubr.msk.f32.mxu0 %vm10142_vm0, %v14882_v0  ;;  %8201 = vmatprep.mubr.msk.f32.mxu1 %vm10142_vm0, %v14882_v0  ;;  %v14865_v7 = vand.u32 4294901760, %v10857_v9 }
  0x94   :  { %8224 = vmatprep.subr.mxu0 %v14882_v0  ;;  %8265 = vmatprep.subr.mxu1 %v14882_v0 }
  0x95   :  { %8225 = vmatpush3.msra.mxu0 %v10761_v5  ;;  %8266 = vmatpush3.msra.mxu1 %v1285_v61  ;;  %v1155_v61 = vsub.f32 %v10857_v9, %v14865_v7 }
  0x96   :  { %8165 = vmatmul.mubr.f32.gmra.mxu0 %v10461_v57  ;;  %8202 = vmatmul.mubr.f32.gmra.mxu1 %v10420_v56  ;;  %v14863_v56 = vand.u32 4294901760, %v10873_v44 }
  0x97   :  { %8204 = vmatprep.mubr.msk.f32.mxu1 %vm10142_vm0, %v14882_v0  ;;  %8226 = vmatprep.mubr.msk.f32.mxu0 %vm10142_vm0, %v14882_v0  ;;  %v1156_v24 = vand.u32 4294901760, %v1155_v61  ;;  %v14867_v61 = vand.u32 4294901760, %v10921_v48 }
  0x98   :  { %8267 = vmatprep.subr.mxu1 %v14882_v0  ;;  %8296 = vmatprep.subr.mxu0 %v14882_v0 }
  0x99   :  { %8268 = vmatpush3.msra.mxu1 %v1292_v29  ;;  %v10909_v29 = vsel %vm1005_vm2, %v1001_v49, %v1002_v40  ;;  %v1054_v40 = vsel %vm85_vm1, %v10839_v28, 0  ;;  %v1165_v49 = vsub.f32 %v10873_v44, %v14863_v56 }
  0x9a   :  { %8205 = vmatmul.mubr.f32.gmra.mxu1 %v10444_v16  ;;  %8227 = vmatmul.mubr.f32.vlgmr.msra.gmra.mxu0 %v1136_v42  ;;  %v1051_v16 = vsel %vm85_vm1, %v10796_v54, 0  ;;  %v14864_v42 = vand.u32 4294901760, %v10903_v15 }
  0x9b   :  { %8207 = vmatprep.mubr.msk.f32.mxu1 %vm10142_vm0, %v14882_v0  ;;  %8229 = vmatprep.mubr.msk.f32.mxu0 %vm10142_vm0, %v14882_v0  ;;  %v10930_v46 = vand.u32 4294901760, %v1051_v16  ;;  %v1166_v38 = vand.u32 4294901760, %v1165_v49 }
  0x9c   :  { %8297 = vmatpush3.msra.mxu0 %v10622_v13  ;;  %8339 = vmatprep.subr.mxu1 %v14882_v0  ;;  %v15064_v13 = vand.u32 4294901760, %v10708_v43 }
  0x9d   :  { %8298 = vmatprep.subr.mxu0 %v14882_v0  ;;  %v10946_v56 = vsub.f32 %v1051_v16, %v10930_v46 }
  0x9e   :  { %8208 = vmatmul.mubr.f32.gmra.mxu1 %v10461_v57  ;;  %8230 = vmatmul.mubr.f32.gmra.mxu0 %v1146_v35  ;;  %v10938_v57 = vand.u32 4294901760, %v1054_v40  ;;  %v1175_v35 = vsub.f32 %v10903_v15, %v14864_v42  ;;  %v1185_v42 = vsub.f32 %v10921_v48, %v14867_v61 }
  0x9f   :  { %8232 = vmatprep.mubr.msk.f32.mxu0 %vm10142_vm0, %v14882_v0  ;;  %8269 = vmatprep.mubr.msk.f32.mxu1 %vm10142_vm0, %v14882_v0  ;;  %v1194_v7 = vand.u32 4294901760, %v10946_v56 }
  0xa0   :  { %8299 = vmatpush3.msra.mxu0 %v10630_v18  ;;  %v10959_v16 = vsub.f32 %v1054_v40, %v10938_v57  ;;  %v1176_v49 = vand.u32 4294901760, %v1175_v35  ;;  %v1186_v40 = vand.u32 4294901760, %v1185_v42  ;;  %v15065_v18 = vand.u32 4294901760, %v10873_v44 }
  0xa1   :  { %8300 = vmatprep.subr.mxu0 %v14882_v0 }
  0xa2   :  { %8233 = vmatmul.mubr.f32.gmra.mxu0 %v1156_v24  ;;  %8270 = vmatmul.mubr.f32.vlgmr.msra.gmra.mxu1 %v10745_v62  ;;  %v1057_v24 = vsel %vm85_vm1, %v10646_v25, 0  ;;  %v1204_v35 = vand.u32 4294901760, %v10959_v16 }
  0xa3   :  { %8340 = vmatpush3.msra.mxu1 %v10605_v6  ;;  %8235 = vmatprep.mubr.msk.f32.mxu0 %vm10142_vm0, %v14882_v0  ;;  %v10966_v39 = vand.u32 4294901760, %v1057_v24 }
  0xa4   :  { %8272 = vmatprep.mubr.msk.f32.mxu1 %vm10142_vm0, %v14882_v0  ;;  %8341 = vmatprep.subr.mxu1 %v14882_v0 }
  0xa5   :  { %8342 = vmatpush3.msra.mxu1 %v10612_v10  ;;  %8301 = vmatpush3.msra.mxu0 %v10655_v32  ;;  %v10982_v61 = vsub.f32 %v1057_v24, %v10966_v39  ;;  %v1205_v24 = vsub.f32 %v10959_v16, %v1204_v35  ;;  %v1021_v32 = vld [vmem:[#allocation2 + $0x30] sm:$0xff] }
  0xa6   :  { %8236 = vmatmul.mubr.f32.gmra.mxu0 %v1166_v38  ;;  %8273 = vmatmul.mubr.f32.gmra.mxu1 %v10800_v2  ;;  %v1195_v38 = vsub.f32 %v10946_v56, %v1194_v7 }
  0xa7   :  { %8238 = vmatprep.mubr.msk.f32.mxu0 %vm10142_vm0, %v14882_v0  ;;  %8275 = vmatprep.mubr.msk.f32.mxu1 %vm10142_vm0, %v14882_v0 }
  0xa8   :  { %8343 = vmatprep.subr.mxu1 %v14882_v0  ;;  %8302 = vmatprep.subr.mxu0 %v14882_v0  ;;  %v1196_v42 = vand.u32 4294901760, %v1195_v38 }
  0xa9   :  { %8344 = vmatpush3.msra.mxu1 %v10632_v19  ;;  %8303 = vmatpush3.msra.mxu0 %v10681_v51 }
  0xaa   :  { %8239 = vmatmul.mubr.f32.gmra.mxu0 %v1176_v49  ;;  %8276 = vmatmul.mubr.f32.gmra.mxu1 %v10826_v14  ;;  %v1214_v49 = vand.u32 4294901760, %v10982_v61 }
  0xab   :  { %8241 = vmatprep.mubr.msk.f32.mxu0 %vm10142_vm0, %v14882_v0  ;;  %8278 = vmatprep.mubr.msk.f32.mxu1 %vm10142_vm0, %v14882_v0 }
  0xac   :  { %8345 = vmatprep.subr.mxu1 %v14882_v0  ;;  %8304 = vmatprep.subr.mxu0 %v14882_v0  ;;  %v1215_v38 = vsub.f32 %v10982_v61, %v1214_v49 }
  0xad   :  { %8346 = vmatpush3.msra.mxu1 %v10657_v33  ;;  %8305 = vmatpush3.msra.mxu0 %v10708_v43  ;;  %v15069_v43 = vand.u32 4294901760, %v10921_v48 }
  0xae   :  { %8242 = vmatmul.mubr.f32.gmra.mxu0 %v1186_v40  ;;  %8279 = vmatmul.mubr.f32.gmra.mxu1 %v10850_v21  ;;  %v1206_v40 = vand.u32 4294901760, %v1205_v24 }
  0xaf   :  { %8244 = vmatprep.mubr.msk.f32.mxu0 %vm10142_vm0, %v14882_v0  ;;  %8281 = vmatprep.mubr.msk.f32.mxu1 %vm10142_vm0, %v14882_v0 }
  0xb0   :  { %8347 = vmatprep.subr.mxu1 %v14882_v0  ;;  %8306 = vmatprep.subr.mxu0 %v14882_v0 }
  0xb1   :  { %8348 = vmatpush3.msra.mxu1 %v10673_v41  ;;  %8307 = vmatpush3.msra.mxu0 %v10723_v1 }
  0xb2   :  { %8245 = vmatmul.mubr.f32.gmra.mxu0 %v1196_v42  ;;  %8282 = vmatmul.mubr.f32.gmra.mxu1 %v10883_v34  ;;  %v1216_v42 = vand.u32 4294901760, %v1215_v38  ;;  %v995_v38 = vrot.slane %v10739_v37, 7 }
  0xb3   :  { %8247 = vmatprep.mubr.msk.f32.mxu0 %vm10142_vm0, %v14882_v0  ;;  %8284 = vmatprep.mubr.msk.f32.mxu1 %vm10142_vm0, %v14882_v0 }
  0xb4   :  { %8349 = vmatprep.subr.mxu1 %v14882_v0  ;;  %8308 = vmatprep.subr.mxu0 %v14882_v0 }
  0xb5   :  { %8350 = vmatpush3.msra.mxu1 %v10700_v52  ;;  %8309 = vmatpush3.msra.mxu0 %v10759_v4 }
  0xb6   :  { %8248 = vmatmul.mubr.f32.gmra.mxu0 %v1206_v40  ;;  %8285 = vmatmul.mubr.f32.gmra.mxu1 %v10896_v36 }
  0xb7   :  { %8250 = vmatprep.mubr.msk.f32.mxu0 %vm10142_vm0, %v14882_v0  ;;  %8287 = vmatprep.mubr.msk.f32.mxu1 %vm10142_vm0, %v14882_v0 }
  0xb8   :  { %8310 = vmatprep.subr.mxu0 %v14882_v0  ;;  %8351 = vmatprep.subr.mxu1 %v14882_v0 }
  0xb9   :  { %8311 = vmatpush3.msra.mxu0 %v10791_v26  ;;  %8352 = vmatpush3.msra.mxu1 %v10730_v58 }
  0xba   :  { %8251 = vmatmul.mubr.f32.gmra.mxu0 %v1216_v42  ;;  %8288 = vmatmul.mubr.f32.gmra.mxu1 %v10930_v46  ;;  %v2851_v42 = vrot.slane %v10717_v63, 1 }
  0xbb   :  { %8290 = vmatprep.mubr.msk.f32.mxu1 %vm10142_vm0, %v14882_v0  ;;  %8312 = vmatprep.mubr.msk.f32.mxu0 %vm10142_vm0, %v14882_v0 }
  0xbc   :  { %8353 = vmatprep.subr.mxu1 %v14882_v0  ;;  %8382 = vmatprep.subr.mxu0 %v14882_v0 }
  0xbd   :  { %8354 = vmatpush3.msra.mxu1 %v10761_v5 }
  0xbe   :  { %8291 = vmatmul.mubr.f32.gmra.mxu1 %v10938_v57  ;;  %8313 = vmatmul.mubr.f32.vlgmr.msra.gmra.mxu0 %v10784_v60 }
  0xbf   :  { %8293 = vmatprep.mubr.msk.f32.mxu1 %vm10142_vm0, %v14882_v0  ;;  %8315 = vmatprep.mubr.msk.f32.mxu0 %vm10142_vm0, %v14882_v0 }
  0xc0   :  { %8383 = vmatpush3.msra.mxu0 %v1241_v22  ;;  %8425 = vmatprep.subr.mxu1 %v14882_v0  ;;  %v15066_v22 = vand.u32 4294901760, %v10723_v1 }
  0xc1   :  { %8384 = vmatprep.subr.mxu0 %v14882_v0 }
  0xc2   :  { %8294 = vmatmul.mubr.f32.gmra.mxu1 %v10966_v39  ;;  %8316 = vmatmul.mubr.f32.gmra.mxu0 %v10824_v8 }
  0xc3   :  { %8318 = vmatprep.mubr.msk.f32.mxu0 %vm10142_vm0, %v14882_v0  ;;  %8355 = vmatprep.mubr.msk.f32.mxu1 %vm10142_vm0, %v14882_v0 }
  0xc4   :  { %8385 = vmatpush3.msra.mxu0 %v1248_v31  ;;  %v15067_v31 = vand.u32 4294901760, %v10903_v15 }
  0xc5   :  { %8386 = vmatprep.subr.mxu0 %v14882_v0 }
  0xc6   :  { %8319 = vmatmul.mubr.f32.gmra.mxu0 %v10857_v9  ;;  %8356 = vmatmul.mubr.f32.vlgmr.msra.gmra.mxu1 %v1134_v53  ;;  %v1019_v53 = vld [vmem:[#allocation2 + $0x20] sm:$0xff] }
  0xc7   :  { %8426 = vmatpush3.msra.mxu1 %v10605_v6  ;;  %8321 = vmatprep.mubr.msk.f32.mxu0 %vm10142_vm0, %v14882_v0  ;;  %v15062_v6 = vand.u32 4294901760, %v10681_v51  ;;  %v1020_v51 = vld [vmem:[#allocation2 + $0x28] sm:$0xff]  ;;  %v11150_v8 = vand.u32 4294901760, %v1019_v53 }
  0xc8   :  { %8358 = vmatprep.mubr.msk.f32.mxu1 %vm10142_vm0, %v14882_v0  ;;  %8427 = vmatprep.subr.mxu1 %v14882_v0 }
  0xc9   :  { %8428 = vmatpush3.msra.mxu1 %v10612_v10  ;;  %8387 = vmatpush3.msra.mxu0 %v1255_v45  ;;  %v15063_v10 = vand.u32 4294901760, %v10857_v9  ;;  %v11115_v45 = vand.u32 4294901760, %v1021_v32 }
  0xca   :  { %8322 = vmatmul.mubr.f32.gmra.mxu0 %v10873_v44  ;;  %8359 = vmatmul.mubr.f32.gmra.mxu1 %v1144_v11  ;;  %v1018_v11 = vld [vmem:[#allocation2 + $0x18] sm:$0xff]  ;;  %v11168_v44 = vsub.f32 %v1019_v53, %v11150_v8 }
  0xcb   :  { %8324 = vmatprep.mubr.msk.f32.mxu0 %vm10142_vm0, %v14882_v0  ;;  %8361 = vmatprep.mubr.msk.f32.mxu1 %vm10142_vm0, %v14882_v0  ;;  %v11135_v60 = vsub.f32 %v1021_v32, %v11115_v45 }
  0xcc   :  { %8429 = vmatprep.subr.mxu1 %v14882_v0  ;;  %8388 = vmatprep.subr.mxu0 %v14882_v0  ;;  %v14872_v24 = vand.u32 4294901760, %v11168_v44 }
  0xcd   :  { %8430 = vmatpush3.msra.mxu1 %v10632_v19  ;;  %8389 = vmatpush3.msra.mxu0 %v15062_v6  ;;  %v1022_v19 = vld [vmem:[#allocation2 + $0x38] sm:$0xff]  ;;  %v1016_v6 = vld [vmem:[#allocation2 + $0x8] sm:$0xff] }
  0xce   :  { %8325 = vmatmul.mubr.f32.gmra.mxu0 %v10903_v15  ;;  %8362 = vmatmul.mubr.f32.gmra.mxu1 %v15063_v10  ;;  %v11174_v15 = vand.u32 4294901760, %v1018_v11  ;;  %v14868_v10 = vrot.slane %v10733_v50, 1  ;;  %v2171_v63 = vsub.f32 %v11168_v44, %v14872_v24 }
  0xcf   :  { %8327 = vmatprep.mubr.msk.f32.mxu0 %vm10142_vm0, %v14882_v0  ;;  %8364 = vmatprep.mubr.msk.f32.mxu1 %vm10142_vm0, %v14882_v0 }
  0xd0   :  { %8431 = vmatprep.subr.mxu1 %v14882_v0  ;;  %8390 = vmatprep.subr.mxu0 %v14882_v0 }
  0xd1   :  { %8432 = vmatpush3.msra.mxu1 %v10657_v33  ;;  %8391 = vmatpush3.msra.mxu0 %v15064_v13  ;;  %v11108_v33 = vand.u32 4294901760, %v1022_v19 }
  0xd2   :  { %8328 = vmatmul.mubr.f32.gmra.mxu0 %v10921_v48  ;;  %8365 = vmatmul.mubr.f32.gmra.mxu1 %v15065_v18  ;;  %v1017_v48 = vld [vmem:[#allocation2 + $0x10] sm:$0xff] }
  0xd3   :  { %8330 = vmatprep.mubr.msk.f32.mxu0 %vm10142_vm0, %v14882_v0  ;;  %8367 = vmatprep.mubr.msk.f32.mxu1 %vm10142_vm0, %v14882_v0  ;;  %v11125_v1 = vsub.f32 %v1022_v19, %v11108_v33  ;;  %v11192_v40 = vand.u32 4294901760, %v1017_v48 }
  0xd4   :  { %8433 = vmatprep.subr.mxu1 %v14882_v0  ;;  %8392 = vmatprep.subr.mxu0 %v14882_v0 }
  0xd5   :  { %8434 = vmatpush3.msra.mxu1 %v10673_v41  ;;  %8393 = vmatpush3.msra.mxu0 %v15066_v22  ;;  %v15068_v41 = vand.u32 4294901760, %v10759_v4  ;;  %v15070_v4 = vand.u32 4294901760, %v10791_v26  ;;  %v14880_v26 = vand.u32 4294901760, %v11125_v1  ;;  %v11213_v19 = vsub.f32 %v1017_v48, %v11192_v40 }
  0xd6   :  { %8331 = vmatmul.mubr.f32.gmra.mxu0 %v10946_v56  ;;  %8368 = vmatmul.mubr.f32.gmra.mxu1 %v15067_v31  ;;  %v11215_v22 = vand.u32 4294901760, %v1016_v6  ;;  %v15071_v31 = vrot.slane %v10643_v23, 7 }
  0xd7   :  { %8333 = vmatprep.mubr.msk.f32.mxu0 %vm10142_vm0, %v14882_v0  ;;  %8370 = vmatprep.mubr.msk.f32.mxu1 %vm10142_vm0, %v14882_v0  ;;  %v2150_v9 = vsub.f32 %v11125_v1, %v14880_v26 }
  0xd8   :  { %8435 = vmatprep.subr.mxu1 %v14882_v0  ;;  %8394 = vmatprep.subr.mxu0 %v14882_v0  ;;  %v1013_v32 = vsel %vm1005_vm2, %v15071_v31, %v995_v38  ;;  %v11250_v48 = vsub.f32 %v1016_v6, %v11215_v22 }
  0xd9   :  { %8436 = vmatpush3.msra.mxu1 %v10700_v52  ;;  %8395 = vmatpush3.msra.mxu0 %v15068_v41  ;;  %v11129_v52 = vand.u32 4294901760, %v1020_v51  ;;  %v2852_v41 = vrot.slane %v10749_v3, 1  ;;  %v11237_v3 = vld [vmem:[%s14853_s4] ss:$0 sm:$0xff] }
  0xda   :  { %8334 = vmatmul.mubr.f32.gmra.mxu0 %v10959_v16  ;;  %8371 = vmatmul.mubr.f32.gmra.mxu1 %v15069_v43  ;;  %v2151_v16 = vand.u32 4294901760, %v2150_v9  ;;  %v11228_v43 = vsel %vm2857_vm3, %v14868_v10, %v2851_v42 }
  0xdb   :  { %8336 = vmatprep.mubr.msk.f32.mxu0 %vm10142_vm0, %v14882_v0  ;;  %8373 = vmatprep.mubr.msk.f32.mxu1 %vm10142_vm0, %v14882_v0 }
  0xdc   :  { %8396 = vmatprep.subr.mxu0 %v14882_v0  ;;  %8437 = vmatprep.subr.mxu1 %v14882_v0 }
  0xdd   :  { %8397 = vmatpush3.msra.mxu0 %v15070_v4  ;;  %8438 = vmatpush3.msra.mxu1 %v10730_v58  ;;  %v11148_v58 = vsub.f32 %v1020_v51, %v11129_v52 }
  0xde   :  { %8337 = vmatmul.mubr.f32.gmra.mxu0 %v10982_v61  ;;  %8374 = vmatmul.mubr.f32.gmra.mxu1 %v1194_v7  ;;  %v14877_v7 = vand.u32 4294901760, %v11135_v60 }
  0xdf   :  { %8376 = vmatprep.mubr.msk.f32.mxu1 %vm10142_vm0, %v14882_v0  ;;  %8398 = vmatprep.mubr.msk.f32.mxu0 %vm10142_vm0, %v14882_v0 }
  0xe0   :  { %8439 = vmatprep.subr.mxu1 %v14882_v0  ;;  %8468 = vmatprep.subr.mxu0 %v14882_v0  ;;  %v2157_v56 = vsub.f32 %v11135_v60, %v14877_v7 }
  0xe1   :  { %8440 = vmatpush3.msra.mxu1 %v10761_v5  ;;  %v14874_v5 = vand.u32 4294901760, %v11148_v58 }
  0xe2   :  { %8377 = vmatmul.mubr.f32.gmra.mxu1 %v1204_v35  ;;  %8399 = vmatmul.mubr.f32.vlgmr.msra.gmra.mxu0 %v10745_v62  ;;  %v2158_v61 = vand.u32 4294901760, %v2157_v56  ;;  %v14871_v56 = vand.u32 4294901760, %v11213_v19 }
  0xe3   :  { %8379 = vmatprep.mubr.msk.f32.mxu1 %vm10142_vm0, %v14882_v0  ;;  %8401 = vmatprep.mubr.msk.f32.mxu0 %vm10142_vm0, %v14882_v0  ;;  %v2164_v35 = vsub.f32 %v11148_v58, %v14874_v5 }
  0xe4   :  { %8469 = vmatpush3.msra.mxu0 %v11108_v33  ;;  %8511 = vmatprep.subr.mxu1 %v14882_v0 }
  0xe5   :  { %8470 = vmatprep.subr.mxu0 %v14882_v0  ;;  %v2165_v13 = vand.u32 4294901760, %v2164_v35  ;;  %v2853_v35 = vrot.slane %v10779_v17, 1 }
  0xe6   :  { %8380 = vmatmul.mubr.f32.gmra.mxu1 %v1214_v49  ;;  %8402 = vmatmul.mubr.f32.gmra.mxu0 %v10800_v2  ;;  %v11190_v49 = vsub.f32 %v1018_v11, %v11174_v15  ;;  %v1944_v11 = vsel %vm85_vm1, %v1013_v32, 0 }
  0xe7   :  { %8404 = vmatprep.mubr.msk.f32.mxu0 %vm10142_vm0, %v14882_v0  ;;  %8441 = vmatprep.mubr.msk.f32.mxu1 %vm10142_vm0, %v14882_v0 }
  0xe8   :  { %8471 = vmatpush3.msra.mxu0 %v11115_v45  ;;  %v14869_v18 = vand.u32 4294901760, %v11190_v49 }
  0xe9   :  { %8472 = vmatprep.subr.mxu0 %v14882_v0 }
  0xea   :  { %8405 = vmatmul.mubr.f32.gmra.mxu0 %v10826_v14  ;;  %8442 = vmatmul.mubr.f32.vlgmr.msra.gmra.mxu1 %v10745_v62  ;;  %v1941_v62 = vsel %vm85_vm1, %v10693_v59, 0  ;;  %v1015_v59 = vld [vmem:[#allocation2] sm:$0xff]  ;;  %v2178_v9 = vsub.f32 %v11190_v49, %v14869_v18 }
  0xeb   :  { %8512 = vmatpush3.msra.mxu1 %v2151_v16  ;;  %8407 = vmatprep.mubr.msk.f32.mxu0 %vm10142_vm0, %v14882_v0  ;;  %v11241_v53 = vand.u32 4294901760, %v1941_v62  ;;  %v11252_v16 = vand.u32 4294901760, %v1015_v59 }
  0xec   :  { %8444 = vmatprep.mubr.msk.f32.mxu1 %vm10142_vm0, %v14882_v0  ;;  %8513 = vmatprep.subr.mxu1 %v14882_v0  ;;  %v2179_v32 = vand.u32 4294901760, %v2178_v9 }
  0xed   :  { %8514 = vmatpush3.msra.mxu1 %v2158_v61  ;;  %8473 = vmatpush3.msra.mxu0 %v11129_v52  ;;  %v11269_v17 = vsub.f32 %v1941_v62, %v11241_v53  ;;  %v14870_v62 = vand.u32 4294901760, %v11250_v48 }
  0xee   :  { %v192_v51 = vpop.f32.mrf.mxu0  ;;  %8408 = vmatmul.mubr.f32.gmra.mxu0 %v10850_v21  ;;  %8445 = vmatmul.mubr.f32.gmra.mxu1 %v10800_v2  ;;  %v2172_v2 = vand.u32 4294901760, %v2171_v63 }
  0xef   :  { %8410 = vmatprep.mubr.msk.f32.mxu0 %vm10142_vm0, %v14882_v0  ;;  %8447 = vmatprep.mubr.msk.f32.mxu1 %vm10142_vm0, %v14882_v0  ;;  %v193_v63 = vadd.f32 %v11237_v3, %v192_v51  ;;  %v2185_v51 = vsub.f32 %v11213_v19, %v14871_v56 }
  0xf0   :  { %v7970_v4 = vpop.f32.mrf.mxu0  ;;  %8515 = vmatprep.subr.mxu1 %v14882_v0  ;;  %8474 = vmatprep.subr.mxu0 %v14882_v0 }
  0xf1   :  { %8516 = vmatpush3.msra.mxu1 %v2165_v13  ;;  %8475 = vmatpush3.msra.mxu0 %v11150_v8  ;;  %v11259_v13 = vsel %vm2857_vm3, %v2851_v42, %v2852_v41  ;;  %v15072_v42 = vrot.slane %v10733_v50, 7  ;;  %v11282_v4 = vsub.f32 %v1015_v59, %v11252_v16 }
  0xf2   :  { %v202_v61 = vpop.f32.mrf.mxu0  ;;  %8411 = vmatmul.mubr.f32.gmra.mxu0 %v10883_v34  ;;  %8448 = vmatmul.mubr.f32.gmra.mxu1 %v10826_v14  ;;  %v11271_v14 = vand.u32 4294901760, %v1944_v11 }
  0xf3   :  { %8413 = vmatprep.mubr.msk.f32.mxu0 %vm10142_vm0, %v14882_v0  ;;  %8450 = vmatprep.mubr.msk.f32.mxu1 %vm10142_vm0, %v14882_v0  ;;  %v1012_v31 = vsel %vm1005_vm2, %v995_v38, %v15072_v42  ;;  %v11290_v38 = vsel %vm2857_vm3, %v2852_v41, %v2853_v35  ;;  %v2192_v41 = vsub.f32 %v11250_v48, %v14870_v62 }
  0xf4   :  { %v7973_v6 = vpop.f32.mrf.mxu0  ;;  %8517 = vmatprep.subr.mxu1 %v14882_v0  ;;  %8476 = vmatprep.subr.mxu0 %v14882_v0 }
  0xf5   :  { %8518 = vmatpush3.msra.mxu1 %v2172_v2  ;;  %8477 = vmatpush3.msra.mxu0 %v11174_v15  ;;  %v2854_v6 = vrot.slane %v10796_v54, 1  ;;  %v203_v2 = vadd.f32 %v11237_v3, %v202_v61  ;;  %v1947_v54 = vsel %vm85_vm1, %v1012_v31, 0  ;;  %v11308_v61 = vsub.f32 %v1944_v11, %v11271_v14 }
  0xf6   :  { %v212_v10 = vpop.f32.mrf.mxu0  ;;  %v383_v18 = vpop.f32.mrf.mxu1  ;;  %8414 = vmatmul.mubr.f32.gmra.mxu0 %v10896_v36  ;;  %8451 = vmatmul.mubr.f32.gmra.mxu1 %v10850_v21  ;;  %v14875_v21 = vand.u32 4294901760, %v11269_v17  ;;  %v2855_v31 = vrot.slane %v10839_v28, 1  ;;  %v1950_v28 = vsel %vm85_vm1, %v10770_v12, 0 }
  0xf7   :  { %v11293_v9 = vadd.f32 %v383_v18, %v193_v63  ;;  %8416 = vmatprep.mubr.msk.f32.mxu0 %vm10142_vm0, %v14882_v0  ;;  %8453 = vmatprep.mubr.msk.f32.mxu1 %vm10142_vm0, %v14882_v0  ;;  %v2186_v18 = vand.u32 4294901760, %v2185_v51  ;;  %v14873_v63 = vand.u32 4294901760, %v11282_v4  ;;  %v11318_v51 = vsel %vm2857_vm3, %v2853_v35, %v2854_v6 }
  0xf8   :  { %v7976_v59 = vpop.f32.mrf.mxu0  ;;  %v8013_v42 = vpop.f32.mrf.mxu1  ;;  %8519 = vmatprep.subr.mxu1 %v14882_v0  ;;  %8478 = vmatprep.subr.mxu0 %v14882_v0  ;;  %v213_v62 = vadd.f32 %v11237_v3, %v212_v10  ;;  %v2043_v10 = vsub.f32 %v11269_v17, %v14875_v21  ;;  %v2193_v35 = vand.u32 4294901760, %v2192_v41  ;;  %v1953_v41 = vsel %vm85_vm1, %v10804_v20, 0 }
  0xf9   :  { %8520 = vmatpush3.msra.mxu1 %v2179_v32  ;;  %8479 = vmatpush3.msra.mxu0 %v11192_v40  ;;  %v11314_v32 = vand.u32 4294901760, %v1947_v54 }
  0xfa   :  { %v222_v59 = vpop.f32.mrf.mxu0  ;;  %v389_v42 = vpop.f32.mrf.mxu1  ;;  %8417 = vmatmul.mubr.f32.gmra.mxu0 %v10930_v46  ;;  %8454 = vmatmul.mubr.f32.gmra.mxu1 %v10883_v34  ;;  %v2856_v34 = vrot.slane %v10646_v25, 1  ;;  %v2199_v25 = vsub.f32 %v11282_v4, %v14873_v63 }
  0xfb   :  { %v11321_v11 = vadd.f32 %v389_v42, %v203_v2  ;;  %8419 = vmatprep.mubr.msk.f32.mxu0 %vm10142_vm0, %v14882_v0  ;;  %8456 = vmatprep.mubr.msk.f32.mxu1 %vm10142_vm0, %v14882_v0  ;;  %v14876_v2 = vand.u32 4294901760, %v11308_v61  ;;  %v11351_v42 = vsel %vm2857_vm3, %v2854_v6, %v2855_v31  ;;  %v223_v63 = vadd.f32 %v11237_v3, %v222_v59 }
  0xfc   :  { %v7979_v56 = vpop.f32.mrf.mxu0  ;;  %v8016_v24 = vpop.f32.mrf.mxu1  ;;  %8521 = vmatprep.subr.mxu1 %v14882_v0  ;;  %8480 = vmatprep.subr.mxu0 %v14882_v0  ;;  %15073 = vst [vmem:[#allocation11_spill] sm:$0xff] %v11351_v42  ;;  %v11366_v6 = vand.u32 4294901760, %v1953_v41 }
  0xfd   :  { %8522 = vmatpush3.msra.mxu1 %v2186_v18  ;;  %8481 = vmatpush3.msra.mxu0 %v11215_v22  ;;  %v11343_v56 = vsub.f32 %v1947_v54, %v11314_v32  ;;  %v11345_v18 = vand.u32 4294901760, %v1950_v28  ;;  %v2053_v20 = vsub.f32 %v11308_v61, %v14876_v2 }
  0xfe   :  { %v232_v12 = vpop.f32.mrf.mxu0  ;;  %v395_v24 = vpop.f32.mrf.mxu1  ;;  %8420 = vmatmul.mubr.f32.gmra.mxu0 %v10938_v57  ;;  %8457 = vmatmul.mubr.f32.gmra.mxu1 %v10896_v36 }
  0xff   :  { %v11354_v5 = vadd.f32 %v395_v24, %v213_v62  ;;  %8422 = vmatprep.mubr.msk.f32.mxu0 %vm10142_vm0, %v14882_v0  ;;  %8459 = vmatprep.mubr.msk.f32.mxu1 %vm10142_vm0, %v14882_v0  ;;  %v2200_v62 = vand.u32 4294901760, %v2199_v25  ;;  %v11372_v21 = vsub.f32 %v1950_v28, %v11345_v18  ;;  %v233_v25 = vadd.f32 %v11237_v3, %v232_v12 }
 0x100   :  { %v7982_v36 = vpop.f32.mrf.mxu0  ;;  %v8019_v54 = vpop.f32.mrf.mxu1  ;;  %8482 = vmatprep.subr.mxu0 %v14882_v0  ;;  %8523 = vmatprep.subr.mxu1 %v14882_v0  ;;  %v14879_v28 = vrot.slane %v10643_v23, 1 }
 0x101   :  { %8483 = vmatpush3.msra.mxu0 %v11252_v16  ;;  %8524 = vmatpush3.msra.mxu1 %v2193_v35  ;;  %v2044_v36 = vand.u32 4294901760, %v2043_v10  ;;  %v14878_v54 = vand.u32 4294901760, %v11343_v56  ;;  %v11376_v35 = vsel %vm2857_vm3, %v2855_v31, %v2856_v34  ;;  %v2054_v31 = vand.u32 4294901760, %v2053_v20 }
 0x102   :  { %v242_v59 = vpop.f32.mrf.mxu0  ;;  %v401_v24 = vpop.f32.mrf.mxu1  ;;  %8423 = vmatmul.mubr.f32.gmra.mxu0 %v10966_v39  ;;  %8460 = vmatmul.mubr.f32.gmra.mxu1 %v10930_v46  ;;  %15074 = vst [vmem:[#allocation12_spill] sm:$0xff] %v11376_v35  ;;  %v1956_v46 = vsel %vm85_vm1, %v10832_v47, 0  ;;  %v11404_v20 = vsel %vm2857_vm3, %v2856_v34, %v14879_v28 }
 0x103   :  { %v11379_v2 = vadd.f32 %v401_v24, %v223_v63  ;;  %8462 = vmatprep.mubr.msk.f32.mxu1 %vm10142_vm0, %v14882_v0  ;;  %8484 = vmatprep.mubr.msk.f32.mxu0 %vm10142_vm0, %v14882_v0  ;;  %v11391_v63 = vsub.f32 %v1953_v41, %v11366_v6  ;;  %v2063_v47 = vsub.f32 %v11343_v56, %v14878_v54 }
 0x104   :  { %v7985_v10 = vpop.f32.mrf.mxu0  ;;  %v8022_v7 = vpop.f32.mrf.mxu1  ;;  %8525 = vmatprep.subr.mxu1 %v14882_v0  ;;  %8554 = vmatprep.subr.mxu0 %v14882_v0  ;;  %15075 = vst [vmem:[#allocation13_spill] sm:$0xff] %v11404_v20  ;;  %v243_v41 = vadd.f32 %v11237_v3, %v242_v59 }
 0x105   :  { %8526 = vmatpush3.msra.mxu1 %v2200_v62  ;;  %v14881_v7 = vand.u32 4294901760, %v11372_v21  ;;  %v11398_v10 = vand.u32 4294901760, %v1956_v46  ;;  %v14884_v34 = vand.u32 4294901760, %v11391_v63 }
 0x106   :  { %v252_v12 = vpop.f32.mrf.mxu0  ;;  %v407_v24 = vpop.f32.mrf.mxu1  ;;  %8463 = vmatmul.mubr.f32.gmra.mxu1 %v10938_v57  ;;  %8485 = vmatmul.mubr.f32.vlgmr.msra.gmra.mxu0 %v2044_v36  ;;  %v1959_v57 = vsel %vm85_vm1, %v10861_v55, 0 }
 0x107   :  { %v11407_v62 = vadd.f32 %v407_v24, %v233_v25  ;;  %8465 = vmatprep.mubr.msk.f32.mxu1 %vm10142_vm0, %v14882_v0  ;;  %8487 = vmatprep.mubr.msk.f32.mxu0 %vm10142_vm0, %v14882_v0  ;;  %v2064_v24 = vand.u32 4294901760, %v2063_v47  ;;  %v2073_v55 = vsub.f32 %v11372_v21, %v14881_v7  ;;  %v253_v28 = vadd.f32 %v11237_v3, %v252_v12 }
 0x108   :  { %v7988_v36 = vpop.f32.mrf.mxu0  ;;  %v8025_v54 = vpop.f32.mrf.mxu1  ;;  %8555 = vmatpush3.msra.mxu0 %v11125_v1  ;;  %8597 = vmatprep.subr.mxu1 %v14882_v0 }
 0x109   :  { %8556 = vmatprep.subr.mxu0 %v14882_v0  ;;  %v11424_v54 = vsub.f32 %v1956_v46, %v11398_v10  ;;  %v11426_v36 = vand.u32 4294901760, %v1959_v57  ;;  %v2083_v46 = vsub.f32 %v11391_v63, %v14884_v34  ;;  %v15076_v34 = vmov 0.0  }
 0x10a   :  { %v262_v59 = vpop.f32.mrf.mxu0  ;;  %v413_v25 = vpop.f32.mrf.mxu1  ;;  %8466 = vmatmul.mubr.f32.gmra.mxu1 %v10966_v39  ;;  %8488 = vmatmul.mubr.f32.gmra.mxu0 %v2054_v31  ;;  %v1962_v39 = vsel %vm85_vm1, %v10887_v30, 0 }
 0x10b   :  { %v11429_v26 = vadd.f32 %v413_v25, %v243_v41  ;;  %8490 = vmatprep.mubr.msk.f32.mxu0 %vm10142_vm0, %v14882_v0  ;;  %8527 = vmatprep.mubr.msk.f32.mxu1 %vm10142_vm0, %v14882_v0  ;;  %v2074_v25 = vand.u32 4294901760, %v2073_v55  ;;  %v14885_v7 = vand.u32 4294901760, %v11424_v54  ;;  %v11445_v30 = vsub.f32 %v1959_v57, %v11426_v36 }
 0x10c   :  { %v7991_v31 = vpop.f32.mrf.mxu0  ;;  %v8028_v47 = vpop.f32.mrf.mxu1  ;;  %8557 = vmatpush3.msra.mxu0 %v11135_v60  ;;  %v2084_v57 = vand.u32 4294901760, %v2083_v46 }
 0x10d   :  { %8558 = vmatprep.subr.mxu0 %v14882_v0  ;;  %v11447_v31 = vand.u32 4294901760, %v1962_v39  ;;  %v263_v47 = vadd.f32 %v11237_v3, %v262_v59 }
 0x10e   :  { %v272_v12 = vpop.f32.mrf.mxu0  ;;  %v419_v41 = vpop.f32.mrf.mxu1  ;;  %8491 = vmatmul.mubr.f32.gmra.mxu0 %v2064_v24  ;;  %8528 = vmatmul.mubr.f32.vlgmr.msra.gmra.mxu1 %v11241_v53  ;;  %v1965_v24 = vsel %vm85_vm1, %v10909_v29, 0  ;;  %v2093_v29 = vsub.f32 %v11424_v54, %v14885_v7 }
 0x10f   :  { %v11450_v0 = vadd.f32 %v419_v41, %v253_v28  ;;  %8598 = vmatpush3.msra.mxu1 %v11108_v33  ;;  %8493 = vmatprep.mubr.msk.f32.mxu0 %vm10142_vm0, %v15076_v34  ;;  %v11468_v41 = vsub.f32 %v1962_v39, %v11447_v31  ;;  %v273_v46 = vadd.f32 %v11237_v3, %v272_v12 }
 0x110   :  { %v7994_v55 = vpop.f32.mrf.mxu0  ;;  %v8031_v20 = vpop.f32.mrf.mxu1  ;;  %8530 = vmatprep.mubr.msk.f32.mxu1 %vm10142_vm0, %v15076_v34  ;;  %8599 = vmatprep.subr.mxu1 %v15076_v34 }
 0x111   :  { %8600 = vmatpush3.msra.mxu1 %v11115_v45  ;;  %8559 = vmatpush3.msra.mxu0 %v11148_v58  ;;  %v2102_v20 = vand.u32 4294901760, %v11445_v30  ;;  %v11470_v55 = vand.u32 4294901760, %v1965_v24 }
 0x112   :  { %v425_v28 = vpop.f32.mrf.mxu1  ;;  %v519_v59 = vpop.f32.mrf.mxu0  ;;  %8494 = vmatmul.mubr.f32.gmra.mxu0 %v2074_v25  ;;  %8531 = vmatmul.mubr.f32.gmra.mxu1 %v11271_v14 }
 0x113   :  { %v11473_v35 = vadd.f32 %v425_v28, %v263_v47  ;;  %v520_v42 = vadd.f32 %v519_v59, %v11293_v9  ;;  %8496 = vmatprep.mubr.msk.f32.mxu0 %vm10142_vm0, %v15076_v34  ;;  %8533 = vmatprep.mubr.msk.f32.mxu1 %vm10142_vm0, %v15076_v34  ;;  %v2094_v9 = vand.u32 4294901760, %v2093_v29  ;;  %v2103_v12 = vsub.f32 %v11445_v30, %v2102_v20 }
 0x114   :  { %v8034_v25 = vpop.f32.mrf.mxu1  ;;  %v8056_v7 = vpop.f32.mrf.mxu0  ;;  %8601 = vmatprep.subr.mxu1 %v15076_v34  ;;  %8560 = vmatprep.subr.mxu0 %v15076_v34  ;;  %v11490_v47 = vsub.f32 %v1965_v24, %v11470_v55 }
 0x115   :  { %8602 = vmatpush3.msra.mxu1 %v11129_v52  ;;  %8561 = vmatpush3.msra.mxu0 %v11168_v44  ;;  %v14886_v7 = vand.u32 4294901760, %v11468_v41 }
 0x116   :  { %v431_v3 = vpop.f32.mrf.mxu1  ;;  %v526_v39 = vpop.f32.mrf.mxu0  ;;  %8497 = vmatmul.mubr.f32.gmra.mxu0 %v2084_v57  ;;  %8534 = vmatmul.mubr.f32.gmra.mxu1 %v11314_v32 }
 0x117   :  { %v11492_v28 = vadd.f32 %v431_v3, %v273_v46  ;;  %v527_v59 = vadd.f32 %v526_v39, %v11321_v11  ;;  %8499 = vmatprep.mubr.msk.f32.mxu0 %vm10142_vm0, %v15076_v34  ;;  %8536 = vmatprep.mubr.msk.f32.mxu1 %vm10142_vm0, %v15076_v34  ;;  %v2104_v11 = vand.u32 4294901760, %v2103_v12  ;;  %v2113_v25 = vsub.f32 %v11468_v41, %v14886_v7 }
 0x118   :  { %v8037_v57 = vpop.f32.mrf.mxu1  ;;  %v8059_v29 = vpop.f32.mrf.mxu0  ;;  %8603 = vmatprep.subr.mxu1 %v15076_v34  ;;  %8562 = vmatprep.subr.mxu0 %v15076_v34  ;;  %v2122_v3 = vand.u32 4294901760, %v11490_v47 }
 0x119   :  { %8604 = vmatpush3.msra.mxu1 %v11150_v8  ;;  %8563 = vmatpush3.msra.mxu0 %v11190_v49 }
 0x11a   :  { %v533_v24 = vpop.f32.mrf.mxu0  ;;  %v656_v46 = vpop.f32.mrf.mxu1  ;;  %8500 = vmatmul.mubr.f32.gmra.mxu0 %v2094_v9  ;;  %8537 = vmatmul.mubr.f32.gmra.mxu1 %v11345_v18 }
 0x11b   :  { %v534_v39 = vadd.f32 %v533_v24, %v11354_v5  ;;  %v11509_v57 = vadd.f32 %v656_v46, %v520_v42  ;;  %8502 = vmatprep.mubr.msk.f32.mxu0 %vm10142_vm0, %v15076_v34  ;;  %8539 = vmatprep.mubr.msk.f32.mxu1 %vm10142_vm0, %v15076_v34  ;;  %v2114_v42 = vand.u32 4294901760, %v2113_v25  ;;  %v2123_v24 = vsub.f32 %v11490_v47, %v2122_v3 }
 0x11c   :  { %v8062_v9 = vpop.f32.mrf.mxu0  ;;  %v8099_v29 = vpop.f32.mrf.mxu1  ;;  %8605 = vmatprep.subr.mxu1 %v15076_v34  ;;  %8564 = vmatprep.subr.mxu0 %v15076_v34 }
 0x11d   :  { %8606 = vmatpush3.msra.mxu1 %v11174_v15  ;;  %8565 = vmatpush3.msra.mxu0 %v11213_v19 }
 0x11e   :  { %v540_v12 = vpop.f32.mrf.mxu0  ;;  %v664_v5 = vpop.f32.mrf.mxu1  ;;  %8503 = vmatmul.mubr.f32.gmra.mxu0 %v2104_v11  ;;  %8540 = vmatmul.mubr.f32.gmra.mxu1 %v11366_v6 }
 0x11f   :  { %v541_v46 = vadd.f32 %v540_v12, %v11379_v2  ;;  %v11524_v9 = vadd.f32 %v664_v5, %v527_v59  ;;  %8505 = vmatprep.mubr.msk.f32.mxu0 %vm10142_vm0, %v15076_v34  ;;  %8542 = vmatprep.mubr.msk.f32.mxu1 %vm10142_vm0, %v15076_v34  ;;  %v2124_v59 = vand.u32 4294901760, %v2123_v24 }
 0x120   :  { %v8065_v29 = vpop.f32.mrf.mxu0  ;;  %v8102_v7 = vpop.f32.mrf.mxu1  ;;  %8607 = vmatprep.subr.mxu1 %v15076_v34  ;;  %8566 = vmatprep.subr.mxu0 %v15076_v34 }
 0x121   :  { %8608 = vmatpush3.msra.mxu1 %v11192_v40  ;;  %8567 = vmatpush3.msra.mxu0 %v11250_v48 }
 0x122   :  { %v547_v11 = vpop.f32.mrf.mxu0  ;;  %v672_v2 = vpop.f32.mrf.mxu1  ;;  %8506 = vmatmul.mubr.f32.gmra.mxu0 %v2114_v42  ;;  %8543 = vmatmul.mubr.f32.gmra.mxu1 %v11398_v10 }
 0x123   :  { %v548_v25 = vadd.f32 %v547_v11, %v11407_v62  ;;  %v11536_v12 = vadd.f32 %v672_v2, %v534_v39  ;;  %8508 = vmatprep.mubr.msk.f32.mxu0 %vm10142_vm0, %v15076_v34  ;;  %8545 = vmatprep.mubr.msk.f32.mxu1 %vm10142_vm0, %v15076_v34 }
 0x124   :  { %v8068_v7 = vpop.f32.mrf.mxu0  ;;  %v8105_v5 = vpop.f32.mrf.mxu1  ;;  %8568 = vmatprep.subr.mxu0 %v15076_v34  ;;  %8609 = vmatprep.subr.mxu1 %v15076_v34 }
 0x125   :  { %8569 = vmatpush3.msra.mxu0 %v11282_v4  ;;  %8610 = vmatpush3.msra.mxu1 %v11215_v22 }
 0x126   :  { %v554_v42 = vpop.f32.mrf.mxu0  ;;  %v680_v62 = vpop.f32.mrf.mxu1  ;;  %8509 = vmatmul.mubr.f32.gmra.mxu0 %v2124_v59  ;;  %8546 = vmatmul.mubr.f32.gmra.mxu1 %v11426_v36 }
 0x127   :  { %v555_v39 = vadd.f32 %v554_v42, %v11429_v26  ;;  %v11548_v24 = vadd.f32 %v680_v62, %v541_v46  ;;  %8548 = vmatprep.mubr.msk.f32.mxu1 %vm10142_vm0, %v15076_v34  ;;  %8570 = vmatprep.mubr.msk.f32.mxu0 %vm10142_vm0, %v15076_v34  ;;  %v15077_v42 = vand.u32 4294901760, %v11125_v1 }
 0x128   :  { %v8071_v29 = vpop.f32.mrf.mxu0  ;;  %v8108_v11 = vpop.f32.mrf.mxu1  ;;  %8611 = vmatprep.subr.mxu1 %v15076_v34  ;;  %8640 = vmatprep.subr.mxu0 %v15076_v34 }
 0x129   :  { %8612 = vmatpush3.msra.mxu1 %v11252_v16 }
 0x12a   :  { %v561_v2 = vpop.f32.mrf.mxu0  ;;  %v688_v59 = vpop.f32.mrf.mxu1  ;;  %8549 = vmatmul.mubr.f32.gmra.mxu1 %v11447_v31  ;;  %8571 = vmatmul.mubr.f32.vlgmr.msra.gmra.mxu0 %v11269_v17 }
 0x12b   :  { %v562_v26 = vadd.f32 %v561_v2, %v11450_v0  ;;  %v11560_v46 = vadd.f32 %v688_v59, %v548_v25  ;;  %8551 = vmatprep.mubr.msk.f32.mxu1 %vm10142_vm0, %v15076_v34  ;;  %8573 = vmatprep.mubr.msk.f32.mxu0 %vm10142_vm0, %v15076_v34  ;;  %v15078_v2 = vand.u32 4294901760, %v11135_v60 }
 0x12c   :  { %v8074_v7 = vpop.f32.mrf.mxu0  ;;  %v8111_v5 = vpop.f32.mrf.mxu1  ;;  %8641 = vmatpush3.msra.mxu0 %v15077_v42  ;;  %8683 = vmatprep.subr.mxu1 %v15076_v34 }
 0x12d   :  { %8642 = vmatprep.subr.mxu0 %v15076_v34 }
 0x12e   :  { %v568_v62 = vpop.f32.mrf.mxu0  ;;  %v696_v29 = vpop.f32.mrf.mxu1  ;;  %8552 = vmatmul.mubr.f32.gmra.mxu1 %v11470_v55  ;;  %8574 = vmatmul.mubr.f32.gmra.mxu0 %v11308_v61 }
 0x12f   :  { %v569_v0 = vadd.f32 %v568_v62, %v11473_v35  ;;  %v11573_v25 = vadd.f32 %v696_v29, %v555_v39  ;;  %8576 = vmatprep.mubr.msk.f32.mxu0 %vm10142_vm0, %v15076_v34  ;;  %8613 = vmatprep.mubr.msk.f32.mxu1 %vm10142_vm0, %v15076_v34  ;;  %v15079_v35 = vand.u32 4294901760, %v11269_v17  ;;  %v15080_v17 = vand.u32 4294901760, %v11148_v58 }
 0x130   :  { %v8077_v1 = vpop.f32.mrf.mxu0  ;;  %v8114_v11 = vpop.f32.mrf.mxu1  ;;  %8643 = vmatpush3.msra.mxu0 %v15078_v2 }
 0x131   :  { %8644 = vmatprep.subr.mxu0 %v15076_v34 }
 0x132   :  { %v575_v59 = vpop.f32.mrf.mxu0  ;;  %v704_v7 = vpop.f32.mrf.mxu1  ;;  %8577 = vmatmul.mubr.f32.gmra.mxu0 %v11343_v56  ;;  %8614 = vmatmul.mubr.f32.vlgmr.msra.gmra.mxu1 %v15079_v35 }
 0x133   :  { %v576_v39 = vadd.f32 %v575_v59, %v11492_v28  ;;  %v11586_v5 = vadd.f32 %v704_v7, %v562_v26  ;;  %8684 = vmatpush3.msra.mxu1 %v11108_v33  ;;  %8579 = vmatprep.mubr.msk.f32.mxu0 %vm10142_vm0, %v15076_v34  ;;  %v15081_v33 = vand.u32 4294901760, %v11308_v61  ;;  %v15082_v61 = vand.u32 4294901760, %v11168_v44 }
 0x134   :  { %v8080_v60 = vpop.f32.mrf.mxu0  ;;  %v8117_v42 = vpop.f32.mrf.mxu1  ;;  %8616 = vmatprep.mubr.msk.f32.mxu1 %vm10142_vm0, %v15076_v34  ;;  %8685 = vmatprep.subr.mxu1 %v15076_v34 }
 0x135   :  { %8686 = vmatpush3.msra.mxu1 %v11115_v45  ;;  %8645 = vmatpush3.msra.mxu0 %v15080_v17  ;;  %v2875_v60 = vld [vmem:[#allocation2 + $0xb8] sm:$0xff]  ;;  %v15088_v17 = vand.u32 4294901760, %v11391_v63 }
 0x136   :  { %v712_v28 = vpop.f32.mrf.mxu1  ;;  %v815_v26 = vpop.f32.mrf.mxu0  ;;  %8580 = vmatmul.mubr.f32.gmra.mxu0 %v11372_v21  ;;  %8617 = vmatmul.mubr.f32.gmra.mxu1 %v15081_v33 }
 0x137   :  { %v11600_v62 = vadd.f32 %v712_v28, %v569_v0  ;;  %v816_v29 = vadd.f32 %v815_v26, %v11509_v57  ;;  %8582 = vmatprep.mubr.msk.f32.mxu0 %vm10142_vm0, %v15076_v34  ;;  %8619 = vmatprep.mubr.msk.f32.mxu1 %vm10142_vm0, %v15076_v34  ;;  %v15083_v57 = vand.u32 4294901760, %v11343_v56  ;;  %v15084_v56 = vand.u32 4294901760, %v11190_v49  ;;  %v2874_v28 = vld [vmem:[#allocation2 + $0xb0] sm:$0xff] }
 0x138   :  { %v8120_v45 = vpop.f32.mrf.mxu1  ;;  %v8142_v58 = vpop.f32.mrf.mxu0  ;;  %8687 = vmatprep.subr.mxu1 %v15076_v34  ;;  %8646 = vmatprep.subr.mxu0 %v15076_v34 }
 0x139   :  { %8688 = vmatpush3.msra.mxu1 %v11129_v52  ;;  %8647 = vmatpush3.msra.mxu0 %v15082_v61  ;;  %v15091_v61 = vand.u32 4294901760, %v11424_v54 }
 0x13a   :  { %v720_v0 = vpop.f32.mrf.mxu1  ;;  %v821_v1 = vpop.f32.mrf.mxu0  ;;  %8583 = vmatmul.mubr.f32.gmra.mxu0 %v11391_v63  ;;  %8620 = vmatmul.mubr.f32.gmra.mxu1 %v15083_v57  ;;  %v15090_v63 = vand.u32 4294901760, %v11250_v48 }
 0x13b   :  { %v11615_v11 = vadd.f32 %v720_v0, %v576_v39  ;;  %v822_v2 = vadd.f32 %v821_v1, %v11524_v9  ;;  %8585 = vmatprep.mubr.msk.f32.mxu0 %vm10142_vm0, %v15076_v34  ;;  %8622 = vmatprep.mubr.msk.f32.mxu1 %vm10142_vm0, %v15076_v34  ;;  %v15085_v9 = vand.u32 4294901760, %v11372_v21  ;;  %v15087_v21 = vand.u32 4294901760, %v11213_v19  ;;  %v2873_v0 = vld [vmem:[#allocation2 + $0xa8] sm:$0xff] }
 0x13c   :  { %v8123_v52 = vpop.f32.mrf.mxu1  ;;  %v8145_v44 = vpop.f32.mrf.mxu0  ;;  %8689 = vmatprep.subr.mxu1 %v15076_v34  ;;  %8648 = vmatprep.subr.mxu0 %v15076_v34 }
 0x13d   :  { %8690 = vmatpush3.msra.mxu1 %v11150_v8  ;;  %8649 = vmatpush3.msra.mxu0 %v15084_v56  ;;  %v11682_v52 = vand.u32 4294901760, %v2873_v0  ;;  %v2872_v44 = vld [vmem:[#allocation2 + $0xa0] sm:$0xff] }
 0x13e   :  { %v827_v59 = vpop.f32.mrf.mxu0  ;;  %v942_v7 = vpop.f32.mrf.mxu1  ;;  %8586 = vmatmul.mubr.f32.gmra.mxu0 %v11424_v54  ;;  %8623 = vmatmul.mubr.f32.gmra.mxu1 %v15085_v9  ;;  %v15093_v54 = vand.u32 4294901760, %v11282_v4 }
 0x13f   :  { %v828_v35 = vadd.f32 %v827_v59, %v11536_v12  ;;  %v11631_v39 = vadd.f32 %v942_v7, %v816_v29  ;;  %8588 = vmatprep.mubr.msk.f32.mxu0 %vm10142_vm0, %v15076_v34  ;;  %8625 = vmatprep.mubr.msk.f32.mxu1 %vm10142_vm0, %v15076_v34 }
 0x140   :  { %v8148_v8 = vpop.f32.mrf.mxu0  ;;  %v8185_v49 = vpop.f32.mrf.mxu1  ;;  %8691 = vmatprep.subr.mxu1 %v15076_v34  ;;  %8650 = vmatprep.subr.mxu0 %v15076_v34 }
 0x141   :  { %15086 = vst [vmem:[#allocation14_spill] sm:$0xff] %v11631_v39  ;;  %8692 = vmatpush3.msra.mxu1 %v11174_v15  ;;  %8651 = vmatpush3.msra.mxu0 %v15087_v21  ;;  %v11652_v15 = vand.u32 4294901760, %v2875_v60  ;;  %v2871_v21 = vld [vmem:[#allocation2 + $0x98] sm:$0xff] }
 0x142   :  { %v833_v12 = vpop.f32.mrf.mxu0  ;;  %v948_v42 = vpop.f32.mrf.mxu1  ;;  %8589 = vmatmul.mubr.f32.gmra.mxu0 %v11445_v30  ;;  %8626 = vmatmul.mubr.f32.gmra.mxu1 %v15088_v17  ;;  %v11697_v30 = vand.u32 4294901760, %v2872_v44 }
 0x143   :  { %v834_v26 = vadd.f32 %v833_v12, %v11548_v24  ;;  %v11646_v33 = vadd.f32 %v948_v42, %v822_v2  ;;  %8591 = vmatprep.mubr.msk.f32.mxu0 %vm10142_vm0, %v15076_v34  ;;  %8628 = vmatprep.mubr.msk.f32.mxu1 %vm10142_vm0, %v15076_v34  ;;  %v11659_v24 = vand.u32 4294901760, %v2874_v28 }
 0x144   :  { %v8151_v19 = vpop.f32.mrf.mxu0  ;;  %v8188_v29 = vpop.f32.mrf.mxu1  ;;  %8693 = vmatprep.subr.mxu1 %v15076_v34  ;;  %8652 = vmatprep.subr.mxu0 %v15076_v34 }
 0x145   :  { %15089 = vst [vmem:[#allocation15_spill] sm:$0xff] %v11646_v33  ;;  %8694 = vmatpush3.msra.mxu1 %v11192_v40  ;;  %8653 = vmatpush3.msra.mxu0 %v15090_v63  ;;  %v11672_v40 = vsub.f32 %v2875_v60, %v11652_v15  ;;  %v15095_v60 = vand.u32 4294901760, %v11468_v41  ;;  %v11728_v29 = vand.u32 4294901760, %v2871_v21 }
 0x146   :  { %v839_v45 = vpop.f32.mrf.mxu0  ;;  %v954_v58 = vpop.f32.mrf.mxu1  ;;  %8592 = vmatmul.mubr.f32.gmra.mxu0 %v11468_v41  ;;  %8629 = vmatmul.mubr.f32.gmra.mxu1 %v15091_v61  ;;  %v2849_v41 = vrot.slane %v10739_v37, 1 }
 0x147   :  { %v840_v1 = vadd.f32 %v839_v45, %v11560_v46  ;;  %v11665_v57 = vadd.f32 %v954_v58, %v828_v35  ;;  %8594 = vmatprep.mubr.msk.f32.mxu0 %vm10142_vm0, %v15076_v34  ;;  %8631 = vmatprep.mubr.msk.f32.mxu1 %vm10142_vm0, %v15076_v34  ;;  %v11680_v46 = vsub.f32 %v2874_v28, %v11659_v24  ;;  %v2870_v58 = vld [vmem:[#allocation2 + $0x90] sm:$0xff] }
 0x148   :  { %v8154_v48 = vpop.f32.mrf.mxu0  ;;  %v8191_v2 = vpop.f32.mrf.mxu1  ;;  %8654 = vmatprep.subr.mxu0 %v15076_v34  ;;  %8695 = vmatprep.subr.mxu1 %v15076_v34 }
 0x149   :  { %15092 = vst [vmem:[#allocation16_spill] sm:$0xff] %v11665_v57  ;;  %8655 = vmatpush3.msra.mxu0 %v15093_v54  ;;  %8696 = vmatpush3.msra.mxu1 %v11215_v22  ;;  %v14899_v22 = vand.u32 4294901760, %v11672_v40  ;;  %v15098_v48 = vrot.slane %v10643_v23, 1  ;;  %v11755_v23 = vand.u32 4294901760, %v2870_v58 }
 0x14a   :  { %v845_v56 = vpop.f32.mrf.mxu0  ;;  %v960_v59 = vpop.f32.mrf.mxu1  ;;  %8595 = vmatmul.mubr.f32.gmra.mxu0 %v11490_v47  ;;  %8632 = vmatmul.mubr.f32.gmra.mxu1 %v2102_v20  ;;  %v14898_v20 = vand.u32 4294901760, %v11680_v46 }
 0x14b   :  { %v846_v7 = vadd.f32 %v845_v56, %v11573_v25  ;;  %v11688_v9 = vadd.f32 %v960_v59, %v834_v26  ;;  %8634 = vmatprep.mubr.msk.f32.mxu1 %vm10142_vm0, %v15076_v34  ;;  %8656 = vmatprep.mubr.msk.f32.mxu0 %vm10142_vm0, %v15076_v34  ;;  %v11702_v25 = vsub.f32 %v2873_v0, %v11682_v52 }
 0x14c   :  { %v8157_v4 = vpop.f32.mrf.mxu0  ;;  %v8194_v35 = vpop.f32.mrf.mxu1  ;;  %8697 = vmatprep.subr.mxu1 %v15076_v34  ;;  %8726 = vmatprep.subr.mxu0 %v15076_v34  ;;  %v3093_v26 = vsub.f32 %v11680_v46, %v14898_v20  ;;  %v2865_v47 = vsel %vm2857_vm3, %v15098_v48, %v2849_v41  ;;  %v11753_v56 = vsub.f32 %v2871_v21, %v11728_v29 }
 0x14d   :  { %15094 = vst [vmem:[#allocation17_spill] sm:$0xff] %v11688_v9  ;;  %8698 = vmatpush3.msra.mxu1 %v11252_v16  ;;  %v3086_v16 = vsub.f32 %v11672_v40, %v14899_v22  ;;  %v14895_v19 = vand.u32 4294901760, %v11702_v25  ;;  %v2869_v4 = vld [vmem:[#allocation2 + $0x88] sm:$0xff] }
 0x14e   :  { %v851_v8 = vpop.f32.mrf.mxu0  ;;  %v966_v49 = vpop.f32.mrf.mxu1  ;;  %8635 = vmatmul.mubr.f32.gmra.mxu1 %v15095_v60  ;;  %8657 = vmatmul.mubr.f32.vlgmr.msra.gmra.mxu0 %v11241_v53  ;;  %v3094_v54 = vand.u32 4294901760, %v3093_v26 }
 0x14f   :  { %v852_v12 = vadd.f32 %v851_v8, %v11586_v5  ;;  %v11708_v42 = vadd.f32 %v966_v49, %v840_v1  ;;  %8637 = vmatprep.mubr.msk.f32.mxu1 %vm10142_vm0, %v15076_v34  ;;  %8659 = vmatprep.mubr.msk.f32.mxu0 %vm10142_vm0, %v15076_v34  ;;  %v11721_v5 = vsub.f32 %v2872_v44, %v11697_v30  ;;  %v3087_v1 = vand.u32 4294901760, %v3086_v16 }
 0x150   :  { %v8160_v17 = vpop.f32.mrf.mxu0  ;;  %v8197_v28 = vpop.f32.mrf.mxu1  ;;  %8727 = vmatpush3.msra.mxu0 %v11652_v15  ;;  %8769 = vmatprep.subr.mxu1 %v15076_v34  ;;  %v3100_v44 = vsub.f32 %v11702_v25, %v14895_v19  ;;  %v2877_v49 = vsel %vm85_vm1, %v2865_v47, 0  ;;  %v11774_v16 = vsub.f32 %v2870_v58, %v11755_v23 }
 0x151   :  { %15096 = vst [vmem:[#allocation18_spill] sm:$0xff] %v11708_v42  ;;  %8728 = vmatprep.subr.mxu0 %v15076_v34  ;;  %v11776_v17 = vand.u32 4294901760, %v2869_v4 }
 0x152   :  { %v857_v63 = vpop.f32.mrf.mxu0  ;;  %v972_v45 = vpop.f32.mrf.mxu1  ;;  %8638 = vmatmul.mubr.f32.gmra.mxu1 %v2122_v3  ;;  %8660 = vmatmul.mubr.f32.gmra.mxu0 %v11271_v14 }
 0x153   :  { %v858_v61 = vadd.f32 %v857_v63, %v11600_v62  ;;  %v11734_v0 = vadd.f32 %v972_v45, %v846_v7  ;;  %8662 = vmatprep.mubr.msk.f32.mxu0 %vm10142_vm0, %v15076_v34  ;;  %8699 = vmatprep.mubr.msk.f32.mxu1 %vm10142_vm0, %v15076_v34  ;;  %v14892_v62 = vand.u32 4294901760, %v11721_v5  ;;  %v2868_v63 = vld [vmem:[#allocation2 + $0x80] sm:$0xff] }
 0x154   :  { %v8163_v3 = vpop.f32.mrf.mxu0  ;;  %v8200_v2 = vpop.f32.mrf.mxu1  ;;  %8729 = vmatpush3.msra.mxu0 %v11659_v24 }
 0x155   :  { %15097 = vst [vmem:[#allocation19_spill] sm:$0xff] %v11734_v0  ;;  %8730 = vmatprep.subr.mxu0 %v15076_v34  ;;  %v14889_v2 = vand.u32 4294901760, %v11774_v16 }
 0x156   :  { %v863_v59 = vpop.f32.mrf.mxu0  ;;  %v978_v7 = vpop.f32.mrf.mxu1  ;;  %8663 = vmatmul.mubr.f32.gmra.mxu0 %v11314_v32  ;;  %8700 = vmatmul.mubr.f32.vlgmr.msra.gmra.mxu1 %v11241_v53  ;;  %v3107_v53 = vsub.f32 %v11721_v5, %v14892_v62 }
 0x157   :  { %v864_v35 = vadd.f32 %v863_v59, %v11615_v11  ;;  %v11760_v8 = vadd.f32 %v978_v7, %v852_v12  ;;  %8770 = vmatpush3.msra.mxu1 %v3087_v1  ;;  %8665 = vmatprep.mubr.msk.f32.mxu0 %vm10142_vm0, %v15076_v34  ;;  %v3101_v11 = vand.u32 4294901760, %v3100_v44  ;;  %v14890_v12 = vand.u32 4294901760, %v11753_v56 }
 0x158   :  { %v8166_v60 = vpop.f32.mrf.mxu0  ;;  %v8203_v21 = vpop.f32.mrf.mxu1  ;;  %8702 = vmatprep.mubr.msk.f32.mxu1 %vm10142_vm0, %v15076_v34  ;;  %8771 = vmatprep.subr.mxu1 %v15076_v34  ;;  %v11786_v1 = vand.u32 4294901760, %v2877_v49  ;;  %v3108_v47 = vand.u32 4294901760, %v3107_v53  ;;  %v11804_v44 = vand.u32 4294901760, %v2868_v63 }
 0x159   :  { %15099 = vst [vmem:[#allocation20_spill] sm:$0xff] %v11760_v8  ;;  %8772 = vmatpush3.msra.mxu1 %v3094_v54  ;;  %8731 = vmatpush3.msra.mxu0 %v11682_v52  ;;  %v3114_v3 = vsub.f32 %v11753_v56, %v14890_v12  ;;  %v11802_v54 = vsub.f32 %v2869_v4, %v11776_v17 }
 0x15a   :  { %v984_v28 = vpop.f32.mrf.mxu1  ;;  %v1138_v26 = vpop.f32.mrf.mxu0  ;;  %8666 = vmatmul.mubr.f32.gmra.mxu0 %v11345_v18  ;;  %8703 = vmatmul.mubr.f32.gmra.mxu1 %v11271_v14  ;;  %v15101_v14 = vrot.slane %v10733_v50, 1  ;;  %v11818_v60 = vsub.f32 %v2877_v49, %v11786_v1  ;;  %v11825_v21 = vsub.f32 %v2868_v63, %v11804_v44  ;;  %v2883_v63 = vsel %vm85_vm1, %v11228_v43, 0 }
 0x15b   :  { %v11780_v45 = vadd.f32 %v984_v28, %v858_v61  ;;  %8668 = vmatprep.mubr.msk.f32.mxu0 %vm10142_vm0, %v15076_v34  ;;  %8705 = vmatprep.mubr.msk.f32.mxu1 %vm10142_vm0, %v15076_v34  ;;  %v14888_v53 = vand.u32 4294901760, %v11802_v54 }
 0x15c   :  { %v8206_v58 = vpop.f32.mrf.mxu1  ;;  %v8228_v48 = vpop.f32.mrf.mxu0  ;;  %8773 = vmatprep.subr.mxu1 %v15076_v34  ;;  %8732 = vmatprep.subr.mxu0 %v15076_v34  ;;  %v2864_v61 = vsel %vm2857_vm3, %v2849_v41, %v15101_v14 }
 0x15d   :  { %15100 = vst [vmem:[#allocation21_spill] sm:$0xff] %v11780_v45  ;;  %8774 = vmatpush3.msra.mxu1 %v3101_v11  ;;  %8733 = vmatpush3.msra.mxu0 %v11697_v30  ;;  %v2880_v41 = vsel %vm85_vm1, %v2864_v61, 0  ;;  %v3128_v14 = vsub.f32 %v11802_v54, %v14888_v53  ;;  %v14887_v61 = vand.u32 4294901760, %v11825_v21 }
 0x15e   :  { %v990_v50 = vpop.f32.mrf.mxu1  ;;  %v1148_v59 = vpop.f32.mrf.mxu0  ;;  %8669 = vmatmul.mubr.f32.gmra.mxu0 %v11366_v6  ;;  %8706 = vmatmul.mubr.f32.gmra.mxu1 %v11314_v32  ;;  %v3115_v32 = vand.u32 4294901760, %v3114_v3  ;;  %v11830_v49 = vand.u32 4294901760, %v2880_v41 }
 0x15f   :  { %v11808_v37 = vadd.f32 %v990_v50, %v864_v35  ;;  %8671 = vmatprep.mubr.msk.f32.mxu0 %vm10142_vm0, %v15076_v34  ;;  %8708 = vmatprep.mubr.msk.f32.mxu1 %vm10142_vm0, %v15076_v34  ;;  %v3121_v35 = vsub.f32 %v11774_v16, %v14889_v2 }
 0x160   :  { %v8209_v7 = vpop.f32.mrf.mxu1  ;;  %v8231_v4 = vpop.f32.mrf.mxu0  ;;  %8775 = vmatprep.subr.mxu1 %v15076_v34  ;;  %8734 = vmatprep.subr.mxu0 %v15076_v34  ;;  %v11851_v50 = vsub.f32 %v2880_v41, %v11830_v49  ;;  %v3135_v41 = vsub.f32 %v11825_v21, %v14887_v61 }
 0x161   :  { %15102 = vst [vmem:[#allocation22_spill] sm:$0xff] %v11808_v37  ;;  %8776 = vmatpush3.msra.mxu1 %v3108_v47  ;;  %8735 = vmatpush3.msra.mxu0 %v11728_v29  ;;  %v11853_v7 = vand.u32 4294901760, %v2883_v63 }
 0x162   :  { %v1158_v11 = vpop.f32.mrf.mxu0  ;;  %v1329_v28 = vpop.f32.mrf.mxu1  ;;  %8672 = vmatmul.mubr.f32.gmra.mxu0 %v11398_v10  ;;  %8709 = vmatmul.mubr.f32.gmra.mxu1 %v11345_v18  ;;  %v3122_v18 = vand.u32 4294901760, %v3121_v35 }
 0x163   :  { %v11832_v58 = vadd.f32 %v1329_v28, %v1138_v26  ;;  %8674 = vmatprep.mubr.msk.f32.mxu0 %vm10142_vm0, %v15076_v34  ;;  %8711 = vmatprep.mubr.msk.f32.mxu1 %vm10142_vm0, %v15076_v34  ;;  %v14897_v26 = vand.u32 4294901760, %v11818_v60 }
 0x164   :  { %v8234_v48 = vpop.f32.mrf.mxu0  ;;  %v8271_v47 = vpop.f32.mrf.mxu1  ;;  %8777 = vmatprep.subr.mxu1 %v15076_v34  ;;  %8736 = vmatprep.subr.mxu0 %v15076_v34 }
 0x165   :  { %8778 = vmatpush3.msra.mxu1 %v3115_v32  ;;  %8737 = vmatpush3.msra.mxu0 %v11755_v23  ;;  %v2886_v32 = vsel %vm85_vm1, %v11259_v13, 0  ;;  %v14893_v47 = vand.u32 4294901760, %v11851_v50 }
 0x166   :  { %v1168_v3 = vpop.f32.mrf.mxu0  ;;  %v1335_v43 = vpop.f32.mrf.mxu1  ;;  %8675 = vmatmul.mubr.f32.gmra.mxu0 %v11426_v36  ;;  %8712 = vmatmul.mubr.f32.gmra.mxu1 %v11366_v6  ;;  %v2979_v6 = vsub.f32 %v11818_v60, %v14897_v26 }
 0x167   :  { %v11855_v4 = vadd.f32 %v1335_v43, %v1148_v59  ;;  %8677 = vmatprep.mubr.msk.f32.mxu0 %vm10142_vm0, %v15076_v34  ;;  %8714 = vmatprep.mubr.msk.f32.mxu1 %vm10142_vm0, %v15076_v34  ;;  %v3129_v59 = vand.u32 4294901760, %v3128_v14  ;;  %v11878_v43 = vand.u32 4294901760, %v2886_v32  ;;  %v2889_v14 = vsel %vm85_vm1, %v11290_v38, 0 }
 0x168   :  { %v8237_v35 = vpop.f32.mrf.mxu0  ;;  %v8274_v28 = vpop.f32.mrf.mxu1  ;;  %8779 = vmatprep.subr.mxu1 %v15076_v34  ;;  %8738 = vmatprep.subr.mxu0 %v15076_v34  ;;  %v11891_v61 = vand.u32 4294901760, %v2889_v14 }
 0x169   :  { %8780 = vmatpush3.msra.mxu1 %v3122_v18  ;;  %8739 = vmatpush3.msra.mxu0 %v11776_v17  ;;  %v11876_v18 = vsub.f32 %v2883_v63, %v11853_v7  ;;  %v3136_v63 = vand.u32 4294901760, %v3135_v41  ;;  %v11900_v53 = vsub.f32 %v2886_v32, %v11878_v43 }
 0x16a   :  { %v1178_v48 = vpop.f32.mrf.mxu0  ;;  %v1341_v13 = vpop.f32.mrf.mxu1  ;;  %8678 = vmatmul.mubr.f32.gmra.mxu0 %v11447_v31  ;;  %8715 = vmatmul.mubr.f32.gmra.mxu1 %v11398_v10  ;;  %v11913_v32 = vsub.f32 %v2889_v14, %v11891_v61  ;;  %v15103_v14 = vld [vmem:[#allocation11_spill] sm:$0xff] }
 0x16b   :  { %v11882_v35 = vadd.f32 %v1341_v13, %v1158_v11  ;;  %8680 = vmatprep.mubr.msk.f32.mxu0 %vm10142_vm0, %v15076_v34  ;;  %8717 = vmatprep.mubr.msk.f32.mxu1 %vm10142_vm0, %v15076_v34  ;;  %v2980_v13 = vand.u32 4294901760, %v2979_v6 }
 0x16c   :  { %v8240_v28 = vpop.f32.mrf.mxu0  ;;  %v8277_v10 = vpop.f32.mrf.mxu1  ;;  %8740 = vmatprep.subr.mxu0 %v15076_v34  ;;  %8781 = vmatprep.subr.mxu1 %v15076_v34 }
 0x16d   :  { %8741 = vmatpush3.msra.mxu0 %v11804_v44  ;;  %8782 = vmatpush3.msra.mxu1 %v3129_v59  ;;  %v2989_v28 = vsub.f32 %v11851_v50, %v14893_v47  ;;  %v14891_v10 = vand.u32 4294901760, %v11876_v18 }
 0x16e   :  { %v1188_v38 = vpop.f32.mrf.mxu0  ;;  %v1347_v11 = vpop.f32.mrf.mxu1  ;;  %8681 = vmatmul.mubr.f32.gmra.mxu0 %v11470_v55  ;;  %8718 = vmatmul.mubr.f32.gmra.mxu1 %v11426_v36  ;;  %v2892_v36 = vsel %vm85_vm1, %v11318_v51, 0 }
 0x16f   :  { %v11902_v59 = vadd.f32 %v1347_v11, %v1168_v3  ;;  %8720 = vmatprep.mubr.msk.f32.mxu1 %vm10142_vm0, %v15076_v34  ;;  %8742 = vmatprep.mubr.msk.f32.mxu0 %vm10142_vm0, %v15076_v34  ;;  %v2990_v2 = vand.u32 4294901760, %v2989_v28  ;;  %v2999_v51 = vsub.f32 %v11876_v18, %v14891_v10 }
 0x170   :  { %v8243_v6 = vpop.f32.mrf.mxu0  ;;  %v8280_v41 = vpop.f32.mrf.mxu1  ;;  %8783 = vmatprep.subr.mxu1 %v15076_v34  ;;  %8812 = vmatprep.subr.mxu0 %v15076_v34 }
 0x171   :  { %8784 = vmatpush3.msra.mxu1 %v3136_v63  ;;  %v14894_v6 = vand.u32 4294901760, %v11900_v53  ;;  %v11920_v41 = vand.u32 4294901760, %v2892_v36  ;;  %v3000_v10 = vand.u32 4294901760, %v2999_v51 }
 0x172   :  { %v1198_v3 = vpop.f32.mrf.mxu0  ;;  %v1353_v11 = vpop.f32.mrf.mxu1  ;;  %8721 = vmatmul.mubr.f32.gmra.mxu1 %v11447_v31  ;;  %8743 = vmatmul.mubr.f32.vlgmr.msra.gmra.mxu0 %v2980_v13  ;;  %v2895_v31 = vsel %vm85_vm1, %v15103_v14, 0 }
 0x173   :  { %v11922_v12 = vadd.f32 %v1353_v11, %v1178_v48  ;;  %8723 = vmatprep.mubr.msk.f32.mxu1 %vm10142_vm0, %v15076_v34  ;;  %8745 = vmatprep.mubr.msk.f32.mxu0 %vm10142_vm0, %v15076_v34  ;;  %v14896_v48 = vand.u32 4294901760, %v11913_v32  ;;  %v3009_v14 = vsub.f32 %v11900_v53, %v14894_v6 }
 0x174   :  { %v8246_v63 = vpop.f32.mrf.mxu0  ;;  %v8283_v13 = vpop.f32.mrf.mxu1  ;;  %8813 = vmatpush3.msra.mxu0 %v11672_v40  ;;  %8855 = vmatprep.subr.mxu1 %v15076_v34 }
 0x175   :  { %8814 = vmatprep.subr.mxu0 %v15076_v34  ;;  %v11939_v63 = vsub.f32 %v2892_v36, %v11920_v41  ;;  %v11941_v13 = vand.u32 4294901760, %v2895_v31  ;;  %v3010_v6 = vand.u32 4294901760, %v3009_v14 }
 0x176   :  { %v1208_v28 = vpop.f32.mrf.mxu0  ;;  %v1359_v11 = vpop.f32.mrf.mxu1  ;;  %8724 = vmatmul.mubr.f32.gmra.mxu1 %v11470_v55  ;;  %8746 = vmatmul.mubr.f32.gmra.mxu0 %v2990_v2  ;;  %v15104_v55 = vld [vmem:[#allocation12_spill] sm:$0xff] }
 0x177   :  { %v11943_v62 = vadd.f32 %v1359_v11, %v1188_v38  ;;  %8748 = vmatprep.mubr.msk.f32.mxu0 %vm10142_vm0, %v15076_v34  ;;  %8785 = vmatprep.mubr.msk.f32.mxu1 %vm10142_vm0, %v15076_v34  ;;  %v2898_v2 = vsel %vm85_vm1, %v15104_v55, 0  ;;  %v3019_v38 = vsub.f32 %v11913_v32, %v14896_v48  ;;  %v14900_v19 = vand.u32 4294901760, %v11939_v63  ;;  %v15105_v48 = vld [vmem:[#allocation13_spill] sm:$0xff] }
 0x178   :  { %v8249_v51 = vpop.f32.mrf.mxu0  ;;  %v8286_v47 = vpop.f32.mrf.mxu1  ;;  %8815 = vmatpush3.msra.mxu0 %v11680_v46  ;;  %v11959_v55 = vsub.f32 %v2895_v31, %v11941_v13 }
 0x179   :  { %8816 = vmatprep.subr.mxu0 %v15076_v34  ;;  %v11961_v47 = vand.u32 4294901760, %v2898_v2  ;;  %v3020_v31 = vand.u32 4294901760, %v3019_v38 }
 0x17a   :  { %v1218_v36 = vpop.f32.mrf.mxu0  ;;  %v1365_v11 = vpop.f32.mrf.mxu1  ;;  %8749 = vmatmul.mubr.f32.gmra.mxu0 %v3000_v10  ;;  %8786 = vmatmul.mubr.f32.vlgmr.msra.gmra.mxu1 %v11786_v1  ;;  %v2901_v10 = vsel %vm85_vm1, %v15105_v48, 0 }
 0x17b   :  { %v11963_v51 = vadd.f32 %v1365_v11, %v1198_v3  ;;  %8856 = vmatpush3.msra.mxu1 %v11652_v15  ;;  %8751 = vmatprep.mubr.msk.f32.mxu0 %vm10142_vm0, %v15076_v34  ;;  %v11981_v48 = vsub.f32 %v2898_v2, %v11961_v47  ;;  %v11983_v11 = vand.u32 4294901760, %v2901_v10 }
 0x17c   :  { %v8252_v26 = vpop.f32.mrf.mxu0  ;;  %v8289_v20 = vpop.f32.mrf.mxu1  ;;  %8788 = vmatprep.mubr.msk.f32.mxu1 %vm10142_vm0, %v15076_v34  ;;  %8857 = vmatprep.subr.mxu1 %v15076_v34 }
 0x17d   :  { %8858 = vmatpush3.msra.mxu1 %v11659_v24  ;;  %8817 = vmatpush3.msra.mxu0 %v11702_v25  ;;  %v3029_v26 = vsub.f32 %v11939_v63, %v14900_v19  ;;  %v14901_v20 = vand.u32 4294901760, %v11959_v55 }
 0x17e   :  { %v1371_v3 = vpop.f32.mrf.mxu1  ;;  %v1465_v14 = vpop.f32.mrf.mxu0  ;;  %8752 = vmatmul.mubr.f32.gmra.mxu0 %v3010_v6  ;;  %8789 = vmatmul.mubr.f32.gmra.mxu1 %v11830_v49 }
 0x17f   :  { %v11985_v22 = vadd.f32 %v1371_v3, %v1208_v28  ;;  %v1466_v38 = vadd.f32 %v1465_v14, %v11832_v58  ;;  %8754 = vmatprep.mubr.msk.f32.mxu0 %vm10142_vm0, %v15076_v34  ;;  %8791 = vmatprep.mubr.msk.f32.mxu1 %vm10142_vm0, %v15076_v34  ;;  %v3030_v58 = vand.u32 4294901760, %v3029_v26  ;;  %v3039_v3 = vsub.f32 %v11959_v55, %v14901_v20 }
 0x180   :  { %v8292_v6 = vpop.f32.mrf.mxu1  ;;  %v8314_v37 = vpop.f32.mrf.mxu0  ;;  %8859 = vmatprep.subr.mxu1 %v15076_v34  ;;  %8818 = vmatprep.subr.mxu0 %v15076_v34  ;;  %v12002_v14 = vsub.f32 %v2901_v10, %v11983_v11 }
 0x181   :  { %8860 = vmatpush3.msra.mxu1 %v11682_v52  ;;  %8819 = vmatpush3.msra.mxu0 %v11721_v5  ;;  %v14902_v37 = vand.u32 4294901760, %v11981_v48 }
 0x182   :  { %v1377_v28 = vpop.f32.mrf.mxu1  ;;  %v1472_v2 = vpop.f32.mrf.mxu0  ;;  %8755 = vmatmul.mubr.f32.gmra.mxu0 %v3020_v31  ;;  %8792 = vmatmul.mubr.f32.gmra.mxu1 %v11853_v7 }
 0x183   :  { %v12004_v6 = vadd.f32 %v1377_v28, %v1218_v36  ;;  %v1473_v19 = vadd.f32 %v1472_v2, %v11855_v4  ;;  %8757 = vmatprep.mubr.msk.f32.mxu0 %vm10142_vm0, %v15076_v34  ;;  %8794 = vmatprep.mubr.msk.f32.mxu1 %vm10142_vm0, %v15076_v34  ;;  %v3040_v4 = vand.u32 4294901760, %v3039_v3  ;;  %v3049_v28 = vsub.f32 %v11981_v48, %v14902_v37 }
 0x184   :  { %v8295_v31 = vpop.f32.mrf.mxu1  ;;  %v8317_v26 = vpop.f32.mrf.mxu0  ;;  %8861 = vmatprep.subr.mxu1 %v15076_v34  ;;  %8820 = vmatprep.subr.mxu0 %v15076_v34  ;;  %v3058_v2 = vand.u32 4294901760, %v12002_v14 }
 0x185   :  { %8862 = vmatpush3.msra.mxu1 %v11697_v30  ;;  %8821 = vmatpush3.msra.mxu0 %v11753_v56 }
 0x186   :  { %v1479_v36 = vpop.f32.mrf.mxu0  ;;  %v1602_v10 = vpop.f32.mrf.mxu1  ;;  %8758 = vmatmul.mubr.f32.gmra.mxu0 %v3030_v58  ;;  %8795 = vmatmul.mubr.f32.gmra.mxu1 %v11878_v43 }
 0x187   :  { %v1480_v31 = vadd.f32 %v1479_v36, %v11882_v35  ;;  %v12021_v26 = vadd.f32 %v1602_v10, %v1466_v38  ;;  %8760 = vmatprep.mubr.msk.f32.mxu0 %vm10142_vm0, %v15076_v34  ;;  %8797 = vmatprep.mubr.msk.f32.mxu1 %vm10142_vm0, %v15076_v34  ;;  %v3050_v38 = vand.u32 4294901760, %v3049_v28  ;;  %v3059_v36 = vsub.f32 %v12002_v14, %v3058_v2 }
 0x188   :  { %v8320_v58 = vpop.f32.mrf.mxu0  ;;  %v8357_v20 = vpop.f32.mrf.mxu1  ;;  %8863 = vmatprep.subr.mxu1 %v15076_v34  ;;  %8822 = vmatprep.subr.mxu0 %v15076_v34 }
 0x189   :  { %8864 = vmatpush3.msra.mxu1 %v11728_v29  ;;  %8823 = vmatpush3.msra.mxu0 %v11774_v16 }
 0x18a   :  { %v1486_v3 = vpop.f32.mrf.mxu0  ;;  %v1610_v35 = vpop.f32.mrf.mxu1  ;;  %8761 = vmatmul.mubr.f32.gmra.mxu0 %v3040_v4  ;;  %8798 = vmatmul.mubr.f32.gmra.mxu1 %v11891_v61 }
 0x18b   :  { %v1487_v20 = vadd.f32 %v1486_v3, %v11902_v59  ;;  %v12036_v10 = vadd.f32 %v1610_v35, %v1473_v19  ;;  %8763 = vmatprep.mubr.msk.f32.mxu0 %vm10142_vm0, %v15076_v34  ;;  %8800 = vmatprep.mubr.msk.f32.mxu1 %vm10142_vm0, %v15076_v34  ;;  %v3060_v19 = vand.u32 4294901760, %v3059_v36 }
 0x18c   :  { %v8323_v58 = vpop.f32.mrf.mxu0  ;;  %v8360_v37 = vpop.f32.mrf.mxu1  ;;  %8865 = vmatprep.subr.mxu1 %v15076_v34  ;;  %8824 = vmatprep.subr.mxu0 %v15076_v34 }
 0x18d   :  { %8866 = vmatpush3.msra.mxu1 %v11755_v23  ;;  %8825 = vmatpush3.msra.mxu0 %v11802_v54 }
 0x18e   :  { %v1493_v4 = vpop.f32.mrf.mxu0  ;;  %v1618_v59 = vpop.f32.mrf.mxu1  ;;  %8764 = vmatmul.mubr.f32.gmra.mxu0 %v3050_v38  ;;  %8801 = vmatmul.mubr.f32.gmra.mxu1 %v11920_v41 }
 0x18f   :  { %v1494_v28 = vadd.f32 %v1493_v4, %v11922_v12  ;;  %v12048_v3 = vadd.f32 %v1618_v59, %v1480_v31  ;;  %8766 = vmatprep.mubr.msk.f32.mxu0 %vm10142_vm0, %v15076_v34  ;;  %8803 = vmatprep.mubr.msk.f32.mxu1 %vm10142_vm0, %v15076_v34 }
 0x190   :  { %v8326_v37 = vpop.f32.mrf.mxu0  ;;  %v8363_v35 = vpop.f32.mrf.mxu1  ;;  %8826 = vmatprep.subr.mxu0 %v15076_v34  ;;  %8867 = vmatprep.subr.mxu1 %v15076_v34 }
 0x191   :  { %8827 = vmatpush3.msra.mxu0 %v11825_v21  ;;  %8868 = vmatpush3.msra.mxu1 %v11776_v17 }
 0x192   :  { %v1500_v38 = vpop.f32.mrf.mxu0  ;;  %v1626_v12 = vpop.f32.mrf.mxu1  ;;  %8767 = vmatmul.mubr.f32.gmra.mxu0 %v3060_v19  ;;  %8804 = vmatmul.mubr.f32.gmra.mxu1 %v11941_v13 }
 0x193   :  { %v1501_v31 = vadd.f32 %v1500_v38, %v11943_v62  ;;  %v12060_v36 = vadd.f32 %v1626_v12, %v1487_v20  ;;  %8806 = vmatprep.mubr.msk.f32.mxu1 %vm10142_vm0, %v15076_v34  ;;  %8828 = vmatprep.mubr.msk.f32.mxu0 %vm10142_vm0, %v15076_v34  ;;  %v15106_v38 = vand.u32 4294901760, %v11672_v40 }
 0x194   :  { %v8329_v58 = vpop.f32.mrf.mxu0  ;;  %v8366_v4 = vpop.f32.mrf.mxu1  ;;  %8869 = vmatprep.subr.mxu1 %v15076_v34  ;;  %8898 = vmatprep.subr.mxu0 %v15076_v34 }
 0x195   :  { %8870 = vmatpush3.msra.mxu1 %v11804_v44 }
 0x196   :  { %v1507_v59 = vpop.f32.mrf.mxu0  ;;  %v1634_v19 = vpop.f32.mrf.mxu1  ;;  %8807 = vmatmul.mubr.f32.gmra.mxu1 %v11961_v47  ;;  %8829 = vmatmul.mubr.f32.vlgmr.msra.gmra.mxu0 %v11818_v60 }
 0x197   :  { %v1508_v62 = vadd.f32 %v1507_v59, %v11963_v51  ;;  %v12072_v20 = vadd.f32 %v1634_v19, %v1494_v28  ;;  %8809 = vmatprep.mubr.msk.f32.mxu1 %vm10142_vm0, %v15076_v34  ;;  %8831 = vmatprep.mubr.msk.f32.mxu0 %vm10142_vm0, %v15076_v34  ;;  %v15107_v59 = vand.u32 4294901760, %v11680_v46 }
 0x198   :  { %v8332_v37 = vpop.f32.mrf.mxu0  ;;  %v8369_v35 = vpop.f32.mrf.mxu1  ;;  %8899 = vmatpush3.msra.mxu0 %v15106_v38  ;;  %8941 = vmatprep.subr.mxu1 %v15076_v34 }
 0x199   :  { %8900 = vmatprep.subr.mxu0 %v15076_v34 }
 0x19a   :  { %v1514_v12 = vpop.f32.mrf.mxu0  ;;  %v1642_v58 = vpop.f32.mrf.mxu1  ;;  %8810 = vmatmul.mubr.f32.gmra.mxu1 %v11983_v11  ;;  %8832 = vmatmul.mubr.f32.gmra.mxu0 %v11851_v50 }
 0x19b   :  { %v1515_v51 = vadd.f32 %v1514_v12, %v11985_v22  ;;  %v12085_v28 = vadd.f32 %v1642_v58, %v1501_v31  ;;  %8834 = vmatprep.mubr.msk.f32.mxu0 %vm10142_vm0, %v15076_v34  ;;  %8871 = vmatprep.mubr.msk.f32.mxu1 %vm10142_vm0, %v15076_v34  ;;  %v15108_v22 = vand.u32 4294901760, %v11818_v60  ;;  %v15109_v60 = vand.u32 4294901760, %v11702_v25 }
 0x19c   :  { %v8335_v40 = vpop.f32.mrf.mxu0  ;;  %v8372_v4 = vpop.f32.mrf.mxu1  ;;  %8901 = vmatpush3.msra.mxu0 %v15107_v59 }
 0x19d   :  { %8902 = vmatprep.subr.mxu0 %v15076_v34 }
 0x19e   :  { %v1521_v19 = vpop.f32.mrf.mxu0  ;;  %v1650_v37 = vpop.f32.mrf.mxu1  ;;  %8835 = vmatmul.mubr.f32.gmra.mxu0 %v11876_v18  ;;  %8872 = vmatmul.mubr.f32.vlgmr.msra.gmra.mxu1 %v15108_v22 }
 0x19f   :  { %v1522_v31 = vadd.f32 %v1521_v19, %v12004_v6  ;;  %v12098_v35 = vadd.f32 %v1650_v37, %v1508_v62  ;;  %8942 = vmatpush3.msra.mxu1 %v11652_v15  ;;  %8837 = vmatprep.mubr.msk.f32.mxu0 %vm10142_vm0, %v15076_v34  ;;  %v15110_v15 = vand.u32 4294901760, %v11851_v50  ;;  %v15111_v50 = vand.u32 4294901760, %v11721_v5 }
 0x1a0   :  { %v8338_v46 = vpop.f32.mrf.mxu0  ;;  %v8375_v38 = vpop.f32.mrf.mxu1  ;;  %8874 = vmatprep.mubr.msk.f32.mxu1 %vm10142_vm0, %v15076_v34  ;;  %8943 = vmatprep.subr.mxu1 %v15076_v34 }
 0x1a1   :  { %8944 = vmatpush3.msra.mxu1 %v11659_v24  ;;  %8903 = vmatpush3.msra.mxu0 %v15109_v60  ;;  %v15116_v38 = vand.u32 4294901760, %v11913_v32 }
 0x1a2   :  { %v1658_v6 = vpop.f32.mrf.mxu1  ;;  %v1761_v62 = vpop.f32.mrf.mxu0  ;;  %8838 = vmatmul.mubr.f32.gmra.mxu0 %v11900_v53  ;;  %8875 = vmatmul.mubr.f32.gmra.mxu1 %v15110_v15  ;;  %v15118_v15 = vand.u32 4294901760, %v11939_v63 }
 0x1a3   :  { %v12112_v12 = vadd.f32 %v1658_v6, %v1515_v51  ;;  %v1762_v58 = vadd.f32 %v1761_v62, %v12021_v26  ;;  %8840 = vmatprep.mubr.msk.f32.mxu0 %vm10142_vm0, %v15076_v34  ;;  %8877 = vmatprep.mubr.msk.f32.mxu1 %vm10142_vm0, %v15076_v34  ;;  %v15112_v26 = vand.u32 4294901760, %v11876_v18  ;;  %v15113_v18 = vand.u32 4294901760, %v11753_v56 }
 0x1a4   :  { %v8378_v24 = vpop.f32.mrf.mxu1  ;;  %v8400_v25 = vpop.f32.mrf.mxu0  ;;  %8945 = vmatprep.subr.mxu1 %v15076_v34  ;;  %8904 = vmatprep.subr.mxu0 %v15076_v34 }
 0x1a5   :  { %8946 = vmatpush3.msra.mxu1 %v11682_v52  ;;  %8905 = vmatpush3.msra.mxu0 %v15111_v50  ;;  %v15119_v25 = vand.u32 4294901760, %v11825_v21  ;;  %v15120_v50 = vand.u32 4294901760, %v11959_v55 }
 0x1a6   :  { %v1666_v51 = vpop.f32.mrf.mxu1  ;;  %v1767_v40 = vpop.f32.mrf.mxu0  ;;  %8841 = vmatmul.mubr.f32.gmra.mxu0 %v11913_v32  ;;  %8878 = vmatmul.mubr.f32.gmra.mxu1 %v15112_v26  ;;  %v15117_v32 = vand.u32 4294901760, %v11802_v54 }
 0x1a7   :  { %v12127_v4 = vadd.f32 %v1666_v51, %v1522_v31  ;;  %v1768_v59 = vadd.f32 %v1767_v40, %v12036_v10  ;;  %8843 = vmatprep.mubr.msk.f32.mxu0 %vm10142_vm0, %v15076_v34  ;;  %8880 = vmatprep.mubr.msk.f32.mxu1 %vm10142_vm0, %v15076_v34  ;;  %v15114_v10 = vand.u32 4294901760, %v11900_v53  ;;  %v15115_v53 = vand.u32 4294901760, %v11774_v16 }
 0x1a8   :  { %v8381_v52 = vpop.f32.mrf.mxu1  ;;  %v8403_v5 = vpop.f32.mrf.mxu0  ;;  %8947 = vmatprep.subr.mxu1 %v15076_v34  ;;  %8906 = vmatprep.subr.mxu0 %v15076_v34 }
 0x1a9   :  { %8948 = vmatpush3.msra.mxu1 %v11697_v30  ;;  %8907 = vmatpush3.msra.mxu0 %v15113_v18 }
 0x1aa   :  { %v1773_v19 = vpop.f32.mrf.mxu0  ;;  %v1888_v37 = vpop.f32.mrf.mxu1  ;;  %8844 = vmatmul.mubr.f32.gmra.mxu0 %v11939_v63  ;;  %8881 = vmatmul.mubr.f32.gmra.mxu1 %v15114_v10 }
 0x1ab   :  { %v1774_v22 = vadd.f32 %v1773_v19, %v12048_v3  ;;  %v12143_v31 = vadd.f32 %v1888_v37, %v1762_v58  ;;  %8846 = vmatprep.mubr.msk.f32.mxu0 %vm10142_vm0, %v15076_v34  ;;  %8883 = vmatprep.mubr.msk.f32.mxu1 %vm10142_vm0, %v15076_v34 }
 0x1ac   :  { %v8406_v30 = vpop.f32.mrf.mxu0  ;;  %v8443_v56 = vpop.f32.mrf.mxu1  ;;  %8949 = vmatprep.subr.mxu1 %v15076_v34  ;;  %8908 = vmatprep.subr.mxu0 %v15076_v34 }
 0x1ad   :  { %8950 = vmatpush3.msra.mxu1 %v11728_v29  ;;  %8909 = vmatpush3.msra.mxu0 %v15115_v53 }
 0x1ae   :  { %v1779_v3 = vpop.f32.mrf.mxu0  ;;  %v1894_v46 = vpop.f32.mrf.mxu1  ;;  %8847 = vmatmul.mubr.f32.gmra.mxu0 %v11959_v55  ;;  %8884 = vmatmul.mubr.f32.gmra.mxu1 %v15116_v38 }
 0x1af   :  { %v1780_v60 = vadd.f32 %v1779_v3, %v12060_v36  ;;  %v12158_v6 = vadd.f32 %v1894_v46, %v1768_v59  ;;  %8849 = vmatprep.mubr.msk.f32.mxu0 %vm10142_vm0, %v15076_v34  ;;  %8886 = vmatprep.mubr.msk.f32.mxu1 %vm10142_vm0, %v15076_v34 }
 0x1b0   :  { %v8409_v29 = vpop.f32.mrf.mxu0  ;;  %v8446_v16 = vpop.f32.mrf.mxu1  ;;  %8951 = vmatprep.subr.mxu1 %v15076_v34  ;;  %8910 = vmatprep.subr.mxu0 %v15076_v34 }
 0x1b1   :  { %8952 = vmatpush3.msra.mxu1 %v11755_v23  ;;  %8911 = vmatpush3.msra.mxu0 %v15117_v32 }
 0x1b2   :  { %v1785_v36 = vpop.f32.mrf.mxu0  ;;  %v1900_v62 = vpop.f32.mrf.mxu1  ;;  %8850 = vmatmul.mubr.f32.gmra.mxu0 %v11981_v48  ;;  %8887 = vmatmul.mubr.f32.gmra.mxu1 %v15118_v15 }
 0x1b3   :  { %v1786_v58 = vadd.f32 %v1785_v36, %v12072_v20  ;;  %v12173_v24 = vadd.f32 %v1900_v62, %v1774_v22  ;;  %8852 = vmatprep.mubr.msk.f32.mxu0 %vm10142_vm0, %v15076_v34  ;;  %8889 = vmatprep.mubr.msk.f32.mxu1 %vm10142_vm0, %v15076_v34 }
 0x1b4   :  { %v8412_v23 = vpop.f32.mrf.mxu0  ;;  %v8449_v54 = vpop.f32.mrf.mxu1  ;;  %8912 = vmatprep.subr.mxu0 %v15076_v34  ;;  %8953 = vmatprep.subr.mxu1 %v15076_v34 }
 0x1b5   :  { %8913 = vmatpush3.msra.mxu0 %v15119_v25  ;;  %8954 = vmatpush3.msra.mxu1 %v11776_v17 }
 0x1b6   :  { %v1791_v63 = vpop.f32.mrf.mxu0  ;;  %v1906_v20 = vpop.f32.mrf.mxu1  ;;  %8853 = vmatmul.mubr.f32.gmra.mxu0 %v12002_v14  ;;  %8890 = vmatmul.mubr.f32.gmra.mxu1 %v15120_v50 }
 0x1b7   :  { %v1792_v51 = vadd.f32 %v1791_v63, %v12085_v28  ;;  %v12188_v40 = vadd.f32 %v1906_v20, %v1780_v60  ;;  %8892 = vmatprep.mubr.msk.f32.mxu1 %vm10142_vm0, %v15076_v34  ;;  %8914 = vmatprep.mubr.msk.f32.mxu0 %vm10142_vm0, %v15076_v34  ;;  %v15121_v28 = vand.u32 4294901760, %v11981_v48 }
 0x1b8   :  { %v8415_v21 = vpop.f32.mrf.mxu0  ;;  %v8452_v26 = vpop.f32.mrf.mxu1  ;;  %8955 = vmatprep.subr.mxu1 %v15076_v34  ;;  %8984 = vmatprep.subr.mxu0 %v15076_v34 }
 0x1b9   :  { %8956 = vmatpush3.msra.mxu1 %v11804_v44 }
 0x1ba   :  { %v1797_v17 = vpop.f32.mrf.mxu0  ;;  %v1912_v55 = vpop.f32.mrf.mxu1  ;;  %8893 = vmatmul.mubr.f32.gmra.mxu1 %v15121_v28  ;;  %8915 = vmatmul.mubr.f32.vlgmr.msra.gmra.mxu0 %v11786_v1 }
 0x1bb   :  { %v1798_v59 = vadd.f32 %v1797_v17, %v12098_v35  ;;  %v12201_v52 = vadd.f32 %v1912_v55, %v1786_v58  ;;  %8895 = vmatprep.mubr.msk.f32.mxu1 %vm10142_vm0, %v15076_v34  ;;  %8917 = vmatprep.mubr.msk.f32.mxu0 %vm10142_vm0, %v15076_v34 }
 0x1bc   :  { %v8418_v5 = vpop.f32.mrf.mxu0  ;;  %v8455_v18 = vpop.f32.mrf.mxu1  ;;  %9043 = vmatprep.subr.mxu1 %v15076_v34 }
 0x1be   :  { %v1803_v44 = vpop.f32.mrf.mxu0  ;;  %v1918_v19 = vpop.f32.mrf.mxu1  ;;  %8896 = vmatmul.mubr.f32.gmra.mxu1 %v3058_v2  ;;  %8918 = vmatmul.mubr.f32.gmra.mxu0 %v11830_v49 }
 0x1bf   :  { %v1804_v48 = vadd.f32 %v1803_v44, %v12112_v12  ;;  %v12212_v35 = vadd.f32 %v1918_v19, %v1792_v51  ;;  %8920 = vmatprep.mubr.msk.f32.mxu0 %vm10142_vm0, %v15076_v34  ;;  %8957 = vmatprep.mubr.msk.f32.mxu1 %vm10142_vm0, %v15076_v34 }
 0x1c0   :  { %v8421_v37 = vpop.f32.mrf.mxu0  ;;  %v8458_v10 = vpop.f32.mrf.mxu1 }
 0x1c2   :  { %v1809_v22 = vpop.f32.mrf.mxu0  ;;  %v1924_v30 = vpop.f32.mrf.mxu1  ;;  %8921 = vmatmul.mubr.f32.gmra.mxu0 %v11853_v7  ;;  %8958 = vmatmul.mubr.f32.vlgmr.msra.gmra.mxu1 %v11786_v1 }
 0x1c3   :  { %v1810_v14 = vadd.f32 %v1809_v22, %v12127_v4  ;;  %v12221_v2 = vadd.f32 %v1924_v30, %v1798_v59  ;;  %8923 = vmatprep.mubr.msk.f32.mxu0 %vm10142_vm0, %v15076_v34  ;;  %8960 = vmatprep.mubr.msk.f32.mxu1 %vm10142_vm0, %v15076_v34  ;;  %v4056_v30 = vld [vmem:[#allocation5 + $0xf8] sm:$0xff] }
 0x1c4   :  { %v8424_v12 = vpop.f32.mrf.mxu0  ;;  %v8461_v56 = vpop.f32.mrf.mxu1 }
 0x1c5   :  { %v4055_v56 = vld [vmem:[#allocation5 + $0xf0] sm:$0xff] }
 0x1c6   :  { %v1930_v53 = vpop.f32.mrf.mxu1  ;;  %v2046_v3 = vpop.f32.mrf.mxu0  ;;  %8924 = vmatmul.mubr.f32.gmra.mxu0 %v11878_v43  ;;  %8961 = vmatmul.mubr.f32.gmra.mxu1 %v11830_v49 }
 0x1c7   :  { %v12229_v46 = vadd.f32 %v1930_v53, %v1804_v48  ;;  %v2047_v1 = vadd.f32 %v2046_v3, %v12143_v31  ;;  %8926 = vmatprep.mubr.msk.f32.mxu0 %vm10142_vm0, %v15076_v34  ;;  %8963 = vmatprep.mubr.msk.f32.mxu1 %vm10142_vm0, %v15076_v34 }
 0x1c8   :  { %v8464_v4 = vpop.f32.mrf.mxu1  ;;  %v8486_v38 = vpop.f32.mrf.mxu0 }
 0x1c9   :  { %v4054_v38 = vld [vmem:[#allocation5 + $0xe8] sm:$0xff] }
 0x1ca   :  { %v1936_v60 = vpop.f32.mrf.mxu1  ;;  %v2056_v29 = vpop.f32.mrf.mxu0  ;;  %8927 = vmatmul.mubr.f32.gmra.mxu0 %v11891_v61  ;;  %8964 = vmatmul.mubr.f32.gmra.mxu1 %v11853_v7 }
 0x1cb   :  { %v12238_v16 = vadd.f32 %v1936_v60, %v1810_v14  ;;  %v2057_v49 = vadd.f32 %v2056_v29, %v12158_v6  ;;  %8929 = vmatprep.mubr.msk.f32.mxu0 %vm10142_vm0, %v15076_v34  ;;  %8966 = vmatprep.mubr.msk.f32.mxu1 %vm10142_vm0, %v15076_v34  ;;  %v12293_v14 = vand.u32 4294901760, %v4056_v30 }
 0x1cc   :  { %v8467_v31 = vpop.f32.mrf.mxu1  ;;  %v8489_v32 = vpop.f32.mrf.mxu0 }
 0x1cd   :  { %8985 = vmatpush3.msra.mxu0 %v12293_v14  ;;  %v4053_v32 = vld [vmem:[#allocation5 + $0xe0] sm:$0xff] }
 0x1ce   :  { %v2066_v36 = vpop.f32.mrf.mxu0  ;;  %v2237_v62 = vpop.f32.mrf.mxu1  ;;  %8930 = vmatmul.mubr.f32.gmra.mxu0 %v11920_v41  ;;  %8967 = vmatmul.mubr.f32.gmra.mxu1 %v11878_v43 }
 0x1cf   :  { %v2067_v7 = vadd.f32 %v2066_v36, %v12173_v24  ;;  %v12248_v15 = vadd.f32 %v2237_v62, %v2047_v1  ;;  %8932 = vmatprep.mubr.msk.f32.mxu0 %vm10142_vm0, %v15076_v34  ;;  %8969 = vmatprep.mubr.msk.f32.mxu1 %vm10142_vm0, %v15076_v34 }
 0x1d0   :  { %v8492_v6 = vpop.f32.mrf.mxu0  ;;  %v8529_v58 = vpop.f32.mrf.mxu1  ;;  %8986 = vmatprep.subr.mxu0 %v15076_v34 }
 0x1d2   :  { %v2076_v23 = vpop.f32.mrf.mxu0  ;;  %v2243_v54 = vpop.f32.mrf.mxu1  ;;  %8933 = vmatmul.mubr.f32.gmra.mxu0 %v11941_v13  ;;  %8970 = vmatmul.mubr.f32.gmra.mxu1 %v11891_v61 }
 0x1d3   :  { %v2077_v43 = vadd.f32 %v2076_v23, %v12188_v40  ;;  %v12257_v25 = vadd.f32 %v2243_v54, %v2057_v49  ;;  %8935 = vmatprep.mubr.msk.f32.mxu0 %vm10142_vm0, %v15076_v34  ;;  %8972 = vmatprep.mubr.msk.f32.mxu1 %vm10142_vm0, %v15076_v34 }
 0x1d4   :  { %v8495_v24 = vpop.f32.mrf.mxu0  ;;  %v8532_v63 = vpop.f32.mrf.mxu1 }
 0x1d5   :  { %v4052_v24 = vld [vmem:[#allocation5 + $0xd8] sm:$0xff] }
 0x1d6   :  { %v2086_v20 = vpop.f32.mrf.mxu0  ;;  %v2249_v50 = vpop.f32.mrf.mxu1  ;;  %8936 = vmatmul.mubr.f32.gmra.mxu0 %v11961_v47  ;;  %8973 = vmatmul.mubr.f32.gmra.mxu1 %v11920_v41 }
 0x1d7   :  { %v2087_v61 = vadd.f32 %v2086_v20, %v12201_v52  ;;  %v12266_v51 = vadd.f32 %v2249_v50, %v2067_v7  ;;  %8938 = vmatprep.mubr.msk.f32.mxu0 %vm10142_vm0, %v15076_v34  ;;  %8975 = vmatprep.mubr.msk.f32.mxu1 %vm10142_vm0, %v15076_v34  ;;  %v12330_v20 = vand.u32 4294901760, %v4052_v24 }
 0x1d8   :  { %v8498_v40 = vpop.f32.mrf.mxu0  ;;  %v8535_v21 = vpop.f32.mrf.mxu1 }
 0x1d9   :  { %15124 = vst [vmem:[#allocation13_spill] sm:$0xff] %v12330_v20 }
 0x1da   :  { %v2096_v26 = vpop.f32.mrf.mxu0  ;;  %v2255_v17 = vpop.f32.mrf.mxu1  ;;  %8939 = vmatmul.mubr.f32.gmra.mxu0 %v11983_v11  ;;  %8976 = vmatmul.mubr.f32.gmra.mxu1 %v11941_v13 }
 0x1db   :  { %v2097_v41 = vadd.f32 %v2096_v26, %v12212_v35  ;;  %v12275_v55 = vadd.f32 %v2255_v17, %v2077_v43  ;;  %8978 = vmatprep.mubr.msk.f32.mxu1 %vm10142_vm0, %v15076_v34  ;;  %9016 = vmatprep.mubr.msk.f32.mxu0 %vm10142_vm0, %v15076_v34  ;;  %v12324_v43 = vand.u32 4294901760, %v4053_v32  ;;  %v4051_v26 = vld [vmem:[#allocation5 + $0xd0] sm:$0xff] }
 0x1dc   :  { %v8501_v28 = vpop.f32.mrf.mxu0  ;;  %v8538_v59 = vpop.f32.mrf.mxu1 }
 0x1dd   :  { %v12334_v21 = vsub.f32 %v4053_v32, %v12324_v43  ;;  %v12341_v59 = vsub.f32 %v4052_v24, %v12330_v20 }
 0x1de   :  { %v2106_v52 = vpop.f32.mrf.mxu0  ;;  %v2261_v5 = vpop.f32.mrf.mxu1  ;;  %8979 = vmatmul.mubr.f32.gmra.mxu1 %v11961_v47 }
 0x1df   :  { %v2107_v18 = vadd.f32 %v2106_v52, %v12221_v2  ;;  %v12283_v44 = vadd.f32 %v2261_v5, %v2087_v61  ;;  %8981 = vmatprep.mubr.msk.f32.mxu1 %vm10142_vm0, %v15076_v34  ;;  %15125 = vst [vmem:[#allocation23_spill] sm:$0xff] %v12334_v21  ;;  %15126 = vst [vmem:[#allocation24_spill] sm:$0xff] %v12341_v59 }
 0x1e0   :  { %v8504_v13 = vpop.f32.mrf.mxu0  ;;  %v8541_v19 = vpop.f32.mrf.mxu1 }
 0x1e1   :  { %v14911_v13 = vand.u32 4294901760, %v12334_v21  ;;  %v12349_v19 = vand.u32 4294901760, %v4051_v26 }
 0x1e2   :  { %v2116_v48 = vpop.f32.mrf.mxu0  ;;  %v2267_v35 = vpop.f32.mrf.mxu1  ;;  %8982 = vmatmul.mubr.f32.gmra.mxu1 %v11983_v11  ;;  %v12299_v11 = vsub.f32 %v4056_v30, %v12293_v14 }
 0x1e3   :  { %v2117_v37 = vadd.f32 %v2116_v48, %v12229_v46  ;;  %v12289_v10 = vadd.f32 %v2267_v35, %v2097_v41  ;;  %9075 = vmatprep.mubr.msk.f32.mxu1 %vm10142_vm0, %v15076_v34  ;;  %v12301_v46 = vand.u32 4294901760, %v4055_v56  ;;  %15127 = vst [vmem:[#allocation25_spill] sm:$0xff] %v12349_v19  ;;  %v14909_v48 = vand.u32 4294901760, %v12341_v59 }
 0x1e4   :  { %v8507_v47 = vpop.f32.mrf.mxu0  ;;  %v8544_v22 = vpop.f32.mrf.mxu1  ;;  %v14916_v60 = vand.u32 4294901760, %v12299_v11  ;;  %v4253_v30 = vsub.f32 %v12334_v21, %v14911_v13 }
 0x1e5   :  { %v12307_v29 = vsub.f32 %v4055_v56, %v12301_v46  ;;  %8987 = vmatpush3.msra.mxu0 %v12301_v46 }
 0x1e6   :  { %v2126_v2 = vpop.f32.mrf.mxu0  ;;  %v2273_v12 = vpop.f32.mrf.mxu1  ;;  %8988 = vmatprep.subr.mxu0 %v15076_v34  ;;  %v4232_v7 = vsub.f32 %v12299_v11, %v14916_v60 }
 0x1e7   :  { %v2127_v53 = vadd.f32 %v2126_v2, %v12238_v16  ;;  %v12296_v3 = vadd.f32 %v2273_v12, %v2107_v18  ;;  %15122 = vst [vmem:[#allocation11_spill] sm:$0xff] %v12307_v29  ;;  %v12309_v16 = vand.u32 4294901760, %v4054_v38  ;;  %v14914_v6 = vand.u32 4294901760, %v12307_v29  ;;  %v4049_v12 = vld [vmem:[#allocation5 + $0xc0] sm:$0xff] }
 0x1e8   :  { %v8510_v1 = vpop.f32.mrf.mxu0  ;;  %v8547_v4 = vpop.f32.mrf.mxu1  ;;  %v4233_v63 = vand.u32 4294901760, %v4232_v7  ;;  %v12361_v2 = vsub.f32 %v4051_v26, %v12349_v19  ;;  %v12375_v7 = vand.u32 4294901760, %v4049_v12 }
 0x1e9   :  { %8989 = vmatpush3.msra.mxu0 %v12309_v16  ;;  %v12322_v54 = vsub.f32 %v4054_v38, %v12309_v16  ;;  %v4260_v1 = vsub.f32 %v12341_v59, %v14909_v48 }
 0x1ea   :  { %v2279_v49 = vpop.f32.mrf.mxu1  ;;  %v2373_v31 = vpop.f32.mrf.mxu0  ;;  %8990 = vmatprep.subr.mxu0 %v15076_v34  ;;  %9044 = vmatpush3.msra.mxu1 %v4233_v63  ;;  %15129 = vst [vmem:[#allocation27_spill] sm:$0xff] %v12361_v2  ;;  %v14907_v32 = vand.u32 4294901760, %v12361_v2  ;;  %15131 = vst [vmem:[#allocation29_spill] sm:$0xff] %v12375_v7 }
 0x1eb   :  { %v12313_v36 = vadd.f32 %v2279_v49, %v2117_v37  ;;  %v2374_v62 = vadd.f32 %v2373_v31, %v12248_v15  ;;  %15123 = vst [vmem:[#allocation12_spill] sm:$0xff] %v12322_v54  ;;  %v4239_v15 = vsub.f32 %v12307_v29, %v14914_v6  ;;  %v14913_v40 = vand.u32 4294901760, %v12322_v54  ;;  %8991 = vmatpush3.msra.mxu0 %v12324_v43 }
 0x1ec   :  { %v8550_v58 = vpop.f32.mrf.mxu1  ;;  %v8572_v23 = vpop.f32.mrf.mxu0  ;;  %8992 = vmatprep.subr.mxu0 %v15076_v34  ;;  %9045 = vmatprep.subr.mxu1 %v15076_v34  ;;  %v4254_v31 = vand.u32 4294901760, %v4253_v30 }
 0x1ed   :  { %v4240_v28 = vand.u32 4294901760, %v4239_v15  ;;  %v4246_v18 = vsub.f32 %v12322_v54, %v14913_v40  ;;  %8993 = vmatpush3.msra.mxu0 %v12330_v20  ;;  %v4267_v15 = vsub.f32 %v12361_v2, %v14907_v32  ;;  %v4042_v32 = vld [vmem:[#allocation5 + $0x88] sm:$0xff] }
 0x1ee   :  { %v2285_v50 = vpop.f32.mrf.mxu1  ;;  %v2380_v61 = vpop.f32.mrf.mxu0  ;;  %8994 = vmatprep.subr.mxu0 %v15076_v34 }
 0x1ef   :  { %v12337_v17 = vadd.f32 %v2285_v50, %v2127_v53  ;;  %v2381_v41 = vadd.f32 %v2380_v61, %v12257_v25  ;;  %v4050_v25 = vld [vmem:[#allocation5 + $0xc8] sm:$0xff]  ;;  %9046 = vmatpush3.msra.mxu1 %v4240_v28  ;;  %v4247_v22 = vand.u32 4294901760, %v4246_v18  ;;  %8995 = vmatpush3.msra.mxu0 %v12349_v19  ;;  %v12387_v50 = vsub.f32 %v4049_v12, %v12375_v7  ;;  %v4047_v61 = vld [vmem:[#allocation5 + $0xb0] sm:$0xff] }
 0x1f0   :  { %v8553_v52 = vpop.f32.mrf.mxu1  ;;  %v8575_v5 = vpop.f32.mrf.mxu0  ;;  %v12353_v35 = vand.u32 4294901760, %v4050_v25  ;;  %9047 = vmatprep.subr.mxu1 %v15076_v34  ;;  %8996 = vmatprep.subr.mxu0 %v15076_v34 }
 0x1f1   :  { %9048 = vmatpush3.msra.mxu1 %v4247_v22  ;;  %15133 = vst [vmem:[#allocation31_spill] sm:$0xff] %v12387_v50  ;;  %v12401_v22 = vand.u32 4294901760, %v4047_v61 }
 0x1f2   :  { %15128 = vst [vmem:[#allocation26_spill] sm:$0xff] %v12353_v35  ;;  %v2387_v37 = vpop.f32.mrf.mxu0  ;;  %v2510_v47 = vpop.f32.mrf.mxu1  ;;  %v12371_v4 = vsub.f32 %v4050_v25, %v12353_v35  ;;  %8997 = vmatpush3.msra.mxu0 %v12353_v35  ;;  %9049 = vmatprep.subr.mxu1 %v15076_v34 }
 0x1f3   :  { %v2388_v56 = vadd.f32 %v2387_v37, %v12266_v51  ;;  %v12365_v53 = vadd.f32 %v2510_v47, %v2374_v62  ;;  %v4048_v51 = vld [vmem:[#allocation5 + $0xb8] sm:$0xff]  ;;  %v4261_v62 = vand.u32 4294901760, %v4260_v1  ;;  %8998 = vmatprep.subr.mxu0 %v15076_v34  ;;  %9050 = vmatpush3.msra.mxu1 %v4254_v31  ;;  %v4268_v37 = vand.u32 4294901760, %v4267_v15  ;;  %15135 = vst [vmem:[#allocation33_spill] sm:$0xff] %v12401_v22 }
 0x1f4   :  { %15130 = vst [vmem:[#allocation28_spill] sm:$0xff] %v12371_v4  ;;  %v8578_v38 = vpop.f32.mrf.mxu0  ;;  %v8615_v49 = vpop.f32.mrf.mxu1  ;;  %v14905_v58 = vand.u32 4294901760, %v12371_v4  ;;  %v12380_v23 = vand.u32 4294901760, %v4048_v51  ;;  %8999 = vmatpush3.msra.mxu0 %v12375_v7  ;;  %9051 = vmatprep.subr.mxu1 %v15076_v34  ;;  %v14904_v47 = vand.u32 4294901760, %v12387_v50  ;;  %v12413_v31 = vsub.f32 %v4047_v61, %v12401_v22 }
 0x1f5   :  { %9052 = vmatpush3.msra.mxu1 %v4261_v62  ;;  %9000 = vmatprep.subr.mxu0 %v15076_v34 }
 0x1f6   :  { %15132 = vst [vmem:[#allocation30_spill] sm:$0xff] %v12380_v23  ;;  %v2394_v24 = vpop.f32.mrf.mxu0  ;;  %v2518_v63 = vpop.f32.mrf.mxu1  ;;  %v4274_v52 = vsub.f32 %v12371_v4, %v14905_v58  ;;  %v12398_v5 = vsub.f32 %v4048_v51, %v12380_v23  ;;  %9053 = vmatprep.subr.mxu1 %v15076_v34  ;;  %9001 = vmatpush3.msra.mxu0 %v12380_v23  ;;  %15137 = vst [vmem:[#allocation35_spill] sm:$0xff] %v12413_v31  ;;  %v4045_v51 = vld [vmem:[#allocation5 + $0xa0] sm:$0xff] }
 0x1f7   :  { %v2395_v26 = vadd.f32 %v2394_v24, %v12275_v55  ;;  %v12391_v28 = vadd.f32 %v2518_v63, %v2381_v41  ;;  %v4046_v55 = vld [vmem:[#allocation5 + $0xa8] sm:$0xff]  ;;  %9054 = vmatpush3.msra.mxu1 %v4268_v37  ;;  %v4281_v49 = vsub.f32 %v12387_v50, %v14904_v47  ;;  %9002 = vmatprep.subr.mxu0 %v15076_v34  ;;  %v4044_v37 = vld [vmem:[#allocation5 + $0x98] sm:$0xff] }
 0x1f8   :  { %15134 = vst [vmem:[#allocation32_spill] sm:$0xff] %v12398_v5  ;;  %v8581_v18 = vpop.f32.mrf.mxu0  ;;  %v8618_v25 = vpop.f32.mrf.mxu1  ;;  %v4275_v41 = vand.u32 4294901760, %v4274_v52  ;;  %v14903_v30 = vand.u32 4294901760, %v12398_v5  ;;  %v12406_v12 = vand.u32 4294901760, %v4046_v55  ;;  %9055 = vmatprep.subr.mxu1 %v15076_v34  ;;  %9003 = vmatpush3.msra.mxu0 %v12401_v22 }
 0x1f9   :  { %v4282_v61 = vand.u32 4294901760, %v4281_v49  ;;  %v14906_v25 = vand.u32 4294901760, %v12413_v31  ;;  %9004 = vmatprep.subr.mxu0 %v15076_v34  ;;  %v4043_v49 = vld [vmem:[#allocation5 + $0x90] sm:$0xff] }
 0x1fa   :  { %15136 = vst [vmem:[#allocation34_spill] sm:$0xff] %v12406_v12  ;;  %v2401_v1 = vpop.f32.mrf.mxu0  ;;  %v2526_v38 = vpop.f32.mrf.mxu1  ;;  %v4288_v63 = vsub.f32 %v12398_v5, %v14903_v30  ;;  %v12424_v15 = vsub.f32 %v4046_v55, %v12406_v12  ;;  %9056 = vmatpush3.msra.mxu1 %v4275_v41  ;;  %9005 = vmatpush3.msra.mxu0 %v12406_v12  ;;  %v12596_v5 = vadd.s32 40, %v10650_v27 }
 0x1fb   :  { %v2402_v62 = vadd.f32 %v2401_v1, %v12283_v44  ;;  %v12417_v24 = vadd.f32 %v2526_v38, %v2388_v56  ;;  %9057 = vmatprep.subr.mxu1 %v15076_v34  ;;  %v12430_v1 = vand.u32 4294901760, %v4045_v51  ;;  %v12432_v38 = vand.u32 4294901760, %v4044_v37  ;;  %9006 = vmatprep.subr.mxu0 %v15076_v34 }
 0x1fc   :  { %15138 = vst [vmem:[#allocation36_spill] sm:$0xff] %v12424_v15  ;;  %v8584_v52 = vpop.f32.mrf.mxu0  ;;  %v8621_v18 = vpop.f32.mrf.mxu1  ;;  %v4289_v44 = vand.u32 4294901760, %v4288_v63  ;;  %v14908_v56 = vand.u32 4294901760, %v12424_v15  ;;  %9058 = vmatpush3.msra.mxu1 %v4282_v61  ;;  %v4295_v41 = vsub.f32 %v12413_v31, %v14906_v25  ;;  %v12590_v31 = vadd.s32 32, %v10650_v27 }
 0x1fd   :  { %15139 = vst [vmem:[#allocation37_spill] sm:$0xff] %v12430_v1  ;;  %15140 = vst [vmem:[#allocation38_spill] sm:$0xff] %v12432_v38  ;;  %9059 = vmatprep.subr.mxu1 %v15076_v34  ;;  %v12447_v47 = vsub.f32 %v4045_v51, %v12430_v1  ;;  %9007 = vmatpush3.msra.mxu0 %v12430_v1 }
 0x1fe   :  { %v2408_v55 = vpop.f32.mrf.mxu0  ;;  %v2534_v52 = vpop.f32.mrf.mxu1  ;;  %v4302_v30 = vsub.f32 %v12424_v15, %v14908_v56  ;;  %9060 = vmatpush3.msra.mxu1 %v4289_v44  ;;  %v4296_v25 = vand.u32 4294901760, %v4295_v41  ;;  %9008 = vmatprep.subr.mxu0 %v15076_v34 }
 0x1ff   :  { %v2409_v63 = vadd.f32 %v2408_v55, %v12289_v10  ;;  %v12440_v18 = vadd.f32 %v2534_v52, %v2395_v26  ;;  %15141 = vst [vmem:[#allocation39_spill] sm:$0xff] %v12447_v47  ;;  %9061 = vmatprep.subr.mxu1 %v15076_v34  ;;  %v14910_v26 = vand.u32 4294901760, %v12447_v47  ;;  %v12453_v55 = vsub.f32 %v4044_v37, %v12432_v38 }
 0x200   :  { %v8587_v61 = vpop.f32.mrf.mxu0  ;;  %v8624_v58 = vpop.f32.mrf.mxu1  ;;  %v4303_v10 = vand.u32 4294901760, %v4302_v30  ;;  %v12455_v52 = vand.u32 4294901760, %v4043_v49  ;;  %9062 = vmatpush3.msra.mxu1 %v4296_v25  ;;  %9009 = vmatpush3.msra.mxu0 %v12432_v38 }
 0x201   :  { %15142 = vst [vmem:[#allocation40_spill] sm:$0xff] %v12453_v55  ;;  %v12458_v58 = vand.u32 4294901760, %v4042_v32  ;;  %9063 = vmatprep.subr.mxu1 %v15076_v34  ;;  %v4309_v30 = vsub.f32 %v12447_v47, %v14910_v26  ;;  %v14912_v37 = vand.u32 4294901760, %v12453_v55  ;;  %9010 = vmatprep.subr.mxu0 %v15076_v34 }
 0x202   :  { %15143 = vst [vmem:[#allocation41_spill] sm:$0xff] %v12455_v52  ;;  %v2415_v51 = vpop.f32.mrf.mxu0  ;;  %v2542_v61 = vpop.f32.mrf.mxu1  ;;  %9064 = vmatpush3.msra.mxu1 %v4303_v10  ;;  %v12471_v48 = vsub.f32 %v4043_v49, %v12455_v52  ;;  %9011 = vmatpush3.msra.mxu0 %v12455_v52 }
 0x203   :  { %15144 = vst [vmem:[#allocation42_spill] sm:$0xff] %v12458_v58  ;;  %v2416_v44 = vadd.f32 %v2415_v51, %v12296_v3  ;;  %v12462_v41 = vadd.f32 %v2542_v61, %v2402_v62  ;;  %v12474_v3 = vsub.f32 %v4042_v32, %v12458_v58  ;;  %9065 = vmatprep.subr.mxu1 %v15076_v34  ;;  %v4310_v62 = vand.u32 4294901760, %v4309_v30  ;;  %v4041_v61 = vld [vmem:[#allocation5 + $0x80] sm:$0xff] }
 0x204   :  { %v8590_v56 = vpop.f32.mrf.mxu0  ;;  %v8627_v25 = vpop.f32.mrf.mxu1  ;;  %15145 = vst [vmem:[#allocation43_spill] sm:$0xff] %v12471_v48  ;;  %v4316_v51 = vsub.f32 %v12453_v55, %v14912_v37  ;;  %9012 = vmatprep.subr.mxu0 %v15076_v34  ;;  %v14915_v26 = vand.u32 4294901760, %v12471_v48  ;;  %v12490_v40 = vand.u32 4294901760, %v4041_v61 }
 0x205   :  { %15146 = vst [vmem:[#allocation44_spill] sm:$0xff] %v12474_v3  ;;  %9066 = vmatpush3.msra.mxu1 %v4310_v62  ;;  %9013 = vmatpush3.msra.mxu0 %v12458_v58  ;;  %v14917_v37 = vand.u32 4294901760, %v12474_v3 }
 0x206   :  { %v2422_v56 = vpop.f32.mrf.mxu0  ;;  %v2550_v10 = vpop.f32.mrf.mxu1  ;;  %v4317_v25 = vand.u32 4294901760, %v4316_v51  ;;  %9067 = vmatprep.subr.mxu1 %v15076_v34  ;;  %15147 = vst [vmem:[#allocation45_spill] sm:$0xff] %v12490_v40  ;;  %9014 = vmatprep.subr.mxu0 %v15076_v34 }
 0x207   :  { %v2423_v49 = vadd.f32 %v2422_v56, %v12313_v36  ;;  %v12484_v32 = vadd.f32 %v2550_v10, %v2409_v63  ;;  %v4323_v36 = vsub.f32 %v12471_v48, %v14915_v26  ;;  %9015 = vmatpush3.msra.mxu0 %v12490_v40  ;;  %v12504_v26 = vsub.f32 %v4041_v61, %v12490_v40 }
 0x208   :  { %v8593_v30 = vpop.f32.mrf.mxu0  ;;  %v8630_v13 = vpop.f32.mrf.mxu1  ;;  %9068 = vmatpush3.msra.mxu1 %v4317_v25  ;;  %9102 = vmatprep.subr.mxu0 %v15076_v34 }
 0x209   :  { %9069 = vmatprep.subr.mxu1 %v15076_v34  ;;  %v4330_v13 = vsub.f32 %v12474_v3, %v14917_v37  ;;  %v4324_v10 = vand.u32 4294901760, %v4323_v36  ;;  %15148 = vst [vmem:[#allocation46_spill] sm:$0xff] %v12504_v26  ;;  %v14918_v37 = vand.u32 4294901760, %v12504_v26 }
 0x20a   :  { %v2429_v63 = vpop.f32.mrf.mxu0  ;;  %v2558_v62 = vpop.f32.mrf.mxu1 }
 0x20b   :  { %v2430_v51 = vadd.f32 %v2429_v63, %v12337_v17  ;;  %v2559_v56 = vadd.f32 %v2558_v62, %v2416_v44  ;;  %v4331_v6 = vand.u32 4294901760, %v4330_v13  ;;  %9070 = vmatpush3.msra.mxu1 %v4324_v10  ;;  %v4337_v61 = vsub.f32 %v12504_v26, %v14918_v37 }
 0x20c   :  { %v8596_v25 = vpop.f32.mrf.mxu0  ;;  %v8633_v30 = vpop.f32.mrf.mxu1  ;;  %9071 = vmatprep.subr.mxu1 %v15076_v34 }
 0x20d   :  { %9072 = vmatpush3.msra.mxu1 %v4331_v6  ;;  %v4338_v13 = vand.u32 4294901760, %v4337_v61 }
 0x20e   :  { %v2566_v60 = vpop.f32.mrf.mxu1  ;;  %v2669_v45 = vpop.f32.mrf.mxu0  ;;  %9073 = vmatprep.subr.mxu1 %v15076_v34 }
 0x20f   :  { %v2567_v8 = vadd.f32 %v2566_v60, %v2423_v49  ;;  %v2670_v17 = vadd.f32 %v2669_v45, %v12365_v53  ;;  %9074 = vmatpush3.msra.mxu1 %v4338_v13 }
 0x210   :  { %v8636_v44 = vpop.f32.mrf.mxu1  ;;  %v8658_v36 = vpop.f32.mrf.mxu0  ;;  %9161 = vmatprep.subr.mxu1 %v15076_v34 }
 0x212   :  { %v2574_v63 = vpop.f32.mrf.mxu1  ;;  %v2675_v62 = vpop.f32.mrf.mxu0 }
 0x213   :  { %v2575_v10 = vadd.f32 %v2574_v63, %v2430_v51  ;;  %v2676_v25 = vadd.f32 %v2675_v62, %v12391_v28 }
 0x214   :  { %v8639_v30 = vpop.f32.mrf.mxu1  ;;  %v8661_v0 = vpop.f32.mrf.mxu0 }
 0x216   :  { %v2681_v45 = vpop.f32.mrf.mxu0  ;;  %v2796_v60 = vpop.f32.mrf.mxu1 }
 0x217   :  { %v2682_v6 = vadd.f32 %v2681_v45, %v12417_v24  ;;  %v12516_v53 = vadd.f32 %v2796_v60, %v2670_v17 }
 0x218   :  { %v8664_v49 = vpop.f32.mrf.mxu0  ;;  %v8701_v44 = vpop.f32.mrf.mxu1 }
 0x21a   :  { %v2687_v36 = vpop.f32.mrf.mxu0  ;;  %v2802_v37 = vpop.f32.mrf.mxu1 }
 0x21b   :  { %v2688_v61 = vadd.f32 %v2687_v36, %v12440_v18  ;;  %v12519_v51 = vadd.f32 %v2802_v37, %v2676_v25 }
 0x21c   :  { %v8667_v28 = vpop.f32.mrf.mxu0  ;;  %v8704_v63 = vpop.f32.mrf.mxu1 }
 0x21e   :  { %v2693_v0 = vpop.f32.mrf.mxu0  ;;  %v2808_v62 = vpop.f32.mrf.mxu1 }
 0x21f   :  { %v2694_v13 = vadd.f32 %v2693_v0, %v12462_v41  ;;  %v12522_v30 = vadd.f32 %v2808_v62, %v2682_v6 }
 0x220   :  { %v8670_v42 = vpop.f32.mrf.mxu0  ;;  %v8707_v24 = vpop.f32.mrf.mxu1 }
 0x222   :  { %v2699_v17 = vpop.f32.mrf.mxu0  ;;  %v2814_v45 = vpop.f32.mrf.mxu1 }
 0x223   :  { %v2700_v60 = vadd.f32 %v2699_v17, %v12484_v32  ;;  %v12525_v49 = vadd.f32 %v2814_v45, %v2688_v61 }
 0x224   :  { %v8673_v44 = vpop.f32.mrf.mxu0  ;;  %v8710_v18 = vpop.f32.mrf.mxu1 }
 0x226   :  { %v2705_v37 = vpop.f32.mrf.mxu0  ;;  %v2820_v25 = vpop.f32.mrf.mxu1 }
 0x227   :  { %v2706_v36 = vadd.f32 %v2705_v37, %v2559_v56  ;;  %v12527_v28 = vadd.f32 %v2820_v25, %v2694_v13 }
 0x228   :  { %v8676_v63 = vpop.f32.mrf.mxu0  ;;  %v8713_v9 = vpop.f32.mrf.mxu1 }
 0x22a   :  { %v2711_v41 = vpop.f32.mrf.mxu0  ;;  %v2826_v6 = vpop.f32.mrf.mxu1 }
 0x22b   :  { %v2712_v0 = vadd.f32 %v2711_v41, %v2567_v8  ;;  %v12529_v42 = vadd.f32 %v2826_v6, %v2700_v60 }
 0x22c   :  { %v8679_v62 = vpop.f32.mrf.mxu0  ;;  %v8716_v24 = vpop.f32.mrf.mxu1 }
 0x22d   :  { %15149 = vst [vmem:[#allocation47_spill] sm:$0xff] %v12529_v42 }
 0x22e   :  { %v2717_v57 = vpop.f32.mrf.mxu0  ;;  %v2832_v32 = vpop.f32.mrf.mxu1 }
 0x22f   :  { %v2718_v61 = vadd.f32 %v2717_v57, %v2575_v10  ;;  %v12531_v17 = vadd.f32 %v2832_v32, %v2706_v36 }
 0x230   :  { %v8682_v45 = vpop.f32.mrf.mxu0  ;;  %v8719_v44 = vpop.f32.mrf.mxu1 }
 0x231   :  { %15150 = vst [vmem:[#allocation48_spill] sm:$0xff] %v12531_v17 }
 0x232   :  { %v2838_v18 = vpop.f32.mrf.mxu1  ;;  %v2982_v56 = vpop.f32.mrf.mxu0 }
 0x233   :  { %v12533_v13 = vadd.f32 %v2838_v18, %v2712_v0 }
 0x234   :  { %v8722_v37 = vpop.f32.mrf.mxu1  ;;  %v8744_v9 = vpop.f32.mrf.mxu0 }
 0x235   :  { %15151 = vst [vmem:[#allocation49_spill] sm:$0xff] %v12533_v13  ;;  %v12626_v13 = vadd.s32 56, %v10650_v27 }
 0x236   :  { %v2844_v25 = vpop.f32.mrf.mxu1  ;;  %v2992_v63 = vpop.f32.mrf.mxu0 }
 0x237   :  { %v12535_v8 = vadd.f32 %v2844_v25, %v2718_v61 }
 0x238   :  { %v8725_v60 = vpop.f32.mrf.mxu1  ;;  %v8747_v41 = vpop.f32.mrf.mxu0 }
 0x239   :  { %15152 = vst [vmem:[#allocation50_spill] sm:$0xff] %v12535_v8 }
 0x23a   :  { %v3002_v6 = vpop.f32.mrf.mxu0  ;;  %v3173_v62 = vpop.f32.mrf.mxu1 }
 0x23b   :  { %v12537_v24 = vadd.f32 %v3173_v62, %v2982_v56 }
 0x23c   :  { %v8750_v57 = vpop.f32.mrf.mxu0  ;;  %v8787_v10 = vpop.f32.mrf.mxu1 }
 0x23e   :  { %v3012_v36 = vpop.f32.mrf.mxu0  ;;  %v3179_v32 = vpop.f32.mrf.mxu1 }
 0x23f   :  { %v12539_v45 = vadd.f32 %v3179_v32, %v2992_v63 }
 0x240   :  { %v8753_v0 = vpop.f32.mrf.mxu0  ;;  %v8790_v44 = vpop.f32.mrf.mxu1 }
 0x242   :  { %v3022_v18 = vpop.f32.mrf.mxu0  ;;  %v3185_v37 = vpop.f32.mrf.mxu1 }
 0x243   :  { %v12541_v9 = vadd.f32 %v3185_v37, %v3002_v6 }
 0x244   :  { %v8756_v61 = vpop.f32.mrf.mxu0  ;;  %v8793_v25 = vpop.f32.mrf.mxu1 }
 0x246   :  { %v3032_v60 = vpop.f32.mrf.mxu0  ;;  %v3191_v41 = vpop.f32.mrf.mxu1 }
 0x247   :  { %v12543_v33 = vadd.f32 %v3191_v41, %v3012_v36 }
 0x248   :  { %v8759_v56 = vpop.f32.mrf.mxu0  ;;  %v8796_v62 = vpop.f32.mrf.mxu1 }
 0x24a   :  { %v3042_v57 = vpop.f32.mrf.mxu0  ;;  %v3197_v10 = vpop.f32.mrf.mxu1 }
 0x24b   :  { %v12545_v39 = vadd.f32 %v3197_v10, %v3022_v18 }
 0x24c   :  { %v8762_v63 = vpop.f32.mrf.mxu0  ;;  %v8799_v32 = vpop.f32.mrf.mxu1 }
 0x24e   :  { %v3052_v0 = vpop.f32.mrf.mxu0  ;;  %v3203_v44 = vpop.f32.mrf.mxu1 }
 0x24f   :  { %v12547_v26 = vadd.f32 %v3203_v44, %v3032_v60 }
 0x250   :  { %v8765_v6 = vpop.f32.mrf.mxu0  ;;  %v8802_v37 = vpop.f32.mrf.mxu1 }
 0x252   :  { %v3062_v61 = vpop.f32.mrf.mxu0  ;;  %v3209_v25 = vpop.f32.mrf.mxu1 }
 0x253   :  { %v12549_v3 = vadd.f32 %v3209_v25, %v3042_v57 }
 0x254   :  { %v8768_v36 = vpop.f32.mrf.mxu0  ;;  %v8805_v41 = vpop.f32.mrf.mxu1 }
 0x255   :  { %v12564_v41 = vmul.u32.u64.low 3817748708, %v10650_v27  ;;  %v12565_v55 = vmul.u32.u64.high 3817748708, %v10650_v27, %v12564_v41 }
 0x256   :  { %v3215_v56 = vpop.f32.mrf.mxu1  ;;  %v12551_v62 = vpop.f32.mrf.mxu0  ;;  %v3811_v41 = vadd.s32 24, %v10650_v27 }
 0x257   :  { %v12553_v48 = vadd.f32 %v3215_v56, %v3052_v0  ;;  %v3823_v40 = vshrl.u32 %v12565_v55, 4  ;;  %v3310_v42 = vadd.f32 %v12551_v62, %v12537_v24 }
 0x258   :  { %v8808_v18 = vpop.f32.mrf.mxu1  ;;  %v8830_v10 = vpop.f32.mrf.mxu0  ;;  %v12592_v1 = vmul.u32.u64.low 3817748708, %v3811_v41  ;;  %v12593_v55 = vmul.u32.u64.high 3817748708, %v3811_v41, %v12592_v1 }
 0x25a   :  { %v3221_v63 = vpop.f32.mrf.mxu1  ;;  %v12555_v32 = vpop.f32.mrf.mxu0 }
 0x25b   :  { %v12557_v60 = vadd.f32 %v3221_v63, %v3062_v61 }
 0x25c   :  { %v8811_v44 = vpop.f32.mrf.mxu1  ;;  %v8833_v6 = vpop.f32.mrf.mxu0 }
 0x25d   :  { %15153 = vst [vmem:[#allocation51_spill] sm:$0xff] %v12557_v60  ;;  %v3809_v44 = vadd.s32 8, %v10650_v27  ;;  %v3810_v6 = vadd.s32 16, %v10650_v27 }
 0x25e   :  { %v12559_v37 = vpop.f32.mrf.mxu0  ;;  %v12561_v57 = vpop.f32.mrf.mxu1 }
 0x25f   :  { %v12586_v15 = vmul.u32.u64.low 3817748708, %v3810_v6  ;;  %v12587_v52 = vmul.u32.u64.high 3817748708, %v3810_v6, %v12586_v15 }
 0x260   :  { %v8836_v25 = vpop.f32.mrf.mxu0  ;;  %v8873_v36 = vpop.f32.mrf.mxu1 }
 0x261   :  { %v3845_v8 = vshrl.u32 %v12587_v52, 4 }
 0x262   :  { %v12567_v0 = vpop.f32.mrf.mxu0  ;;  %v12569_v56 = vpop.f32.mrf.mxu1 }
 0x263   :  { %v3846_v52 = vmul.u32 18, %v3845_v8  ;;  %v12639_v60 = vmul.u32.u64.low 3817748708, %v12626_v13  ;;  %v12640_v8 = vmul.u32.u64.high 3817748708, %v12626_v13, %v12639_v60 }
 0x264   :  { %v8839_v18 = vpop.f32.mrf.mxu0  ;;  %v8876_v10 = vpop.f32.mrf.mxu1  ;;  %v3447_v60 = vadd.f32 %v12561_v57, %v3310_v42 }
 0x265   :  { %v12583_v18 = vmul.u32.u64.low 3817748708, %v3809_v44  ;;  %v12584_v10 = vmul.u32.u64.high 3817748708, %v3809_v44, %v12583_v18 }
 0x266   :  { %v12571_v61 = vpop.f32.mrf.mxu0  ;;  %v12573_v63 = vpop.f32.mrf.mxu1  ;;  %v12603_v18 = vmul.u32.u64.low 3817748708, %v12590_v31  ;;  %v12604_v22 = vmul.u32.u64.high 3817748708, %v12590_v31, %v12603_v18 }
 0x267   :  { %v3834_v23 = vshrl.u32 %v12584_v10, 4 }
 0x268   :  { %v8842_v25 = vpop.f32.mrf.mxu0  ;;  %v8879_v36 = vpop.f32.mrf.mxu1 }
 0x269   :  { %v3824_v36 = vmul.u32 18, %v3823_v40  ;;  %v3835_v35 = vmul.u32 18, %v3834_v23 }
 0x26a   :  { %v12579_v47 = vpop.f32.mrf.mxu0  ;;  %v12581_v58 = vpop.f32.mrf.mxu1 }
 0x26c   :  { %v8845_v38 = vpop.f32.mrf.mxu0  ;;  %v8882_v25 = vpop.f32.mrf.mxu1 }
 0x26d   :  { %v3825_v38 = vsub.s32 %v10650_v27, %v3824_v36  ;;  %v12608_v40 = vmul.u32.u64.low 3817748708, %v12596_v5  ;;  %v12609_v25 = vmul.u32.u64.high 3817748708, %v12596_v5, %v12608_v40  ;;  %v12619_v36 = vadd.s32 48, %v10650_v27 }
 0x26e   :  { %v12598_v12 = vpop.f32.mrf.mxu0  ;;  %v12600_v50 = vpop.f32.mrf.mxu1 }
 0x26f   :  { %vm3916_vm4 = vcmp.ne.s32.totalorder %v3825_v38, 0  ;;  %vm3925_vm5 = vcmp.lt.s32.totalorder %v3825_v38, 0  ;;  %v3943_v40 = vadd.s32 18, %v3825_v38 }
 0x270   :  { %v8848_v15 = vpop.f32.mrf.mxu0  ;;  %v8885_v4 = vpop.f32.mrf.mxu1  ;;  %vm3934_vm6 = vmand %vm3925_vm5, %vm3916_vm4  ;;  %v12631_v19 = vmul.u32.u64.low 3817748708, %v12619_v36  ;;  %v12632_v54 = vmul.u32.u64.high 3817748708, %v12619_v36, %v12631_v19 }
 0x271   :  { %v3856_v4 = vshrl.u32 %v12593_v55, 4  ;;  %v3878_v55 = vshrl.u32 %v12609_v25, 4  ;;  %v12636_v23 = vsel %vm3934_vm6, %v3943_v40, %v3825_v38  ;;  %v3317_v40 = vadd.f32 %v12555_v32, %v12539_v45 }
 0x272   :  { %v12611_v1 = vpop.f32.mrf.mxu0  ;;  %v12613_v2 = vpop.f32.mrf.mxu1  ;;  %vm3961_vm7 = vcmp.eq.s32.totalorder %v12636_v23, 0  ;;  %vm3970_vm14 = vcmp.eq.s32.totalorder %v12636_v23, 17 }
 0x273   :  { %v3857_v21 = vmul.u32 18, %v3856_v4  ;;  %v3879_v25 = vmul.u32 18, %v3878_v55  ;;  %v3455_v55 = vadd.f32 %v12569_v56, %v3317_v40 }
 0x274   :  { %v8851_v7 = vpop.f32.mrf.mxu0  ;;  %v8888_v59 = vpop.f32.mrf.mxu1 }
 0x275   :  { %v3867_v59 = vshrl.u32 %v12604_v22, 4  ;;  %v3847_v22 = vsub.s32 %v3810_v6, %v3846_v52  ;;  %v3858_v20 = vsub.s32 %v3811_v41, %v3857_v21  ;;  %v3880_v62 = vsub.s32 %v12596_v5, %v3879_v25 }
 0x276   :  { %v12621_v18 = vpop.f32.mrf.mxu0  ;;  %v12623_v15 = vpop.f32.mrf.mxu1  ;;  %v3889_v41 = vshrl.u32 %v12632_v54, 4  ;;  %v3331_v5 = vadd.f32 %v12567_v0, %v12543_v33 }
 0x277   :  { %15154 = vst [vmem:[#allocation52_spill] sm:$0xff] %v12621_v18  ;;  %v3836_v18 = vsub.s32 %v3809_v44, %v3835_v35  ;;  %v12648_v44 = vadd.s32 64, %v10650_v27  ;;  %vm3918_vm10 = vcmp.ne.s32.totalorder %v3847_v22, 0  ;;  %vm3927_vm11 = vcmp.lt.s32.totalorder %v3847_v22, 0 }
 0x278   :  { %v8854_v7 = vpop.f32.mrf.mxu0  ;;  %v8891_v10 = vpop.f32.mrf.mxu1  ;;  %vm3919_vm12 = vcmp.ne.s32.totalorder %v3858_v20, 0  ;;  %vm3928_vm13 = vcmp.lt.s32.totalorder %v3858_v20, 0  ;;  %vm12667_vm1 = vmand %vm3927_vm11, %vm3918_vm10  ;;  %v3946_v54 = vadd.s32 18, %v3858_v20  ;;  %v3471_v0 = vadd.f32 %v12581_v58, %v3331_v5 }
 0x279   :  { %v3868_v7 = vmul.u32 18, %v3867_v59  ;;  %vm3917_vm8 = vcmp.ne.s32.totalorder %v3836_v18, 0  ;;  %vm3926_vm9 = vcmp.lt.s32.totalorder %v3836_v18, 0  ;;  %v3944_v35 = vadd.s32 18, %v3836_v18  ;;  %vm12679_vm4 = vmand %vm3928_vm13, %vm3919_vm12 }
 0x27a   :  { %v12634_v17 = vpop.f32.mrf.mxu1  ;;  %v3605_v29 = vpop.f32.mrf.mxu0  ;;  %vm12661_vm15 = vmand %vm3926_vm9, %vm3917_vm8  ;;  %v12673_v45 = vmul.u32.u64.low 3817748708, %v12648_v44  ;;  %v12674_v32 = vmul.u32.u64.high 3817748708, %v12648_v44, %v12673_v45  ;;  %vm3921_vm8 = vcmp.ne.s32.totalorder %v3880_v62, 0  ;;  %vm3930_vm9 = vcmp.lt.s32.totalorder %v3880_v62, 0 }
 0x27b   :  { %v12652_v21 = vsub.s32 %v12590_v31, %v3868_v7  ;;  %v3606_v52 = vadd.f32 %v3605_v29, %v3447_v60  ;;  %v3945_v31 = vadd.s32 18, %v3847_v22  ;;  %v3900_v29 = vshrl.u32 %v12640_v8, 4  ;;  %v12688_v8 = vld [vmem:[%s14851_s2] ss:$0 sm:$0xff]  ;;  %vm12714_vm12 = vmand %vm3930_vm9, %vm3921_vm8  ;;  %s10143_s2 = smov [#allocation7]  }
 0x27c   :  { %v8894_v10 = vpop.f32.mrf.mxu1  ;;  %v8916_v4 = vpop.f32.mrf.mxu0  ;;  %v3953_v56 = vsel %vm12661_vm15, %v3944_v35, %v3836_v18  ;;  %v3890_v60 = vmul.u32 18, %v3889_v41  ;;  %vm12722_vm13 = vmor %vm3961_vm7, %vm3970_vm14  ;;  %v15241_v27 = vand.u32 4294901760, %v12299_v11  ;;  %s7079_s18 = sshll.u32 %s10143_s2, 4  ;;  %s7080_s18 = int_to_ptr.vmem [resolvable:$true] %s7079_s18 }
 0x27d   :  { %vm3920_vm5 = vcmp.ne.s32.totalorder %v12652_v21, 0  ;;  %vm3929_vm6 = vcmp.lt.s32.totalorder %v12652_v21, 0  ;;  %vm3962_vm11 = vcmp.eq.s32.totalorder %v3953_v56, 0  ;;  %vm3971_vm15 = vcmp.eq.s32.totalorder %v3953_v56, 17  ;;  %s10111_s19 = scalar_lea.vmem %s7080_s18, 1152  ;;  %p10116_p11 = scmp.lt.s32.totalorder %s7080_s18, %s7080_s18 }
 0x27e   :  { %v12645_v19 = vpop.f32.mrf.mxu1  ;;  %v3611_v38 = vpop.f32.mrf.mxu0  ;;  %vm12705_vm10 = vmand %vm3929_vm6, %vm3920_vm5  ;;  %p10112_p10 = scmp.ne.s32.totalorder %s7080_s18, %s10111_s19  ;;  %p10117_p12 = scmp.lt.s32.totalorder %s10111_s19, %s10111_s19 }
 0x27f   :  { %vm12758_vm5 = vmor %vm3962_vm11, %vm3971_vm15 }
 0x280   :  { %v8897_v6 = vpop.f32.mrf.mxu1  ;;  %v8919_v24 = vpop.f32.mrf.mxu0  ;;  %p10118_p13 = por %p10117_p12, %p10116_p11 }
 0x281   :  { %v3324_v6 = vadd.f32 %v12559_v37, %v12541_v9  ;;  %v3612_v24 = vadd.f32 %v3611_v38, %v3455_v55  ;;  %v3947_v9 = vadd.s32 18, %v12652_v21  ;;  %v3901_v37 = vmul.u32 18, %v3900_v29 }
 0x282   :  { %v3617_v57 = vpop.f32.mrf.mxu0  ;;  %v3732_v59 = vpop.f32.mrf.mxu1  ;;  %p10119_p0 = pnand %p10118_p13, %p10112_p10 }
 0x283   :  { %v3733_v7 = vadd.f32 %v3732_v59, %v3606_v52  ;;  %v3954_v52 = vsel %vm12667_vm1, %v3945_v31, %v3847_v22  ;;  %v3463_v22 = vadd.f32 %v12573_v63, %v3324_v6  ;;  %v12727_v31 = vsub.s32 %v12619_v36, %v3890_v60 }
 0x284   :  { %v8922_v4 = vpop.f32.mrf.mxu0  ;;  %v8959_v25 = vpop.f32.mrf.mxu1  ;;  %vm3963_vm1 = vcmp.eq.s32.totalorder %v3954_v52, 0  ;;  %v12737_v10 = vsel %vm12705_vm10, %v3947_v9, %v12652_v21  ;;  %v12744_v33 = vsub.s32 %v12626_v13, %v3901_v37  ;;  %v3338_v6 = vadd.f32 %v12571_v61, %v12545_v39 }
 0x285   :  { %v3784_v40 = vadd.f32 %v3733_v7, %v12516_v53  ;;  %v12699_v4 = vsel %vm12679_vm4, %v3946_v54, %v3858_v20  ;;  %v3948_v53 = vadd.s32 18, %v3880_v62  ;;  %vm3972_vm4 = vcmp.eq.s32.totalorder %v3954_v52, 17 }
 0x286   :  { %v3623_v59 = vpop.f32.mrf.mxu0  ;;  %v3738_v45 = vpop.f32.mrf.mxu1  ;;  %v3618_v54 = vadd.f32 %v3617_v57, %v3463_v22  ;;  %vm3964_vm7 = vcmp.eq.s32.totalorder %v12699_v4, 0  ;;  %vm3973_vm14 = vcmp.eq.s32.totalorder %v12699_v4, 17  ;;  %vm3922_vm6 = vcmp.ne.s32.totalorder %v12727_v31, 0 }
 0x287   :  { %v3800_v38 = vadd.f32 %v12688_v8, %v3784_v40  ;;  %v3739_v35 = vadd.f32 %v3738_v45, %v3612_v24  ;;  %v12741_v36 = vsel %vm12714_vm12, %v3948_v53, %v3880_v62  ;;  %vm3931_vm8 = vcmp.lt.s32.totalorder %v12727_v31, 0 }
 0x288   :  { %v8925_v63 = vpop.f32.mrf.mxu0  ;;  %v8962_v42 = vpop.f32.mrf.mxu1  ;;  %v3949_v58 = vadd.s32 18, %v12727_v31  ;;  %v3624_v24 = vadd.f32 %v3623_v59, %v3471_v0  ;;  %vm3965_vm9 = vcmp.eq.s32.totalorder %v12737_v10, 0  ;;  %vm3974_vm10 = vcmp.eq.s32.totalorder %v12737_v10, 17  ;;  %vm12803_vm15 = vmand %vm3931_vm8, %vm3922_vm6 }
 0x289   :  { %v3988_v29 = vmax.f32 %v3800_v38, 0.0  ;;  %v3785_v55 = vadd.f32 %v3739_v35, %v12519_v51  ;;  %v3911_v51 = vshrl.u32 %v12674_v32, 4  ;;  %vm3923_vm11 = vcmp.ne.s32.totalorder %v12744_v33, 0  ;;  %vm12859_vm6 = vmor %vm3964_vm7, %vm3973_vm14 }
 0x28a   :  { %v3629_v23 = vpop.f32.mrf.mxu0  ;;  %v3744_v7 = vpop.f32.mrf.mxu1  ;;  %vm3932_vm12 = vcmp.lt.s32.totalorder %v12744_v33, 0  ;;  %v3479_v61 = vadd.f32 %v12600_v50, %v3338_v6  ;;  %v3345_v63 = vadd.f32 %v12579_v47, %v12547_v26 }
 0x28b   :  { %v12750_v57 = vsel %vm12722_vm13, 0.0, %v3988_v29  ;;  %v3801_v25 = vadd.f32 %v12688_v8, %v3785_v55  ;;  %v3745_v60 = vadd.f32 %v3744_v7, %v3618_v54  ;;  %v3912_v39 = vmul.u32 18, %v3911_v51  ;;  %vm12785_vm13 = vmor %vm3963_vm1, %vm3972_vm4 }
 0x28c   :  { %v12754_v21 = vand.u32 4294901760, %v12750_v57  ;;  %v8928_v13 = vpop.f32.mrf.mxu0  ;;  %v8965_v32 = vpop.f32.mrf.mxu1  ;;  %v14977_v22 = vrot.slane %v12750_v57, 1  ;;  %v3630_v42 = vadd.f32 %v3629_v23, %v3479_v61  ;;  %vm3966_vm1 = vcmp.eq.s32.totalorder %v12741_v36, 0 }
 0x28d   :  { %v3989_v40 = vmax.f32 %v3801_v25, 0.0  ;;  %v3786_v45 = vadd.f32 %v3745_v60, %v12522_v30  ;;  %vm3975_vm4 = vcmp.eq.s32.totalorder %v12741_v36, 17  ;;  %v3950_v23 = vadd.s32 18, %v12744_v33 }
 0x28e   :  { %v12770_v56 = vsub.f32 %v12750_v57, %v12754_v21  ;;  %v3635_v18 = vpop.f32.mrf.mxu0  ;;  %v3750_v9 = vpop.f32.mrf.mxu1  ;;  %9076 = vmatmul.mubr.f32.vlgmr.msra.gmra.mxu1 %v12754_v21  ;;  %v3487_v7 = vadd.f32 %v12613_v2, %v3345_v63  ;;  %v12843_v25 = vsel %vm12803_vm15, %v3949_v58, %v12727_v31  ;;  %v3352_v60 = vadd.f32 %v12598_v12, %v12549_v3  ;;  %v15181_v63 = vld [vmem:[#allocation13_spill] sm:$0xff] }
 0x28f   :  { %v12780_v30 = vsel %vm12758_vm5, 0.0, %v3989_v40  ;;  %v3802_v59 = vadd.f32 %v12688_v8, %v3786_v45  ;;  %v3751_v37 = vadd.f32 %v3750_v9, %v3624_v24  ;;  %9078 = vmatprep.mubr.msk.f32.mxu1 %vm10142_vm0, %v15076_v34  ;;  %9162 = vmatpush3.msra.mxu1 %v12293_v14  ;;  %vm12849_vm5 = vmand %vm3932_vm12, %vm3923_vm11  ;;  %v12865_v6 = vsub.s32 %v12648_v44, %v3912_v39 }
 0x290   :  { %v14979_v50 = vand.u32 4294901760, %v12770_v56  ;;  %v14980_v38 = vrot.slane %v12780_v30, 1  ;;  %v8931_v35 = vpop.f32.mrf.mxu0  ;;  %v8968_v20 = vpop.f32.mrf.mxu1  ;;  %v12796_v52 = vand.u32 4294901760, %v12780_v30  ;;  %9163 = vmatprep.subr.mxu1 %v15076_v34  ;;  %v3636_v24 = vadd.f32 %v3635_v18, %v3487_v7  ;;  %vm12906_vm11 = vmor %vm3965_vm9, %vm3974_vm10 }
 0x291   :  { %v3990_v5 = vmax.f32 %v3802_v59, 0.0  ;;  %v3787_v54 = vadd.f32 %v3751_v37, %v12525_v49  ;;  %9164 = vmatpush3.msra.mxu1 %v12301_v46  ;;  %vm3967_vm7 = vcmp.eq.s32.totalorder %v12843_v25, 0  ;;  %vm3976_vm14 = vcmp.eq.s32.totalorder %v12843_v25, 17  ;;  %vm12938_vm10 = vmor %vm3966_vm1, %vm3975_vm4  ;;  %v15197_v25 = vld [vmem:[#allocation24_spill] sm:$0xff] }
 0x292   :  { %v4141_v29 = vsub.f32 %v12770_v56, %v14979_v50  ;;  %v12822_v47 = vsel %vm2857_vm3, %v14977_v22, %v14980_v38  ;;  %v3641_v26 = vpop.f32.mrf.mxu0  ;;  %v3756_v49 = vpop.f32.mrf.mxu1  ;;  %9079 = vmatmul.mubr.f32.gmra.mxu1 %v12796_v52  ;;  %9165 = vmatprep.subr.mxu1 %v15076_v34  ;;  %v12828_v55 = vsub.f32 %v12780_v30, %v12796_v52  ;;  %vm3924_vm8 = vcmp.ne.s32.totalorder %v12865_v6, 0  ;;  %vm12986_vm1 = vmor %vm3967_vm7, %vm3976_vm14  ;;  %v15213_v38 = vld [vmem:[#allocation37_spill] sm:$0xff] }
 0x293   :  { %15173 = vst [vmem:[#allocation53_spill] sm:$0xff] %v12822_v47  ;;  %v12834_v51 = vsel %vm12785_vm13, 0.0, %v3990_v5  ;;  %v3803_v0 = vadd.f32 %v12688_v8, %v3787_v54  ;;  %9081 = vmatprep.mubr.msk.f32.mxu1 %vm10142_vm0, %v15076_v34  ;;  %9166 = vmatpush3.msra.mxu1 %v12309_v16  ;;  %v3757_v31 = vadd.f32 %v3756_v49, %v3630_v42  ;;  %v15182_v5 = vld [vmem:[#allocation51_spill] sm:$0xff]  ;;  %v15183_v54 = vld [vmem:[#allocation52_spill] sm:$0xff]  ;;  %vm3933_vm9 = vcmp.lt.s32.totalorder %v12865_v6, 0 }
 0x294   :  { %v4142_v62 = vand.u32 4294901760, %v4141_v29  ;;  %v8934_v32 = vpop.f32.mrf.mxu0  ;;  %v8971_v58 = vpop.f32.mrf.mxu1  ;;  %9167 = vmatprep.subr.mxu1 %v15076_v34  ;;  %v12868_v12 = vand.u32 4294901760, %v12834_v51  ;;  %v14978_v3 = vand.u32 4294901760, %v12828_v55  ;;  %v12879_v44 = vsel %vm12849_vm5, %v3950_v23, %v12744_v33  ;;  %v15184_v23 = vld [vmem:[#allocation11_spill] sm:$0xff]  ;;  %vm12957_vm13 = vmand %vm3933_vm9, %vm3924_vm8 }
 0x295   :  { %v3991_v40 = vmax.f32 %v3803_v0, 0.0  ;;  %9168 = vmatpush3.msra.mxu1 %v12324_v43  ;;  %v3788_v4 = vadd.f32 %v3757_v31, %v12527_v28  ;;  %v3495_v18 = vadd.f32 %v12623_v15, %v3352_v60  ;;  %v3359_v59 = vadd.f32 %v12611_v1, %v12553_v48  ;;  %v15180_v1 = vld [vmem:[#allocation47_spill] sm:$0xff] }
 0x296   :  { %v3647_v45 = vpop.f32.mrf.mxu0  ;;  %v3762_v9 = vpop.f32.mrf.mxu1  ;;  %9017 = vmatmul.mubr.f32.vlgmr.msra.gmra.mxu0 %v4142_v62  ;;  %9169 = vmatprep.subr.mxu1 %v15076_v34  ;;  %v4151_v61 = vsub.f32 %v12828_v55, %v14978_v3  ;;  %v12915_v42 = vsub.f32 %v12834_v51, %v12868_v12  ;;  %v3366_v29 = vadd.f32 %v15183_v54, %v15182_v5  ;;  %vm3968_vm12 = vcmp.eq.s32.totalorder %v12879_v44, 0  ;;  %v15211_v3 = vld [vmem:[#allocation32_spill] sm:$0xff] }
 0x297   :  { %v12884_v39 = vsel %vm12859_vm6, 0.0, %v3991_v40  ;;  %v3763_v28 = vadd.f32 %v3762_v9, %v3636_v24  ;;  %9082 = vmatmul.mubr.f32.gmra.mxu1 %v12868_v12  ;;  %9103 = vmatpush3.msra.mxu0 %v12299_v11  ;;  %v3804_v33 = vadd.f32 %v12688_v8, %v3788_v4  ;;  %v3642_v35 = vadd.f32 %v3641_v26, %v3495_v18  ;;  %v15187_v9 = vld [vmem:[#allocation48_spill] sm:$0xff] }
 0x298   :  { %v8937_v53 = vpop.f32.mrf.mxu0  ;;  %v8974_v15 = vpop.f32.mrf.mxu1  ;;  %9019 = vmatprep.mubr.msk.f32.mxu0 %vm10142_vm0, %v15076_v34  ;;  %9084 = vmatprep.mubr.msk.f32.mxu1 %vm10142_vm0, %v15076_v34  ;;  %v12899_v37 = vand.u32 4294901760, %v12884_v39  ;;  %v4152_v41 = vand.u32 4294901760, %v4151_v61  ;;  %v3503_v0 = vadd.f32 %v12634_v17, %v3359_v59  ;;  %v14976_v62 = vand.u32 4294901760, %v12915_v42  ;;  %v15201_v61 = vld [vmem:[#allocation29_spill] sm:$0xff] }
 0x299   :  { %v3789_v20 = vadd.f32 %v3763_v28, %v15180_v1  ;;  %9104 = vmatprep.subr.mxu0 %v15076_v34  ;;  %9170 = vmatpush3.msra.mxu1 %v15181_v63  ;;  %v3992_v26 = vmax.f32 %v3804_v33, 0.0  ;;  %v3951_v58 = vadd.s32 18, %v12865_v6  ;;  %v3511_v40 = vadd.f32 %v12645_v19, %v3366_v29  ;;  %v15188_v28 = vld [vmem:[#allocation12_spill] sm:$0xff]  ;;  %v15191_v19 = vld [vmem:[#allocation25_spill] sm:$0xff] }
 0x29a   :  { %v3653_v10 = vpop.f32.mrf.mxu0  ;;  %v3768_v49 = vpop.f32.mrf.mxu1  ;;  %9105 = vmatpush3.msra.mxu0 %v15184_v23  ;;  %9171 = vmatprep.subr.mxu1 %v15076_v34  ;;  %v12924_v7 = vsub.f32 %v12884_v39, %v12899_v37  ;;  %v3648_v36 = vadd.f32 %v3647_v45, %v3503_v0  ;;  %v4007_v59 = vrot.slane %v12780_v30, 7  ;;  %v4161_v33 = vsub.f32 %v12915_v42, %v14976_v62 }
 0x29b   :  { %v3805_v2 = vadd.f32 %v12688_v8, %v3789_v20  ;;  %v3769_v60 = vadd.f32 %v3768_v49, %v3642_v35  ;;  %9020 = vmatmul.mubr.f32.gmra.mxu0 %v4152_v41  ;;  %9085 = vmatmul.mubr.f32.gmra.mxu1 %v12899_v37  ;;  %v12932_v13 = vsel %vm12906_vm11, 0.0, %v3992_v26  ;;  %vm3977_vm15 = vcmp.eq.s32.totalorder %v12879_v44, 17  ;;  %v15192_v20 = vld [vmem:[#allocation23_spill] sm:$0xff] }
 0x29c   :  { %9106 = vmatprep.subr.mxu0 %v15076_v34  ;;  %v8977_v17 = vpop.f32.mrf.mxu1  ;;  %9022 = vmatprep.mubr.msk.f32.mxu0 %vm10142_vm0, %v15076_v34  ;;  %v8940_v32 = vpop.f32.mrf.mxu0  ;;  %v14975_v24 = vand.u32 4294901760, %v12924_v7  ;;  %v12968_v53 = vand.u32 4294901760, %v12932_v13  ;;  %v4006_v41 = vrot.slane %v12750_v57, 7  ;;  %v3654_v5 = vadd.f32 %v3653_v10, %v3511_v40  ;;  %v15195_v10 = vld [vmem:[#allocation49_spill] sm:$0xff]  ;;  %vm13028_vm4 = vmor %vm3968_vm12, %vm3977_vm15 }
 0x29d   :  { %v3993_v4 = vmax.f32 %v3805_v2, 0.0  ;;  %v3790_v18 = vadd.f32 %v3769_v60, %v15187_v9  ;;  %9107 = vmatpush3.msra.mxu0 %v15188_v28  ;;  %9087 = vmatprep.mubr.msk.f32.mxu1 %vm10142_vm0, %v15076_v34  ;;  %v4162_v29 = vand.u32 4294901760, %v4161_v33  ;;  %v3960_v49 = vsel %vm12957_vm13, %v3951_v58, %v12865_v6  ;;  %v15196_v60 = vld [vmem:[#allocation26_spill] sm:$0xff] }
 0x29e   :  { %9108 = vmatprep.subr.mxu0 %v15076_v34  ;;  %9172 = vmatpush3.msra.mxu1 %v15191_v19  ;;  %v3774_v45 = vpop.f32.mrf.mxu1  ;;  %v4171_v15 = vsub.f32 %v12924_v7, %v14975_v24  ;;  %v13003_v17 = vsub.f32 %v12932_v13, %v12968_v53  ;;  %v13012_v6 = vsel %vm1005_vm2, %v4006_v41, %v4007_v59  ;;  %vm3969_vm5 = vcmp.eq.s32.totalorder %v3960_v49, 0 }
 0x29f   :  { %v12975_v35 = vsel %vm12938_vm10, 0.0, %v3993_v4  ;;  %v3806_v48 = vadd.f32 %v12688_v8, %v3790_v18  ;;  %v3775_v1 = vadd.f32 %v3774_v45, %v3648_v36  ;;  %9109 = vmatpush3.msra.mxu0 %v15192_v20  ;;  %9173 = vmatprep.subr.mxu1 %v15076_v34  ;;  %15198 = vst [vmem:[#allocation47_spill] sm:$0xff] %v13012_v6  ;;  %vm3978_vm6 = vcmp.eq.s32.totalorder %v3960_v49, 17  ;;  %v15205_v18 = vld [vmem:[#allocation28_spill] sm:$0xff]  ;;  %v15206_v49 = vld [vmem:[#allocation33_spill] sm:$0xff]  ;;  %v15217_v6 = vld [vmem:[#allocation35_spill] sm:$0xff] }
 0x2a0   :  { %9088 = vmatmul.mubr.f32.gmra.mxu1 %v12968_v53  ;;  %9110 = vmatprep.subr.mxu0 %v15076_v34  ;;  %v8980_v26 = vpop.f32.mrf.mxu1  ;;  %v12999_v31 = vand.u32 4294901760, %v12975_v35  ;;  %v4172_v40 = vand.u32 4294901760, %v4171_v15  ;;  %v14974_v9 = vand.u32 4294901760, %v13003_v17  ;;  %v4008_v54 = vrot.slane %v12834_v51, 7  ;;  %vm3987_vm7 = vmor %vm3969_vm5, %vm3978_vm6 }
 0x2a1   :  { %v3994_v0 = vmax.f32 %v3806_v48, 0.0  ;;  %v3791_v2 = vadd.f32 %v3775_v1, %v15195_v10  ;;  %9174 = vmatpush3.msra.mxu1 %v15196_v60  ;;  %9111 = vmatpush3.msra.mxu0 %v15197_v25  ;;  %v15202_v1 = vld [vmem:[#allocation50_spill] sm:$0xff]  ;;  %v4011_v24 = vrot.slane %v12975_v35, 7  ;;  %v15243_v11 = vand.u32 4294901760, %v15184_v23 }
 0x2a2   :  { %9023 = vmatmul.mubr.f32.gmra.mxu0 %v4162_v29  ;;  %9175 = vmatprep.subr.mxu1 %v15076_v34  ;;  %v3780_v32 = vpop.f32.mrf.mxu1  ;;  %v13039_v15 = vsub.f32 %v12975_v35, %v12999_v31  ;;  %v15203_v29 = vld [vmem:[#allocation30_spill] sm:$0xff] }
 0x2a3   :  { %v13016_v58 = vsel %vm12986_vm1, 0.0, %v3994_v0  ;;  %v3807_v36 = vadd.f32 %v12688_v8, %v3791_v2  ;;  %9025 = vmatprep.mubr.msk.f32.mxu0 %vm10142_vm0, %v15076_v34  ;;  %9090 = vmatprep.mubr.msk.f32.mxu1 %vm10142_vm0, %v15076_v34  ;;  %v3781_v4 = vadd.f32 %v3780_v32, %v3654_v5  ;;  %v4181_v5 = vsub.f32 %v13003_v17, %v14974_v9  ;;  %v15204_v32 = vld [vmem:[#allocation27_spill] sm:$0xff] }
 0x2a4   :  { %9176 = vmatpush3.msra.mxu1 %v15201_v61  ;;  %9112 = vmatprep.subr.mxu0 %v15076_v34  ;;  %v8983_v45 = vpop.f32.mrf.mxu1  ;;  %v13035_v33 = vand.u32 4294901760, %v13016_v58  ;;  %v14973_v26 = vand.u32 4294901760, %v13039_v15  ;;  %v4012_v22 = vrot.slane %v13016_v58, 7 }
 0x2a5   :  { %v3995_v48 = vmax.f32 %v3807_v36, 0.0  ;;  %v3792_v44 = vadd.f32 %v3781_v4, %v15202_v1  ;;  %9091 = vmatmul.mubr.f32.gmra.mxu1 %v12999_v31  ;;  %9177 = vmatprep.subr.mxu1 %v15076_v34  ;;  %v4182_v36 = vand.u32 4294901760, %v4181_v5  ;;  %v4009_v1 = vrot.slane %v12884_v39, 7 }
 0x2a6   :  { %9026 = vmatmul.mubr.f32.gmra.mxu0 %v4172_v40  ;;  %9178 = vmatpush3.msra.mxu1 %v15203_v29  ;;  %v13052_v0 = vsub.f32 %v13016_v58, %v13035_v33  ;;  %v4191_v40 = vsub.f32 %v13039_v15, %v14973_v26 }
 0x2a7   :  { %v13056_v10 = vsel %vm13028_vm4, 0.0, %v3995_v48  ;;  %v3808_v2 = vadd.f32 %v12688_v8, %v3792_v44  ;;  %9113 = vmatpush3.msra.mxu0 %v15204_v32  ;;  %9179 = vmatprep.subr.mxu1 %v15076_v34  ;;  %v13080_v48 = vsel %vm1005_vm2, %v4007_v59, %v4008_v54  ;;  %v4010_v44 = vrot.slane %v12932_v13, 7 }
 0x2a8   :  { %9114 = vmatprep.subr.mxu0 %v15076_v34  ;;  %9028 = vmatprep.mubr.msk.f32.mxu0 %vm10142_vm0, %v15076_v34  ;;  %v13069_v4 = vand.u32 4294901760, %v13056_v10  ;;  %v14982_v45 = vand.u32 4294901760, %v13052_v0  ;;  %15207 = vst [vmem:[#allocation13_spill] sm:$0xff] %v13080_v48  ;;  %v4192_v26 = vand.u32 4294901760, %v4191_v40  ;;  %v4013_v50 = vrot.slane %v13056_v10, 7 }
 0x2a9   :  { %v3996_v8 = vmax.f32 %v3808_v2, 0.0  ;;  %9093 = vmatprep.mubr.msk.f32.mxu1 %vm10142_vm0, %v15076_v34  ;;  %9115 = vmatpush3.msra.mxu0 %v15205_v18  ;;  %v13130_v48 = vsel %vm1005_vm2, %v4009_v1, %v4010_v44  ;;  %v13139_v47 = vsel %vm1005_vm2, %v4010_v44, %v4011_v24  ;;  %v13153_v44 = vsel %vm1005_vm2, %v4011_v24, %v4012_v22 }
 0x2aa   :  { %9180 = vmatpush3.msra.mxu1 %v15206_v49  ;;  %9029 = vmatmul.mubr.f32.gmra.mxu0 %v4182_v36  ;;  %v15208_v36 = vld [vmem:[#allocation31_spill] sm:$0xff]  ;;  %v13096_v9 = vsub.f32 %v13056_v10, %v13069_v4  ;;  %v4201_v40 = vsub.f32 %v13052_v0, %v14982_v45  ;;  %15214 = vst [vmem:[#allocation11_spill] sm:$0xff] %v13130_v48  ;;  %15216 = vst [vmem:[#allocation48_spill] sm:$0xff] %v13139_v47  ;;  %v15221_v48 = vld [vmem:[#allocation41_spill] sm:$0xff]  ;;  %v15223_v24 = vrot.slane %v12780_v30, 1 }
 0x2ab   :  { %v13084_v5 = vsel %vm3987_vm7, 0.0, %v3996_v8  ;;  %9094 = vmatmul.mubr.f32.gmra.mxu1 %v13035_v33  ;;  %9116 = vmatprep.subr.mxu0 %v15076_v34  ;;  %v15209_v8 = vld [vmem:[#allocation34_spill] sm:$0xff]  ;;  %15219 = vst [vmem:[#allocation12_spill] sm:$0xff] %v13153_v44  ;;  %v13157_v47 = vsel %vm1005_vm2, %v4012_v22, %v4013_v50  ;;  %v15225_v22 = vld [vmem:[#allocation36_spill] sm:$0xff]  ;;  %v6032_v30 = vrot.slane %v12975_v35, 1  ;;  %v15231_v35 = vand.u32 4294901760, %v12770_v56 }
 0x2ac   :  { %v4014_v2 = vrot.slane %v13084_v5, 7  ;;  %9181 = vmatprep.subr.mxu1 %v15076_v34  ;;  %9117 = vmatpush3.msra.mxu0 %v15208_v36  ;;  %v13092_v59 = vand.u32 4294901760, %v13084_v5  ;;  %15220 = vst [vmem:[#allocation25_spill] sm:$0xff] %v13157_v47  ;;  %v6031_v47 = vrot.slane %v12932_v13, 1  ;;  %v15251_v23 = vand.u32 4294901760, %v13052_v0 }
 0x2ad   :  { %9182 = vmatpush3.msra.mxu1 %v15209_v8  ;;  %9118 = vmatprep.subr.mxu0 %v15076_v34 }
 0x2ae   :  { %v13105_v62 = vsel %vm1005_vm2, %v4014_v2, %v4006_v41  ;;  %9183 = vmatprep.subr.mxu1 %v15076_v34  ;;  %9031 = vmatprep.mubr.msk.f32.mxu0 %vm10142_vm0, %v15076_v34  ;;  %v13119_v41 = vsel %vm1005_vm2, %v4008_v54, %v4009_v1  ;;  %v13126_v45 = vsub.f32 %v13084_v5, %v13092_v59  ;;  %v6029_v54 = vrot.slane %v12834_v51, 1 }
 0x2af   :  { %15210 = vst [vmem:[#allocation51_spill] sm:$0xff] %v13105_v62  ;;  %9096 = vmatprep.mubr.msk.f32.mxu1 %vm10142_vm0, %v15076_v34  ;;  %9119 = vmatpush3.msra.mxu0 %v15211_v3  ;;  %15212 = vst [vmem:[#allocation52_spill] sm:$0xff] %v13119_v41  ;;  %v15215_v41 = vld [vmem:[#allocation38_spill] sm:$0xff]  ;;  %v15218_v51 = vand.u32 4294901760, %v13096_v9  ;;  %v6030_v62 = vrot.slane %v12884_v39, 1 }
 0x2b0   :  { %9184 = vmatpush3.msra.mxu1 %v15213_v38  ;;  %9032 = vmatmul.mubr.f32.gmra.mxu0 %v4192_v26  ;;  %v4202_v26 = vand.u32 4294901760, %v4201_v40  ;;  %v13171_v40 = vsel %vm2857_vm3, %v15223_v24, %v6029_v54  ;;  %v15226_v39 = vld [vmem:[#allocation42_spill] sm:$0xff]  ;;  %v6034_v24 = vrot.slane %v13056_v10, 1  ;;  %v15233_v10 = vld [vmem:[#allocation43_spill] sm:$0xff] }
 0x2b1   :  { %9097 = vmatmul.mubr.f32.gmra.mxu1 %v13069_v4  ;;  %9185 = vmatprep.subr.mxu1 %v15076_v34  ;;  %v4211_v1 = vsub.f32 %v13096_v9, %v15218_v51  ;;  %v13165_v51 = vsel %vm1005_vm2, %v4013_v50, %v4014_v2  ;;  %15224 = vst [vmem:[#allocation49_spill] sm:$0xff] %v13171_v40  ;;  %v15227_v50 = vand.u32 4294901760, %v13126_v45 }
 0x2b2   :  { %9120 = vmatprep.subr.mxu0 %v15076_v34  ;;  %9186 = vmatpush3.msra.mxu1 %v15215_v41  ;;  %15222 = vst [vmem:[#allocation23_spill] sm:$0xff] %v13165_v51  ;;  %v15228_v51 = vld [vmem:[#allocation39_spill] sm:$0xff]  ;;  %v13189_v13 = vsel %vm2857_vm3, %v6029_v54, %v6030_v62  ;;  %v13200_v44 = vsel %vm2857_vm3, %v6030_v62, %v6031_v47  ;;  %v6035_v54 = vrot.slane %v13084_v5, 1 }
 0x2b3   :  { %9121 = vmatpush3.msra.mxu0 %v15217_v6  ;;  %9187 = vmatprep.subr.mxu1 %v15076_v34  ;;  %v4221_v2 = vsub.f32 %v13126_v45, %v15227_v50  ;;  %15229 = vst [vmem:[#allocation26_spill] sm:$0xff] %v13189_v13  ;;  %v15230_v50 = vld [vmem:[#allocation45_spill] sm:$0xff]  ;;  %v15232_v13 = vld [vmem:[#allocation40_spill] sm:$0xff] }
 0x2b4   :  { %9034 = vmatprep.mubr.msk.f32.mxu0 %vm10142_vm0, %v15076_v34  ;;  %9099 = vmatprep.mubr.msk.f32.mxu1 %vm10142_vm0, %v15076_v34 }
 0x2b5   :  { %9122 = vmatprep.subr.mxu0 %v15076_v34  ;;  %9188 = vmatpush3.msra.mxu1 %v15221_v48  ;;  %v4222_v40 = vand.u32 4294901760, %v4221_v2  ;;  %v13229_v2 = vsel %vm2857_vm3, %v6034_v24, %v6035_v54 }
 0x2b6   :  { %9035 = vmatmul.mubr.f32.gmra.mxu0 %v4202_v26  ;;  %9100 = vmatmul.mubr.f32.gmra.mxu1 %v13092_v59  ;;  %v4212_v26 = vand.u32 4294901760, %v4211_v1  ;;  %v6033_v1 = vrot.slane %v13016_v58, 1  ;;  %v13208_v58 = vsel %vm2857_vm3, %v6031_v47, %v6032_v30  ;;  %v15234_v47 = vand.u32 4294901760, %v12828_v55  ;;  %15236 = vst [vmem:[#allocation24_spill] sm:$0xff] %v13229_v2 }
 0x2b7   :  { %9123 = vmatpush3.msra.mxu0 %v15225_v22  ;;  %9189 = vmatprep.subr.mxu1 %v15076_v34 }
 0x2b8   :  { %9124 = vmatprep.subr.mxu0 %v15076_v34  ;;  %9190 = vmatpush3.msra.mxu1 %v15226_v39  ;;  %v13217_v62 = vsel %vm2857_vm3, %v6032_v30, %v6033_v1  ;;  %v13221_v5 = vsel %vm2857_vm3, %v6033_v1, %v6034_v24  ;;  %v15237_v30 = vrot.slane %v12750_v57, 1  ;;  %v15239_v1 = vld [vmem:[#allocation46_spill] sm:$0xff]  ;;  %v15246_v57 = vand.u32 4294901760, %v15192_v20  ;;  %v4038_v20 = vld [vmem:[#allocation5 + $0x70] sm:$0xff] }
 0x2b9   :  { %9125 = vmatpush3.msra.mxu0 %v15228_v51  ;;  %9191 = vmatprep.subr.mxu1 %v15076_v34 }
 0x2ba   :  { %9037 = vmatprep.mubr.msk.f32.mxu0 %vm10142_vm0, %v15076_v34  ;;  %9126 = vmatprep.subr.mxu0 %v15076_v34 }
 0x2bb   :  { %9192 = vmatpush3.msra.mxu1 %v15230_v50  ;;  %9193 = vmatprep.mubr.msk.f32.mxu1 %vm10142_vm0, %v15076_v34 }
 0x2bc   :  { %9038 = vmatmul.mubr.f32.gmra.mxu0 %v4212_v26  ;;  %9194 = vmatmul.mubr.f32.vlgmr.msra.gmra.mxu1 %v15231_v35  ;;  %v15235_v26 = vld [vmem:[#allocation44_spill] sm:$0xff] }
 0x2bd   :  { %9127 = vmatpush3.msra.mxu0 %v15232_v13  ;;  %9040 = vmatprep.mubr.msk.f32.mxu0 %vm10142_vm0, %v15076_v34 }
 0x2be   :  { %9128 = vmatprep.subr.mxu0 %v15076_v34  ;;  %9196 = vmatprep.mubr.msk.f32.mxu1 %vm10142_vm0, %v15076_v34 }
 0x2bf   :  { %9129 = vmatpush3.msra.mxu0 %v15233_v10  ;;  %9279 = vmatprep.subr.mxu1 %v15076_v34 }
 0x2c0   :  { %9041 = vmatmul.mubr.f32.gmra.mxu0 %v4222_v40  ;;  %9130 = vmatprep.subr.mxu0 %v15076_v34  ;;  %v13237_v40 = vsel %vm2857_vm3, %v6035_v54, %v15237_v30  ;;  %v15259_v30 = vand.u32 4294901760, %v15232_v13  ;;  %v15260_v13 = vand.u32 4294901760, %v15233_v10  ;;  %v15261_v10 = vand.u32 4294901760, %v15235_v26 }
 0x2c1   :  { %9197 = vmatmul.mubr.f32.gmra.mxu1 %v15234_v47  ;;  %9131 = vmatpush3.msra.mxu0 %v15235_v26  ;;  %15238 = vst [vmem:[#allocation29_spill] sm:$0xff] %v13237_v40  ;;  %v4033_v47 = vld [vmem:[#allocation5 + $0x48] sm:$0xff] }
 0x2c2   :  { %9280 = vmatpush3.msra.mxu1 %v12293_v14  ;;  %9132 = vmatprep.subr.mxu0 %v15076_v34  ;;  %v15240_v14 = vand.u32 4294901760, %v12915_v42 }
 0x2c3   :  { %9281 = vmatprep.subr.mxu1 %v15076_v34  ;;  %9133 = vmatpush3.msra.mxu0 %v15239_v1 }
 0x2c4   :  { %9134 = vmatprep.mubr.msk.f32.mxu0 %vm10142_vm0, %v15076_v34  ;;  %9199 = vmatprep.mubr.msk.f32.mxu1 %vm10142_vm0, %v15076_v34 }
 0x2c5   :  { %9282 = vmatpush3.msra.mxu1 %v12301_v46  ;;  %9135 = vmatmul.mubr.f32.vlgmr.msra.gmra.mxu0 %v12770_v56  ;;  %v15242_v46 = vand.u32 4294901760, %v12924_v7  ;;  %v15247_v56 = vand.u32 4294901760, %v15197_v25  ;;  %v15254_v25 = vand.u32 4294901760, %v13096_v9 }
 0x2c6   :  { %9200 = vmatmul.mubr.f32.gmra.mxu1 %v15240_v14  ;;  %9220 = vmatprep.subr.mxu0 %v15076_v34 }
 0x2c7   :  { %9283 = vmatprep.subr.mxu1 %v15076_v34  ;;  %9221 = vmatpush3.msra.mxu0 %v15241_v27 }
 0x2c8   :  { %9284 = vmatpush3.msra.mxu1 %v12309_v16  ;;  %9137 = vmatprep.mubr.msk.f32.mxu0 %vm10142_vm0, %v15076_v34  ;;  %v15244_v16 = vand.u32 4294901760, %v15188_v28  ;;  %v15252_v28 = vand.u32 4294901760, %v15208_v36  ;;  %v4035_v36 = vld [vmem:[#allocation5 + $0x58] sm:$0xff] }
 0x2c9   :  { %9285 = vmatprep.subr.mxu1 %v15076_v34  ;;  %9202 = vmatprep.mubr.msk.f32.mxu1 %vm10142_vm0, %v15076_v34  ;;  %v13373_v24 = vand.u32 4294901760, %v4035_v36 }
 0x2ca   :  { %9222 = vmatprep.subr.mxu0 %v15076_v34  ;;  %9286 = vmatpush3.msra.mxu1 %v12324_v43  ;;  %v15245_v43 = vand.u32 4294901760, %v13003_v17 }
 0x2cb   :  { %9138 = vmatmul.mubr.f32.gmra.mxu0 %v12828_v55  ;;  %9203 = vmatmul.mubr.f32.gmra.mxu1 %v15242_v46  ;;  %v15248_v55 = vand.u32 4294901760, %v13039_v15  ;;  %v13400_v14 = vsub.f32 %v4035_v36, %v13373_v24  ;;  %v13409_v46 = vand.u32 4294901760, %v4033_v47 }
 0x2cc   :  { %9223 = vmatpush3.msra.mxu0 %v15243_v11  ;;  %9287 = vmatprep.subr.mxu1 %v15076_v34  ;;  %v4032_v11 = vld [vmem:[#allocation5 + $0x40] sm:$0xff] }
 0x2cd   :  { %9224 = vmatprep.subr.mxu0 %v15076_v34  ;;  %9288 = vmatpush3.msra.mxu1 %v15181_v63  ;;  %v15249_v63 = vand.u32 4294901760, %v15204_v32  ;;  %v13433_v26 = vsub.f32 %v4033_v47, %v13409_v46 }
 0x2ce   :  { %9225 = vmatpush3.msra.mxu0 %v15244_v16  ;;  %9289 = vmatprep.subr.mxu1 %v15076_v34 }
 0x2cf   :  { %9140 = vmatprep.mubr.msk.f32.mxu0 %vm10142_vm0, %v15076_v34  ;;  %9205 = vmatprep.mubr.msk.f32.mxu1 %vm10142_vm0, %v15076_v34 }
 0x2d0   :  { %9226 = vmatprep.subr.mxu0 %v15076_v34  ;;  %9290 = vmatpush3.msra.mxu1 %v15191_v19 }
 0x2d1   :  { %9141 = vmatmul.mubr.f32.gmra.mxu0 %v12915_v42  ;;  %9206 = vmatmul.mubr.f32.gmra.mxu1 %v15245_v43  ;;  %v15250_v42 = vand.u32 4294901760, %v15205_v18 }
 0x2d2   :  { %9227 = vmatpush3.msra.mxu0 %v15246_v57  ;;  %9291 = vmatprep.subr.mxu1 %v15076_v34 }
 0x2d3   :  { %9228 = vmatprep.subr.mxu0 %v15076_v34  ;;  %9292 = vmatpush3.msra.mxu1 %v15196_v60  ;;  %v15253_v60 = vand.u32 4294901760, %v15211_v3  ;;  %v15255_v3 = vand.u32 4294901760, %v15217_v6  ;;  %v15256_v6 = vand.u32 4294901760, %v13126_v45 }
 0x2d4   :  { %9229 = vmatpush3.msra.mxu0 %v15247_v56  ;;  %9293 = vmatprep.subr.mxu1 %v15076_v34  ;;  %v15005_v56 = vand.u32 4294901760, %v13400_v14 }
 0x2d5   :  { %9143 = vmatprep.mubr.msk.f32.mxu0 %vm10142_vm0, %v15076_v34  ;;  %9208 = vmatprep.mubr.msk.f32.mxu1 %vm10142_vm0, %v15076_v34 }
 0x2d6   :  { %9294 = vmatpush3.msra.mxu1 %v15201_v61  ;;  %9144 = vmatmul.mubr.f32.gmra.mxu0 %v12924_v7  ;;  %v4039_v7 = vld [vmem:[#allocation5 + $0x78] sm:$0xff]  ;;  %v4037_v61 = vld [vmem:[#allocation5 + $0x68] sm:$0xff] }
 0x2d7   :  { %9209 = vmatmul.mubr.f32.gmra.mxu1 %v15248_v55  ;;  %9230 = vmatprep.subr.mxu0 %v15076_v34  ;;  %v13323_v19 = vand.u32 4294901760, %v4039_v7  ;;  %v13427_v55 = vand.u32 4294901760, %v4032_v11 }
 0x2d8   :  { %9295 = vmatprep.subr.mxu1 %v15076_v34  ;;  %9231 = vmatpush3.msra.mxu0 %v15249_v63  ;;  %v4031_v63 = vld [vmem:[#allocation5 + $0x38] sm:$0xff] }
 0x2d9   :  { %9296 = vmatpush3.msra.mxu1 %v15203_v29  ;;  %9232 = vmatprep.subr.mxu0 %v15076_v34  ;;  %v13339_v29 = vsub.f32 %v4039_v7, %v13323_v19 }
 0x2da   :  { %9297 = vmatprep.subr.mxu1 %v15076_v34  ;;  %9146 = vmatprep.mubr.msk.f32.mxu0 %vm10142_vm0, %v15076_v34 }
 0x2db   :  { %9211 = vmatprep.mubr.msk.f32.mxu1 %vm10142_vm0, %v15076_v34  ;;  %9233 = vmatpush3.msra.mxu0 %v15250_v42  ;;  %v15012_v18 = vand.u32 4294901760, %v13339_v29  ;;  %v15262_v42 = vand.u32 4294901760, %v15239_v1  ;;  %v5245_v1 = vsub.f32 %v13400_v14, %v15005_v56 }
 0x2dc   :  { %9298 = vmatpush3.msra.mxu1 %v15206_v49  ;;  %9147 = vmatmul.mubr.f32.gmra.mxu0 %v13003_v17  ;;  %v13334_v17 = vand.u32 4294901760, %v4038_v20 }
 0x2dd   :  { %9212 = vmatmul.mubr.f32.gmra.mxu1 %v15251_v23  ;;  %9234 = vmatprep.subr.mxu0 %v15076_v34 }
 0x2de   :  { %9299 = vmatprep.subr.mxu1 %v15076_v34  ;;  %9235 = vmatpush3.msra.mxu0 %v15252_v28  ;;  %v13353_v32 = vsub.f32 %v4038_v20, %v13334_v17  ;;  %v13444_v28 = vand.u32 4294901760, %v4031_v63  ;;  %v4030_v20 = vld [vmem:[#allocation5 + $0x30] sm:$0xff] }
 0x2df   :  { %9300 = vmatpush3.msra.mxu1 %v15209_v8  ;;  %9236 = vmatprep.subr.mxu0 %v15076_v34  ;;  %v15257_v8 = vand.u32 4294901760, %v15225_v22  ;;  %v4034_v22 = vld [vmem:[#allocation5 + $0x50] sm:$0xff] }
 0x2e0   :  { %9301 = vmatprep.subr.mxu1 %v15076_v34  ;;  %9149 = vmatprep.mubr.msk.f32.mxu0 %vm10142_vm0, %v15076_v34  ;;  %v13390_v54 = vand.u32 4294901760, %v4034_v22  ;;  %v13465_v36 = vsub.f32 %v4031_v63, %v13444_v28 }
 0x2e1   :  { %9214 = vmatprep.mubr.msk.f32.mxu1 %vm10142_vm0, %v15076_v34  ;;  %9237 = vmatpush3.msra.mxu0 %v15253_v60 }
 0x2e2   :  { %9302 = vmatpush3.msra.mxu1 %v15213_v38  ;;  %9150 = vmatmul.mubr.f32.gmra.mxu0 %v13039_v15  ;;  %v4036_v38 = vld [vmem:[#allocation5 + $0x60] sm:$0xff]  ;;  %v13348_v15 = vand.u32 4294901760, %v4037_v61  ;;  %v13417_v43 = vsub.f32 %v4034_v22, %v13390_v54 }
 0x2e3   :  { %9215 = vmatmul.mubr.f32.gmra.mxu1 %v15254_v25  ;;  %9303 = vmatprep.subr.mxu1 %v15076_v34  ;;  %v13359_v49 = vand.u32 4294901760, %v4036_v38  ;;  %v13449_v25 = vsub.f32 %v4032_v11, %v13427_v55 }
 0x2e4   :  { %9238 = vmatprep.subr.mxu0 %v15076_v34  ;;  %9304 = vmatpush3.msra.mxu1 %v15215_v41  ;;  %v15009_v41 = vand.u32 4294901760, %v13353_v32  ;;  %v15004_v7 = vand.u32 4294901760, %v13417_v43 }
 0x2e5   :  { %9239 = vmatpush3.msra.mxu0 %v15255_v3  ;;  %9305 = vmatprep.subr.mxu1 %v15076_v34  ;;  %v13382_v35 = vsub.f32 %v4036_v38, %v13359_v49  ;;  %v13459_v3 = vand.u32 4294901760, %v4030_v20  ;;  %v4029_v38 = vld [vmem:[#allocation5 + $0x28] sm:$0xff] }
 0x2e6   :  { %9152 = vmatprep.mubr.msk.f32.mxu0 %vm10142_vm0, %v15076_v34  ;;  %9217 = vmatprep.mubr.msk.f32.mxu1 %vm10142_vm0, %v15076_v34  ;;  %v13474_v22 = vand.u32 4294901760, %v4029_v38 }
 0x2e7   :  { %9240 = vmatprep.subr.mxu0 %v15076_v34  ;;  %9306 = vmatpush3.msra.mxu1 %v15221_v48  ;;  %v13367_v48 = vsub.f32 %v4037_v61, %v13348_v15  ;;  %v15006_v27 = vand.u32 4294901760, %v13382_v35  ;;  %v5252_v61 = vsub.f32 %v13417_v43, %v15004_v7 }
 0x2e8   :  { %9153 = vmatmul.mubr.f32.gmra.mxu0 %v13052_v0  ;;  %9218 = vmatmul.mubr.f32.gmra.mxu1 %v15256_v6  ;;  %v15258_v0 = vand.u32 4294901760, %v15228_v51  ;;  %v5246_v6 = vand.u32 4294901760, %v5245_v1 }
 0x2e9   :  { %9241 = vmatpush3.msra.mxu0 %v15257_v8  ;;  %9307 = vmatprep.subr.mxu1 %v15076_v34  ;;  %v15007_v51 = vand.u32 4294901760, %v13367_v48  ;;  %v15002_v8 = vand.u32 4294901760, %v13449_v25  ;;  %v5253_v47 = vand.u32 4294901760, %v5252_v61 }
 0x2ea   :  { %9242 = vmatprep.subr.mxu0 %v15076_v34  ;;  %9308 = vmatpush3.msra.mxu1 %v15226_v39  ;;  %v5217_v39 = vsub.f32 %v13339_v29, %v15012_v18 }
 0x2eb   :  { %9243 = vmatpush3.msra.mxu0 %v15258_v0  ;;  %9309 = vmatprep.subr.mxu1 %v15076_v34  ;;  %v5231_v16 = vsub.f32 %v13367_v48, %v15007_v51 }
 0x2ec   :  { %9155 = vmatprep.mubr.msk.f32.mxu0 %vm10142_vm0, %v15076_v34  ;;  %9244 = vmatprep.subr.mxu0 %v15076_v34 }
 0x2ed   :  { %9310 = vmatpush3.msra.mxu1 %v15230_v50  ;;  %9311 = vmatprep.mubr.msk.f32.mxu1 %vm10142_vm0, %v15076_v34  ;;  %v5224_v50 = vsub.f32 %v13353_v32, %v15009_v41  ;;  %v5232_v23 = vand.u32 4294901760, %v5231_v16  ;;  %v13495_v16 = vsub.f32 %v4029_v38, %v13474_v22  ;;  %v15270_v41 = vld [vmem:[#allocation25_spill] sm:$0xff] }
 0x2ee   :  { %9156 = vmatmul.mubr.f32.gmra.mxu0 %v13096_v9  ;;  %9312 = vmatmul.mubr.f32.vlgmr.msra.gmra.mxu1 %v12754_v21  ;;  %v5218_v9 = vand.u32 4294901760, %v5217_v39  ;;  %v4028_v39 = vld [vmem:[#allocation5 + $0x20] sm:$0xff] }
 0x2ef   :  { %9245 = vmatpush3.msra.mxu0 %v15259_v30  ;;  %9158 = vmatprep.mubr.msk.f32.mxu0 %vm10142_vm0, %v15076_v34  ;;  %v5225_v57 = vand.u32 4294901760, %v5224_v50  ;;  %v13479_v30 = vsub.f32 %v4030_v20, %v13459_v3  ;;  %v4027_v50 = vld [vmem:[#allocation5 + $0x18] sm:$0xff]  ;;  %v14999_v1 = vand.u32 4294901760, %v13495_v16  ;;  %v4025_v20 = vld [vmem:[#allocation5 + $0x8] sm:$0xff] }
 0x2f0   :  { %9246 = vmatprep.subr.mxu0 %v15076_v34  ;;  %9314 = vmatprep.mubr.msk.f32.mxu1 %vm10142_vm0, %v15076_v34 }
 0x2f1   :  { %9247 = vmatpush3.msra.mxu0 %v15260_v13  ;;  %9397 = vmatprep.subr.mxu1 %v15076_v34  ;;  %v13488_v13 = vand.u32 4294901760, %v4028_v39 }
 0x2f2   :  { %9159 = vmatmul.mubr.f32.gmra.mxu0 %v13126_v45  ;;  %9248 = vmatprep.subr.mxu0 %v15076_v34  ;;  %v5238_v45 = vsub.f32 %v13382_v35, %v15006_v27  ;;  %v15269_v27 = vld [vmem:[#allocation12_spill] sm:$0xff] }
 0x2f3   :  { %9315 = vmatmul.mubr.f32.gmra.mxu1 %v12796_v52  ;;  %9249 = vmatpush3.msra.mxu0 %v15261_v10  ;;  %v15000_v10 = vand.u32 4294901760, %v13479_v30  ;;  %v13733_v51 = vand.u32 4294901760, %v15269_v27 }
 0x2f4   :  { %9398 = vmatpush3.msra.mxu1 %v5218_v9  ;;  %9250 = vmatprep.subr.mxu0 %v15076_v34  ;;  %v5239_v60 = vand.u32 4294901760, %v5238_v45  ;;  %v5266_v9 = vsub.f32 %v13449_v25, %v15002_v8  ;;  %v4026_v45 = vld [vmem:[#allocation5 + $0x10] sm:$0xff] }
 0x2f5   :  { %9399 = vmatprep.subr.mxu1 %v15076_v34  ;;  %9251 = vmatpush3.msra.mxu0 %v15262_v42 }
 0x2f6   :  { %9252 = vmatprep.mubr.msk.f32.mxu0 %vm10142_vm0, %v15076_v34  ;;  %9317 = vmatprep.mubr.msk.f32.mxu1 %vm10142_vm0, %v15076_v34  ;;  %v5267_v42 = vand.u32 4294901760, %v5266_v9 }
 0x2f7   :  { %9400 = vmatpush3.msra.mxu1 %v5225_v57  ;;  %9253 = vmatmul.mubr.f32.vlgmr.msra.gmra.mxu0 %v12754_v21  ;;  %v15003_v21 = vand.u32 4294901760, %v13433_v26  ;;  %v13499_v57 = vand.u32 4294901760, %v4027_v50 }
 0x2f8   :  { %9318 = vmatmul.mubr.f32.gmra.mxu1 %v12868_v12  ;;  %9338 = vmatprep.subr.mxu0 %v15076_v34 }
 0x2f9   :  { %9401 = vmatprep.subr.mxu1 %v15076_v34  ;;  %9339 = vmatpush3.msra.mxu0 %v13323_v19  ;;  %v5259_v0 = vsub.f32 %v13433_v26, %v15003_v21  ;;  %v13521_v61 = vsub.f32 %v4027_v50, %v13499_v57  ;;  %v15268_v21 = vld [vmem:[#allocation48_spill] sm:$0xff] }
 0x2fa   :  { %9402 = vmatpush3.msra.mxu1 %v5232_v23  ;;  %9255 = vmatprep.mubr.msk.f32.mxu0 %vm10142_vm0, %v15076_v34  ;;  %v13509_v23 = vsub.f32 %v4028_v39, %v13488_v13  ;;  %v4024_v39 = vld [vmem:[#allocation5] sm:$0xff]  ;;  %v13710_v7 = vand.u32 4294901760, %v15268_v21 }
 0x2fb   :  { %9403 = vmatprep.subr.mxu1 %v15076_v34  ;;  %9320 = vmatprep.mubr.msk.f32.mxu1 %vm10142_vm0, %v15076_v34  ;;  %v5260_v11 = vand.u32 4294901760, %v5259_v0  ;;  %v13529_v0 = vand.u32 4294901760, %v4025_v20  ;;  %v14995_v9 = vand.u32 4294901760, %v13521_v61 }
 0x2fc   :  { %9340 = vmatprep.subr.mxu0 %v15076_v34  ;;  %9404 = vmatpush3.msra.mxu1 %v5239_v60  ;;  %v5280_v60 = vsub.f32 %v13479_v30, %v15000_v10 }
 0x2fd   :  { %9256 = vmatmul.mubr.f32.gmra.mxu0 %v12796_v52  ;;  %9321 = vmatmul.mubr.f32.gmra.mxu1 %v12899_v37  ;;  %v15001_v52 = vand.u32 4294901760, %v13465_v36 }
 0x2fe   :  { %9341 = vmatpush3.msra.mxu0 %v13334_v17  ;;  %9405 = vmatprep.subr.mxu1 %v15076_v34 }
 0x2ff   :  { %9342 = vmatprep.subr.mxu0 %v15076_v34  ;;  %9406 = vmatpush3.msra.mxu1 %v5246_v6  ;;  %v5273_v63 = vsub.f32 %v13465_v36, %v15001_v52  ;;  %v14998_v6 = vand.u32 4294901760, %v13509_v23 }
 0x300   :  { %9343 = vmatpush3.msra.mxu0 %v13348_v15  ;;  %9407 = vmatprep.subr.mxu1 %v15076_v34 }
 0x301   :  { %9258 = vmatprep.mubr.msk.f32.mxu0 %vm10142_vm0, %v15076_v34  ;;  %9323 = vmatprep.mubr.msk.f32.mxu1 %vm10142_vm0, %v15076_v34  ;;  %v5274_v38 = vand.u32 4294901760, %v5273_v63  ;;  %v13552_v63 = vsub.f32 %v4025_v20, %v13529_v0 }
 0x302   :  { %9344 = vmatprep.subr.mxu0 %v15076_v34  ;;  %9408 = vmatpush3.msra.mxu1 %v5253_v47  ;;  %v5287_v47 = vsub.f32 %v13495_v16, %v14999_v1  ;;  %v15267_v1 = vld [vmem:[#allocation11_spill] sm:$0xff] }
 0x303   :  { %9259 = vmatmul.mubr.f32.gmra.mxu0 %v12868_v12  ;;  %9324 = vmatmul.mubr.f32.gmra.mxu1 %v12968_v53  ;;  %v13513_v12 = vand.u32 4294901760, %v4026_v45  ;;  %v13683_v10 = vand.u32 4294901760, %v15267_v1 }
 0x304   :  { %9345 = vmatpush3.msra.mxu0 %v13359_v49  ;;  %9409 = vmatprep.subr.mxu1 %v15076_v34 }
 0x305   :  { %9346 = vmatprep.subr.mxu0 %v15076_v34  ;;  %9410 = vmatpush3.msra.mxu1 %v5260_v11  ;;  %v13537_v50 = vsub.f32 %v4026_v45, %v13513_v12  ;;  %v13543_v11 = vand.u32 4294901760, %v4024_v39  ;;  %v5294_v45 = vsub.f32 %v13509_v23, %v14998_v6 }
 0x306   :  { %9347 = vmatpush3.msra.mxu0 %v13373_v24  ;;  %9411 = vmatprep.subr.mxu1 %v15076_v34 }
 0x307   :  { %9261 = vmatprep.mubr.msk.f32.mxu0 %vm10142_vm0, %v15076_v34  ;;  %9326 = vmatprep.mubr.msk.f32.mxu1 %vm10142_vm0, %v15076_v34  ;;  %v13565_v20 = vsub.f32 %v4024_v39, %v13543_v11 }
 0x308   :  { %9412 = vmatpush3.msra.mxu1 %v5267_v42  ;;  %9262 = vmatmul.mubr.f32.gmra.mxu0 %v12899_v37  ;;  %v5281_v37 = vand.u32 4294901760, %v5280_v60  ;;  %v5288_v42 = vand.u32 4294901760, %v5287_v47  ;;  %v14994_v60 = vand.u32 4294901760, %v13537_v50  ;;  %v5295_v47 = vand.u32 4294901760, %v5294_v45 }
 0x309   :  { %9327 = vmatmul.mubr.f32.gmra.mxu1 %v12999_v31  ;;  %9348 = vmatprep.subr.mxu0 %v15076_v34  ;;  %v14996_v45 = vand.u32 4294901760, %v13565_v20 }
 0x30a   :  { %9413 = vmatprep.subr.mxu1 %v15076_v34  ;;  %9349 = vmatpush3.msra.mxu0 %v13390_v54 }
 0x30b   :  { %9414 = vmatpush3.msra.mxu1 %v5274_v38  ;;  %9350 = vmatprep.subr.mxu0 %v15076_v34  ;;  %v5301_v38 = vsub.f32 %v13521_v61, %v14995_v9 }
 0x30c   :  { %9415 = vmatprep.subr.mxu1 %v15076_v34  ;;  %9264 = vmatprep.mubr.msk.f32.mxu0 %vm10142_vm0, %v15076_v34 }
 0x30d   :  { %9329 = vmatprep.mubr.msk.f32.mxu1 %vm10142_vm0, %v15076_v34  ;;  %9351 = vmatpush3.msra.mxu0 %v13409_v46  ;;  %v5302_v39 = vand.u32 4294901760, %v5301_v38  ;;  %v15263_v38 = vld [vmem:[#allocation51_spill] sm:$0xff] }
 0x30e   :  { %9416 = vmatpush3.msra.mxu1 %v5281_v37  ;;  %9265 = vmatmul.mubr.f32.gmra.mxu0 %v12968_v53  ;;  %v14997_v37 = vand.u32 4294901760, %v13552_v63  ;;  %v5308_v53 = vsub.f32 %v13537_v50, %v14994_v60  ;;  %v13589_v9 = vand.u32 4294901760, %v15263_v38 }
 0x30f   :  { %9330 = vmatmul.mubr.f32.gmra.mxu1 %v13035_v33  ;;  %9352 = vmatprep.subr.mxu0 %v15076_v34 }
 0x310   :  { %9417 = vmatprep.subr.mxu1 %v15076_v34  ;;  %9353 = vmatpush3.msra.mxu0 %v13427_v55  ;;  %v5309_v60 = vand.u32 4294901760, %v5308_v53  ;;  %v13605_v53 = vsub.f32 %v15263_v38, %v13589_v9 }
 0x311   :  { %9418 = vmatpush3.msra.mxu1 %v5288_v42  ;;  %9354 = vmatprep.subr.mxu0 %v15076_v34  ;;  %v5315_v42 = vsub.f32 %v13552_v63, %v14997_v37 }
 0x312   :  { %9419 = vmatprep.subr.mxu1 %v15076_v34  ;;  %9267 = vmatprep.mubr.msk.f32.mxu0 %vm10142_vm0, %v15076_v34 }
 0x313   :  { %9332 = vmatprep.mubr.msk.f32.mxu1 %vm10142_vm0, %v15076_v34  ;;  %9355 = vmatpush3.msra.mxu0 %v13444_v28 }
 0x314   :  { %9420 = vmatpush3.msra.mxu1 %v5295_v47  ;;  %9268 = vmatmul.mubr.f32.gmra.mxu0 %v12999_v31  ;;  %v5322_v31 = vsub.f32 %v13565_v20, %v14996_v45  ;;  %v5316_v47 = vand.u32 4294901760, %v5315_v42  ;;  %v5125_v42 = vand.u32 4294901760, %v13605_v53  ;;  %v15266_v45 = vld [vmem:[#allocation52_spill] sm:$0xff] }
 0x315   :  { %9333 = vmatmul.mubr.f32.gmra.mxu1 %v13069_v4  ;;  %9421 = vmatprep.subr.mxu1 %v15076_v34  ;;  %v13659_v37 = vand.u32 4294901760, %v15266_v45 }
 0x316   :  { %9356 = vmatprep.subr.mxu0 %v15076_v34  ;;  %9422 = vmatpush3.msra.mxu1 %v5302_v39  ;;  %v5323_v39 = vand.u32 4294901760, %v5322_v31  ;;  %v15265_v31 = vld [vmem:[#allocation13_spill] sm:$0xff] }
 0x317   :  { %9357 = vmatpush3.msra.mxu0 %v13459_v3  ;;  %9423 = vmatprep.subr.mxu1 %v15076_v34 }
 0x318   :  { %9270 = vmatprep.mubr.msk.f32.mxu0 %vm10142_vm0, %v15076_v34  ;;  %9335 = vmatprep.mubr.msk.f32.mxu1 %vm10142_vm0, %v15076_v34 }
 0x319   :  { %9358 = vmatprep.subr.mxu0 %v15076_v34  ;;  %9424 = vmatpush3.msra.mxu1 %v5309_v60  ;;  %v15264_v60 = vld [vmem:[#allocation47_spill] sm:$0xff] }
 0x31a   :  { %9271 = vmatmul.mubr.f32.gmra.mxu0 %v13035_v33  ;;  %9336 = vmatmul.mubr.f32.gmra.mxu1 %v13092_v59  ;;  %v13613_v33 = vand.u32 4294901760, %v15264_v60 }
 0x31b   :  { %9359 = vmatpush3.msra.mxu0 %v13474_v22  ;;  %9425 = vmatprep.subr.mxu1 %v15076_v34 }
 0x31c   :  { %9360 = vmatprep.subr.mxu0 %v15076_v34  ;;  %9426 = vmatpush3.msra.mxu1 %v5316_v47  ;;  %v13628_v38 = vsub.f32 %v15264_v60, %v13613_v33  ;;  %v13639_v47 = vand.u32 4294901760, %v15265_v31 }
 0x31d   :  { %9361 = vmatpush3.msra.mxu0 %v13488_v13  ;;  %9427 = vmatprep.subr.mxu1 %v15076_v34 }
 0x31e   :  { %9273 = vmatprep.mubr.msk.f32.mxu0 %vm10142_vm0, %v15076_v34  ;;  %9362 = vmatprep.subr.mxu0 %v15076_v34 }
 0x31f   :  { %9428 = vmatpush3.msra.mxu1 %v5323_v39  ;;  %9429 = vmatprep.mubr.msk.f32.mxu1 %vm10142_vm0, %v15076_v34  ;;  %v15016_v39 = vand.u32 4294901760, %v13628_v38 }
 0x320   :  { %9274 = vmatmul.mubr.f32.gmra.mxu0 %v13069_v4  ;;  %9430 = vmatmul.mubr.f32.vlgmr.msra.gmra.mxu1 %v13589_v9  ;;  %v5126_v4 = vsub.f32 %v13605_v53, %v5125_v42 }
 0x321   :  { %9363 = vmatpush3.msra.mxu0 %v13499_v57  ;;  %9276 = vmatprep.mubr.msk.f32.mxu0 %vm10142_vm0, %v15076_v34 }
 0x322   :  { %9364 = vmatprep.subr.mxu0 %v15076_v34  ;;  %9432 = vmatprep.mubr.msk.f32.mxu1 %vm10142_vm0, %v15076_v34  ;;  %v5127_v60 = vand.u32 4294901760, %v5126_v4  ;;  %v5136_v4 = vsub.f32 %v13628_v38, %v15016_v39 }
 0x323   :  { %9365 = vmatpush3.msra.mxu0 %v13513_v12  ;;  %9515 = vmatprep.subr.mxu1 %v15076_v34 }
 0x324   :  { %9277 = vmatmul.mubr.f32.gmra.mxu0 %v13092_v59  ;;  %9366 = vmatprep.subr.mxu0 %v15076_v34  ;;  %v13652_v59 = vsub.f32 %v15265_v31, %v13639_v47  ;;  %v5137_v6 = vand.u32 4294901760, %v5136_v4 }
 0x325   :  { %9433 = vmatmul.mubr.f32.gmra.mxu1 %v13613_v33  ;;  %9367 = vmatpush3.msra.mxu0 %v13529_v0 }
 0x326   :  { %9516 = vmatpush3.msra.mxu1 %v13323_v19  ;;  %9368 = vmatprep.subr.mxu0 %v15076_v34  ;;  %v15013_v31 = vand.u32 4294901760, %v13652_v59 }
 0x327   :  { %9517 = vmatprep.subr.mxu1 %v15076_v34  ;;  %9369 = vmatpush3.msra.mxu0 %v13543_v11 }
 0x328   :  { %9370 = vmatprep.mubr.msk.f32.mxu0 %vm10142_vm0, %v15076_v34  ;;  %9435 = vmatprep.mubr.msk.f32.mxu1 %vm10142_vm0, %v15076_v34 }
 0x329   :  { %9518 = vmatpush3.msra.mxu1 %v13334_v17  ;;  %9371 = vmatmul.mubr.f32.vlgmr.msra.gmra.mxu0 %v5127_v60  ;;  %v13675_v60 = vsub.f32 %v15266_v45, %v13659_v37  ;;  %v5146_v45 = vsub.f32 %v13652_v59, %v15013_v31 }
 0x32a   :  { %9436 = vmatmul.mubr.f32.gmra.mxu1 %v13639_v47  ;;  %9456 = vmatprep.subr.mxu0 %v15076_v34 }
 0x32b   :  { %9519 = vmatprep.subr.mxu1 %v15076_v34  ;;  %9457 = vmatpush3.msra.mxu0 %v13339_v29  ;;  %v15010_v4 = vand.u32 4294901760, %v13675_v60  ;;  %v5147_v52 = vand.u32 4294901760, %v5146_v45 }
 0x32c   :  { %9520 = vmatpush3.msra.mxu1 %v13348_v15  ;;  %9373 = vmatprep.mubr.msk.f32.mxu0 %vm10142_vm0, %v15076_v34 }
 0x32d   :  { %9521 = vmatprep.subr.mxu1 %v15076_v34  ;;  %9438 = vmatprep.mubr.msk.f32.mxu1 %vm10142_vm0, %v15076_v34  ;;  %v5156_v8 = vsub.f32 %v13675_v60, %v15010_v4  ;;  %v13757_v4 = vand.u32 4294901760, %v15270_v41 }
 0x32e   :  { %9458 = vmatprep.subr.mxu0 %v15076_v34  ;;  %9522 = vmatpush3.msra.mxu1 %v13359_v49 }
 0x32f   :  { %9374 = vmatmul.mubr.f32.gmra.mxu0 %v5137_v6  ;;  %9439 = vmatmul.mubr.f32.gmra.mxu1 %v13659_v37  ;;  %v13698_v6 = vsub.f32 %v15267_v1, %v13683_v10  ;;  %v5157_v45 = vand.u32 4294901760, %v5156_v8 }
 0x330   :  { %9459 = vmatpush3.msra.mxu0 %v13353_v32  ;;  %9523 = vmatprep.subr.mxu1 %v15076_v34 }
 0x331   :  { %9460 = vmatprep.subr.mxu0 %v15076_v34  ;;  %9524 = vmatpush3.msra.mxu1 %v13373_v24  ;;  %v15008_v1 = vand.u32 4294901760, %v13698_v6 }
 0x332   :  { %9461 = vmatpush3.msra.mxu0 %v13367_v48  ;;  %9525 = vmatprep.subr.mxu1 %v15076_v34 }
 0x333   :  { %9376 = vmatprep.mubr.msk.f32.mxu0 %vm10142_vm0, %v15076_v34  ;;  %9441 = vmatprep.mubr.msk.f32.mxu1 %vm10142_vm0, %v15076_v34  ;;  %v5166_v56 = vsub.f32 %v13698_v6, %v15008_v1 }
 0x334   :  { %9462 = vmatprep.subr.mxu0 %v15076_v34  ;;  %9526 = vmatpush3.msra.mxu1 %v13390_v54 }
 0x335   :  { %9377 = vmatmul.mubr.f32.gmra.mxu0 %v5147_v52  ;;  %9442 = vmatmul.mubr.f32.gmra.mxu1 %v13683_v10  ;;  %v13722_v52 = vsub.f32 %v15268_v21, %v13710_v7  ;;  %v5167_v8 = vand.u32 4294901760, %v5166_v56 }
 0x336   :  { %9463 = vmatpush3.msra.mxu0 %v13382_v35  ;;  %9527 = vmatprep.subr.mxu1 %v15076_v34 }
 0x337   :  { %9464 = vmatprep.subr.mxu0 %v15076_v34  ;;  %9528 = vmatpush3.msra.mxu1 %v13409_v46  ;;  %v15011_v21 = vand.u32 4294901760, %v13722_v52 }
 0x338   :  { %9465 = vmatpush3.msra.mxu0 %v13400_v14  ;;  %9529 = vmatprep.subr.mxu1 %v15076_v34 }
 0x339   :  { %9379 = vmatprep.mubr.msk.f32.mxu0 %vm10142_vm0, %v15076_v34  ;;  %9444 = vmatprep.mubr.msk.f32.mxu1 %vm10142_vm0, %v15076_v34  ;;  %v5176_v1 = vsub.f32 %v13722_v52, %v15011_v21  ;;  %v15271_v21 = vld [vmem:[#allocation23_spill] sm:$0xff] }
 0x33a   :  { %9530 = vmatpush3.msra.mxu1 %v13427_v55  ;;  %9380 = vmatmul.mubr.f32.gmra.mxu0 %v5157_v45  ;;  %v13747_v45 = vsub.f32 %v15269_v27, %v13733_v51  ;;  %v13774_v18 = vand.u32 4294901760, %v15271_v21 }
 0x33b   :  { %9445 = vmatmul.mubr.f32.gmra.mxu1 %v13710_v7  ;;  %9466 = vmatprep.subr.mxu0 %v15076_v34  ;;  %v5177_v56 = vand.u32 4294901760, %v5176_v1 }
 0x33c   :  { %9531 = vmatprep.subr.mxu1 %v15076_v34  ;;  %9467 = vmatpush3.msra.mxu0 %v13417_v43  ;;  %v15014_v27 = vand.u32 4294901760, %v13747_v45 }
 0x33d   :  { %9532 = vmatpush3.msra.mxu1 %v13444_v28  ;;  %9468 = vmatprep.subr.mxu0 %v15076_v34 }
 0x33e   :  { %9533 = vmatprep.subr.mxu1 %v15076_v34  ;;  %9382 = vmatprep.mubr.msk.f32.mxu0 %vm10142_vm0, %v15076_v34  ;;  %v5186_v31 = vsub.f32 %v13747_v45, %v15014_v27 }
 0x33f   :  { %9447 = vmatprep.mubr.msk.f32.mxu1 %vm10142_vm0, %v15076_v34  ;;  %9469 = vmatpush3.msra.mxu0 %v13433_v26 }
 0x340   :  { %9534 = vmatpush3.msra.mxu1 %v13459_v3  ;;  %9383 = vmatmul.mubr.f32.gmra.mxu0 %v5167_v8  ;;  %v13771_v8 = vsub.f32 %v15270_v41, %v13757_v4  ;;  %v13789_v41 = vsub.f32 %v15271_v21, %v13774_v18 }
 0x341   :  { %9448 = vmatmul.mubr.f32.gmra.mxu1 %v13733_v51  ;;  %9470 = vmatprep.subr.mxu0 %v15076_v34 }
 0x342   :  { %9535 = vmatprep.subr.mxu1 %v15076_v34  ;;  %9471 = vmatpush3.msra.mxu0 %v13449_v25  ;;  %v15015_v1 = vand.u32 4294901760, %v13771_v8  ;;  %v15018_v27 = vand.u32 4294901760, %v13789_v41 }
 0x343   :  { %9536 = vmatpush3.msra.mxu1 %v13474_v22  ;;  %9472 = vmatprep.subr.mxu0 %v15076_v34 }
 0x344   :  { %9537 = vmatprep.subr.mxu1 %v15076_v34  ;;  %9385 = vmatprep.mubr.msk.f32.mxu0 %vm10142_vm0, %v15076_v34  ;;  %v5196_v21 = vsub.f32 %v13771_v8, %v15015_v1  ;;  %v5206_v1 = vsub.f32 %v13789_v41, %v15018_v27 }
 0x345   :  { %9450 = vmatprep.mubr.msk.f32.mxu1 %vm10142_vm0, %v15076_v34  ;;  %9473 = vmatpush3.msra.mxu0 %v13465_v36 }
 0x346   :  { %9538 = vmatpush3.msra.mxu1 %v13488_v13  ;;  %9386 = vmatmul.mubr.f32.gmra.mxu0 %v5177_v56  ;;  %v5187_v56 = vand.u32 4294901760, %v5186_v31 }
 0x347   :  { %9451 = vmatmul.mubr.f32.gmra.mxu1 %v13757_v4  ;;  %9539 = vmatprep.subr.mxu1 %v15076_v34 }
 0x348   :  { %9474 = vmatprep.subr.mxu0 %v15076_v34  ;;  %9540 = vmatpush3.msra.mxu1 %v13499_v57 }
 0x349   :  { %9475 = vmatpush3.msra.mxu0 %v13479_v30  ;;  %9541 = vmatprep.subr.mxu1 %v15076_v34 }
 0x34a   :  { %9388 = vmatprep.mubr.msk.f32.mxu0 %vm10142_vm0, %v15076_v34  ;;  %9453 = vmatprep.mubr.msk.f32.mxu1 %vm10142_vm0, %v15076_v34 }
 0x34b   :  { %9476 = vmatprep.subr.mxu0 %v15076_v34  ;;  %9542 = vmatpush3.msra.mxu1 %v13513_v12 }
 0x34c   :  { %9389 = vmatmul.mubr.f32.gmra.mxu0 %v5187_v56  ;;  %9454 = vmatmul.mubr.f32.gmra.mxu1 %v13774_v18  ;;  %v5197_v56 = vand.u32 4294901760, %v5196_v21 }
 0x34d   :  { %9477 = vmatpush3.msra.mxu0 %v13495_v16  ;;  %9543 = vmatprep.subr.mxu1 %v15076_v34 }
 0x34e   :  { %9478 = vmatprep.subr.mxu0 %v15076_v34  ;;  %9544 = vmatpush3.msra.mxu1 %v13529_v0  ;;  %v4375_v31 = vpop.f32.mrf.mxu1 }
 0x34f   :  { %9479 = vmatpush3.msra.mxu0 %v13509_v23  ;;  %9545 = vmatprep.subr.mxu1 %v15076_v34 }
 0x350   :  { %9391 = vmatprep.mubr.msk.f32.mxu0 %vm10142_vm0, %v15076_v34  ;;  %9480 = vmatprep.subr.mxu0 %v15076_v34  ;;  %v9077_v39 = vpop.f32.mrf.mxu1 }
 0x351   :  { %9546 = vmatpush3.msra.mxu1 %v13543_v11  ;;  %9547 = vmatprep.mubr.msk.f32.mxu1 %vm10142_vm0, %v15076_v34  ;;  %v5207_v39 = vand.u32 4294901760, %v5206_v1 }
 0x352   :  { %9392 = vmatmul.mubr.f32.gmra.mxu0 %v5197_v56  ;;  %9548 = vmatmul.mubr.f32.vlgmr.msra.gmra.mxu1 %v5125_v42  ;;  %v4381_v40 = vpop.f32.mrf.mxu1  ;;  %v15272_v56 = vand.u32 4294901760, %v13628_v38 }
 0x353   :  { %9481 = vmatpush3.msra.mxu0 %v13521_v61  ;;  %9394 = vmatprep.mubr.msk.f32.mxu0 %vm10142_vm0, %v15076_v34 }
 0x354   :  { %9482 = vmatprep.subr.mxu0 %v15076_v34  ;;  %9550 = vmatprep.mubr.msk.f32.mxu1 %vm10142_vm0, %v15076_v34  ;;  %v9080_v21 = vpop.f32.mrf.mxu1 }
 0x355   :  { %9483 = vmatpush3.msra.mxu0 %v13537_v50  ;;  %9633 = vmatprep.subr.mxu1 %v15076_v34  ;;  %v15273_v21 = vand.u32 4294901760, %v13652_v59 }
 0x356   :  { %9395 = vmatmul.mubr.f32.gmra.mxu0 %v5207_v39  ;;  %9484 = vmatprep.subr.mxu0 %v15076_v34  ;;  %v4144_v42 = vpop.f32.mrf.mxu0 }
 0x357   :  { %9551 = vmatmul.mubr.f32.gmra.mxu1 %v15272_v56  ;;  %9485 = vmatpush3.msra.mxu0 %v13552_v63  ;;  %v13834_v27 = vadd.f32 %v4375_v31, %v4144_v42  ;;  %v4387_v2 = vpop.f32.mrf.mxu1  ;;  %v15274_v56 = vand.u32 4294901760, %v13339_v29  ;;  %v15276_v29 = vand.u32 4294901760, %v13353_v32 }
 0x358   :  { %9634 = vmatpush3.msra.mxu1 %v13323_v19  ;;  %9486 = vmatprep.subr.mxu0 %v15076_v34  ;;  %v9018_v1 = vpop.f32.mrf.mxu0 }
 0x359   :  { %9635 = vmatprep.subr.mxu1 %v15076_v34  ;;  %9487 = vmatpush3.msra.mxu0 %v13565_v20  ;;  %v9083_v39 = vpop.f32.mrf.mxu1 }
 0x35a   :  { %9488 = vmatprep.mubr.msk.f32.mxu0 %vm10142_vm0, %v15076_v34  ;;  %9553 = vmatprep.mubr.msk.f32.mxu1 %vm10142_vm0, %v15076_v34 }
 0x35b   :  { %9636 = vmatpush3.msra.mxu1 %v13334_v17  ;;  %9489 = vmatmul.mubr.f32.vlgmr.msra.gmra.mxu0 %v13605_v53  ;;  %v4154_v31 = vpop.f32.mrf.mxu0  ;;  %v4393_v19 = vpop.f32.mrf.mxu1  ;;  %v15275_v17 = vand.u32 4294901760, %v13675_v60 }
 0x35c   :  { %9554 = vmatmul.mubr.f32.gmra.mxu1 %v15273_v21  ;;  %9574 = vmatprep.subr.mxu0 %v15076_v34  ;;  %v13849_v42 = vadd.f32 %v4381_v40, %v4154_v31 }
 0x35d   :  { %9637 = vmatprep.subr.mxu1 %v15076_v34  ;;  %9575 = vmatpush3.msra.mxu0 %v15274_v56  ;;  %v9021_v1 = vpop.f32.mrf.mxu0  ;;  %v9086_v39 = vpop.f32.mrf.mxu1  ;;  %v15279_v56 = vand.u32 4294901760, %v13382_v35 }
 0x35e   :  { %9638 = vmatpush3.msra.mxu1 %v13348_v15  ;;  %9491 = vmatprep.mubr.msk.f32.mxu0 %vm10142_vm0, %v15076_v34 }
 0x35f   :  { %9639 = vmatprep.subr.mxu1 %v15076_v34  ;;  %9556 = vmatprep.mubr.msk.f32.mxu1 %vm10142_vm0, %v15076_v34 }
 0x360   :  { %9576 = vmatprep.subr.mxu0 %v15076_v34  ;;  %9640 = vmatpush3.msra.mxu1 %v13359_v49  ;;  %v4399_v40 = vpop.f32.mrf.mxu1  ;;  %v15277_v49 = vand.u32 4294901760, %v13367_v48 }
 0x361   :  { %9492 = vmatmul.mubr.f32.gmra.mxu0 %v13628_v38  ;;  %9557 = vmatmul.mubr.f32.gmra.mxu1 %v15275_v17  ;;  %v15282_v17 = vand.u32 4294901760, %v13417_v43 }
 0x362   :  { %9577 = vmatpush3.msra.mxu0 %v15276_v29  ;;  %9641 = vmatprep.subr.mxu1 %v15076_v34  ;;  %v4164_v15 = vpop.f32.mrf.mxu0  ;;  %v9089_v53 = vpop.f32.mrf.mxu1  ;;  %v15284_v29 = vand.u32 4294901760, %v13747_v45 }
 0x363   :  { %9578 = vmatprep.subr.mxu0 %v15076_v34  ;;  %9642 = vmatpush3.msra.mxu1 %v13373_v24  ;;  %v13870_v31 = vadd.f32 %v4387_v2, %v4164_v15  ;;  %v15278_v2 = vand.u32 4294901760, %v13698_v6  ;;  %v6061_v15 = vld [vmem:[#allocation5 + $0x178] sm:$0xff] }
 0x364   :  { %9579 = vmatpush3.msra.mxu0 %v15277_v49  ;;  %9643 = vmatprep.subr.mxu1 %v15076_v34  ;;  %v9024_v38 = vpop.f32.mrf.mxu0 }
 0x365   :  { %9494 = vmatprep.mubr.msk.f32.mxu0 %vm10142_vm0, %v15076_v34  ;;  %9559 = vmatprep.mubr.msk.f32.mxu1 %vm10142_vm0, %v15076_v34  ;;  %v4405_v32 = vpop.f32.mrf.mxu1 }
 0x366   :  { %9580 = vmatprep.subr.mxu0 %v15076_v34  ;;  %9644 = vmatpush3.msra.mxu1 %v13390_v54  ;;  %v4174_v24 = vpop.f32.mrf.mxu0  ;;  %v15280_v54 = vand.u32 4294901760, %v13400_v14  ;;  %v15281_v14 = vand.u32 4294901760, %v13722_v52 }
 0x367   :  { %9495 = vmatmul.mubr.f32.gmra.mxu0 %v13652_v59  ;;  %9560 = vmatmul.mubr.f32.gmra.mxu1 %v15278_v2  ;;  %v13884_v48 = vadd.f32 %v4393_v19, %v4174_v24  ;;  %v9092_v21 = vpop.f32.mrf.mxu1  ;;  %v15287_v2 = vand.u32 4294901760, %v13771_v8 }
 0x368   :  { %9581 = vmatpush3.msra.mxu0 %v15279_v56  ;;  %9645 = vmatprep.subr.mxu1 %v15076_v34  ;;  %v9027_v1 = vpop.f32.mrf.mxu0  ;;  %v6059_v56 = vld [vmem:[#allocation5 + $0x168] sm:$0xff] }
 0x369   :  { %9582 = vmatprep.subr.mxu0 %v15076_v34  ;;  %9646 = vmatpush3.msra.mxu1 %v13409_v46  ;;  %v13959_v1 = vand.u32 4294901760, %v6059_v56 }
 0x36a   :  { %9583 = vmatpush3.msra.mxu0 %v15280_v54  ;;  %9647 = vmatprep.subr.mxu1 %v15076_v34  ;;  %v4184_v59 = vpop.f32.mrf.mxu0 }
 0x36b   :  { %9497 = vmatprep.mubr.msk.f32.mxu0 %vm10142_vm0, %v15076_v34  ;;  %9562 = vmatprep.mubr.msk.f32.mxu1 %vm10142_vm0, %v15076_v34  ;;  %v13898_v35 = vadd.f32 %v4399_v40, %v4184_v59  ;;  %v4411_v19 = vpop.f32.mrf.mxu1 }
 0x36c   :  { %9648 = vmatpush3.msra.mxu1 %v13427_v55  ;;  %9498 = vmatmul.mubr.f32.gmra.mxu0 %v13675_v60  ;;  %v9030_v46 = vpop.f32.mrf.mxu0  ;;  %v15283_v60 = vand.u32 4294901760, %v13433_v26  ;;  %v15285_v26 = vand.u32 4294901760, %v13449_v25  ;;  %v15286_v25 = vand.u32 4294901760, %v13465_v36 }
 0x36d   :  { %9563 = vmatmul.mubr.f32.gmra.mxu1 %v15281_v14  ;;  %9584 = vmatprep.subr.mxu0 %v15076_v34  ;;  %v9095_v39 = vpop.f32.mrf.mxu1 }
 0x36e   :  { %9649 = vmatprep.subr.mxu1 %v15076_v34  ;;  %9585 = vmatpush3.msra.mxu0 %v15282_v17  ;;  %v6057_v39 = vld [vmem:[#allocation5 + $0x158] sm:$0xff] }
 0x36f   :  { %9650 = vmatpush3.msra.mxu1 %v13444_v28  ;;  %9586 = vmatprep.subr.mxu0 %v15076_v34 }
 0x370   :  { %9651 = vmatprep.subr.mxu1 %v15076_v34  ;;  %9500 = vmatprep.mubr.msk.f32.mxu0 %vm10142_vm0, %v15076_v34  ;;  %v4194_v55 = vpop.f32.mrf.mxu0 }
 0x371   :  { %9565 = vmatprep.mubr.msk.f32.mxu1 %vm10142_vm0, %v15076_v34  ;;  %9587 = vmatpush3.msra.mxu0 %v15283_v60  ;;  %v13917_v40 = vadd.f32 %v4405_v32, %v4194_v55  ;;  %v4417_v43 = vpop.f32.mrf.mxu1  ;;  %v15290_v60 = vand.u32 4294901760, %v13495_v16  ;;  %v6056_v16 = vld [vmem:[#allocation5 + $0x150] sm:$0xff] }
 0x372   :  { %9652 = vmatpush3.msra.mxu1 %v13459_v3  ;;  %9501 = vmatmul.mubr.f32.gmra.mxu0 %v13698_v6  ;;  %v9033_v28 = vpop.f32.mrf.mxu0  ;;  %v13932_v3 = vand.u32 4294901760, %v6061_v15  ;;  %v6060_v6 = vld [vmem:[#allocation5 + $0x170] sm:$0xff] }
 0x373   :  { %9566 = vmatmul.mubr.f32.gmra.mxu1 %v15284_v29  ;;  %9588 = vmatprep.subr.mxu0 %v15076_v34  ;;  %v9098_v53 = vpop.f32.mrf.mxu1  ;;  %v13945_v21 = vand.u32 4294901760, %v6060_v6  ;;  %v13986_v29 = vand.u32 4294901760, %v6057_v39 }
 0x374   :  { %9653 = vmatprep.subr.mxu1 %v15076_v34  ;;  %9589 = vmatpush3.msra.mxu0 %v15285_v26  ;;  %v13950_v36 = vsub.f32 %v6061_v15, %v13932_v3 }
 0x375   :  { %9654 = vmatpush3.msra.mxu1 %v13474_v22  ;;  %9590 = vmatprep.subr.mxu0 %v15076_v34 }
 0x376   :  { %9655 = vmatprep.subr.mxu1 %v15076_v34  ;;  %9503 = vmatprep.mubr.msk.f32.mxu0 %vm10142_vm0, %v15076_v34  ;;  %v4204_v49 = vpop.f32.mrf.mxu0  ;;  %v4423_v38 = vpop.f32.mrf.mxu1  ;;  %v15029_v46 = vand.u32 4294901760, %v13950_v36 }
 0x377   :  { %9568 = vmatprep.mubr.msk.f32.mxu1 %vm10142_vm0, %v15076_v34  ;;  %9591 = vmatpush3.msra.mxu0 %v15286_v25  ;;  %v13938_v32 = vadd.f32 %v4411_v19, %v4204_v49  ;;  %v15289_v19 = vand.u32 4294901760, %v13789_v41  ;;  %v6055_v25 = vld [vmem:[#allocation5 + $0x148] sm:$0xff] }
 0x378   :  { %9656 = vmatpush3.msra.mxu1 %v13488_v13  ;;  %9504 = vmatmul.mubr.f32.gmra.mxu0 %v13722_v52  ;;  %v9036_v22 = vpop.f32.mrf.mxu0  ;;  %v9101_v24 = vpop.f32.mrf.mxu1  ;;  %v15288_v13 = vand.u32 4294901760, %v13479_v30  ;;  %v6058_v52 = vld [vmem:[#allocation5 + $0x160] sm:$0xff]  ;;  %v13964_v30 = vsub.f32 %v6060_v6, %v13945_v21 }
 0x379   :  { %9569 = vmatmul.mubr.f32.gmra.mxu1 %v15287_v2  ;;  %9657 = vmatprep.subr.mxu1 %v15076_v34  ;;  %v13972_v14 = vand.u32 4294901760, %v6058_v52  ;;  %v15292_v22 = vand.u32 4294901760, %v13521_v61  ;;  %v14017_v24 = vsub.f32 %v6057_v39, %v13986_v29 }
 0x37a   :  { %9592 = vmatprep.subr.mxu0 %v15076_v34  ;;  %9658 = vmatpush3.msra.mxu1 %v13499_v57  ;;  %v15028_v28 = vand.u32 4294901760, %v13964_v30 }
 0x37b   :  { %9593 = vmatpush3.msra.mxu0 %v15288_v13  ;;  %9659 = vmatprep.subr.mxu1 %v15076_v34 }
 0x37c   :  { %9506 = vmatprep.mubr.msk.f32.mxu0 %vm10142_vm0, %v15076_v34  ;;  %9571 = vmatprep.mubr.msk.f32.mxu1 %vm10142_vm0, %v15076_v34  ;;  %v4214_v54 = vpop.f32.mrf.mxu0  ;;  %v4672_v59 = vpop.f32.mrf.mxu1 }
 0x37d   :  { %9594 = vmatprep.subr.mxu0 %v15076_v34  ;;  %9660 = vmatpush3.msra.mxu1 %v13513_v12  ;;  %v13966_v57 = vadd.f32 %v4417_v43, %v4214_v54  ;;  %v13980_v12 = vsub.f32 %v6059_v56, %v13959_v1  ;;  %v15291_v43 = vand.u32 4294901760, %v13509_v23  ;;  %v6237_v23 = vsub.f32 %v13950_v36, %v15029_v46 }
 0x37e   :  { %9507 = vmatmul.mubr.f32.gmra.mxu0 %v13747_v45  ;;  %9572 = vmatmul.mubr.f32.gmra.mxu1 %v15289_v19  ;;  %v9039_v17 = vpop.f32.mrf.mxu0  ;;  %v9195_v55 = vpop.f32.mrf.mxu1  ;;  %v14029_v54 = vand.u32 4294901760, %v6055_v25  ;;  %v6054_v19 = vld [vmem:[#allocation5 + $0x140] sm:$0xff] }
 0x37f   :  { %9595 = vmatpush3.msra.mxu0 %v15290_v60  ;;  %9661 = vmatprep.subr.mxu1 %v15076_v34  ;;  %v15027_v49 = vand.u32 4294901760, %v13980_v12  ;;  %v6238_v2 = vand.u32 4294901760, %v6237_v23  ;;  %v15294_v60 = vand.u32 4294901760, %v13552_v63  ;;  %v6053_v23 = vld [vmem:[#allocation5 + $0x138] sm:$0xff] }
 0x380   :  { %9596 = vmatprep.subr.mxu0 %v15076_v34  ;;  %9662 = vmatpush3.msra.mxu1 %v13529_v0  ;;  %v4224_v45 = vpop.f32.mrf.mxu0  ;;  %v13999_v0 = vsub.f32 %v6058_v52, %v13972_v14  ;;  %v15293_v52 = vand.u32 4294901760, %v13537_v50  ;;  %v14055_v63 = vsub.f32 %v6055_v25, %v14029_v54  ;;  %v14069_v25 = vand.u32 4294901760, %v6053_v23 }
 0x381   :  { %9597 = vmatpush3.msra.mxu0 %v15291_v43  ;;  %9663 = vmatprep.subr.mxu1 %v15076_v34  ;;  %v13988_v15 = vadd.f32 %v4423_v38, %v4224_v45  ;;  %v13990_v53 = vpop.f32.mrf.mxu1  ;;  %v14007_v38 = vand.u32 4294901760, %v6056_v16  ;;  %v6251_v17 = vsub.f32 %v13980_v12, %v15027_v49 }
 0x382   :  { %9509 = vmatprep.mubr.msk.f32.mxu0 %vm10142_vm0, %v15076_v34  ;;  %9598 = vmatprep.subr.mxu0 %v15076_v34  ;;  %v9042_v26 = vpop.f32.mrf.mxu0  ;;  %v15024_v61 = vand.u32 4294901760, %v13999_v0 }
 0x383   :  { %9664 = vmatpush3.msra.mxu1 %v13543_v11  ;;  %9665 = vmatprep.mubr.msk.f32.mxu1 %vm10142_vm0, %v15076_v34  ;;  %v9198_v6 = vpop.f32.mrf.mxu1  ;;  %v6244_v11 = vsub.f32 %v13964_v30, %v15028_v28 }
 0x384   :  { %9510 = vmatmul.mubr.f32.gmra.mxu0 %v13771_v8  ;;  %9666 = vmatmul.mubr.f32.vlgmr.msra.gmra.mxu1 %v13589_v9  ;;  %v6258_v43 = vsub.f32 %v13999_v0, %v15024_v61 }
 0x385   :  { %9599 = vmatpush3.msra.mxu0 %v15292_v22  ;;  %9512 = vmatprep.mubr.msk.f32.mxu0 %vm10142_vm0, %v15076_v34  ;;  %v4527_v8 = vpop.f32.mrf.mxu0  ;;  %v6245_v45 = vand.u32 4294901760, %v6244_v11  ;;  %v6252_v22 = vand.u32 4294901760, %v6251_v17 }
 0x386   :  { %9600 = vmatprep.subr.mxu0 %v15076_v34  ;;  %9668 = vmatprep.mubr.msk.f32.mxu1 %vm10142_vm0, %v15076_v34  ;;  %v4528_v56 = vadd.f32 %v4527_v8, %v13834_v27  ;;  %v14024_v13 = vpop.f32.mrf.mxu1  ;;  %v14037_v27 = vsub.f32 %v6056_v16, %v14007_v38  ;;  %v14049_v16 = vand.u32 4294901760, %v6054_v19 }
 0x387   :  { %9601 = vmatpush3.msra.mxu0 %v15293_v52  ;;  %9751 = vmatprep.subr.mxu1 %v15076_v34  ;;  %v9136_v39 = vpop.f32.mrf.mxu0 }
 0x388   :  { %9513 = vmatmul.mubr.f32.gmra.mxu0 %v13789_v41  ;;  %9602 = vmatprep.subr.mxu0 %v15076_v34  ;;  %v9201_v55 = vpop.f32.mrf.mxu1  ;;  %v14039_v50 = vadd.f32 %v4672_v59, %v4528_v56  ;;  %v15023_v41 = vand.u32 4294901760, %v14017_v24  ;;  %v15295_v59 = vand.u32 4294901760, %v13565_v20  ;;  %v15022_v11 = vand.u32 4294901760, %v14037_v27 }
 0x389   :  { %9669 = vmatmul.mubr.f32.gmra.mxu1 %v13613_v33  ;;  %9603 = vmatpush3.msra.mxu0 %v15294_v60  ;;  %v6259_v39 = vand.u32 4294901760, %v6258_v43  ;;  %v14074_v17 = vsub.f32 %v6054_v19, %v14049_v16  ;;  %v6051_v19 = vld [vmem:[#allocation5 + $0x128] sm:$0xff] }
 0x38a   :  { %9752 = vmatpush3.msra.mxu1 %v6238_v2  ;;  %9604 = vmatprep.subr.mxu0 %v15076_v34  ;;  %v6265_v20 = vsub.f32 %v14017_v24, %v15023_v41  ;;  %v6052_v2 = vld [vmem:[#allocation5 + $0x130] sm:$0xff]  ;;  %v6272_v55 = vsub.f32 %v14037_v27, %v15022_v11 }
 0x38b   :  { %9753 = vmatprep.subr.mxu1 %v15076_v34  ;;  %9605 = vmatpush3.msra.mxu0 %v15295_v59  ;;  %v4534_v26 = vpop.f32.mrf.mxu0  ;;  %v14057_v6 = vpop.f32.mrf.mxu1  ;;  %v14087_v60 = vand.u32 4294901760, %v6052_v2  ;;  %v6048_v41 = vld [vmem:[#allocation5 + $0x110] sm:$0xff] }
 0x38c   :  { %9606 = vmatprep.mubr.msk.f32.mxu0 %vm10142_vm0, %v15076_v34  ;;  %9671 = vmatprep.mubr.msk.f32.mxu1 %vm10142_vm0, %v15076_v34  ;;  %v4535_v8 = vadd.f32 %v4534_v26, %v13849_v42  ;;  %v15021_v26 = vand.u32 4294901760, %v14074_v17 }
 0x38d   :  { %9754 = vmatpush3.msra.mxu1 %v6245_v45  ;;  %9607 = vmatmul.mubr.f32.vlgmr.msra.gmra.mxu0 %v13589_v9  ;;  %v9139_v56 = vpop.f32.mrf.mxu0  ;;  %v9204_v52 = vpop.f32.mrf.mxu1  ;;  %v15020_v9 = vand.u32 4294901760, %v14055_v63  ;;  %v14093_v45 = vsub.f32 %v6053_v23, %v14069_v25  ;;  %v14105_v23 = vand.u32 4294901760, %v6051_v19 }
 0x38e   :  { %9672 = vmatmul.mubr.f32.gmra.mxu1 %v13639_v47  ;;  %9692 = vmatprep.subr.mxu0 %v15076_v34  ;;  %v14077_v42 = vadd.f32 %v13990_v53, %v4535_v8  ;;  %v6266_v53 = vand.u32 4294901760, %v6265_v20  ;;  %v6050_v20 = vld [vmem:[#allocation5 + $0x120] sm:$0xff] }
 0x38f   :  { %9755 = vmatprep.subr.mxu1 %v15076_v34  ;;  %9693 = vmatpush3.msra.mxu0 %v13932_v3  ;;  %v6279_v8 = vsub.f32 %v14055_v63, %v15020_v9  ;;  %v6049_v9 = vld [vmem:[#allocation5 + $0x118] sm:$0xff] }
 0x390   :  { %9756 = vmatpush3.msra.mxu1 %v6252_v22  ;;  %9609 = vmatprep.mubr.msk.f32.mxu0 %vm10142_vm0, %v15076_v34  ;;  %v14136_v11 = vand.u32 4294901760, %v6049_v9 }
 0x391   :  { %9757 = vmatprep.subr.mxu1 %v15076_v34  ;;  %9674 = vmatprep.mubr.msk.f32.mxu1 %vm10142_vm0, %v15076_v34  ;;  %v4541_v43 = vpop.f32.mrf.mxu0  ;;  %v14095_v59 = vpop.f32.mrf.mxu1 }
 0x392   :  { %9694 = vmatprep.subr.mxu0 %v15076_v34  ;;  %9758 = vmatpush3.msra.mxu1 %v6259_v39  ;;  %v4542_v22 = vadd.f32 %v4541_v43, %v13870_v31  ;;  %v6273_v39 = vand.u32 4294901760, %v6272_v55  ;;  %v14110_v31 = vsub.f32 %v6052_v2, %v14087_v60  ;;  %v15025_v43 = vand.u32 4294901760, %v14093_v45 }
 0x393   :  { %9610 = vmatmul.mubr.f32.gmra.mxu0 %v13613_v33  ;;  %9675 = vmatmul.mubr.f32.gmra.mxu1 %v13659_v37  ;;  %v9142_v56 = vpop.f32.mrf.mxu0  ;;  %v9207_v52 = vpop.f32.mrf.mxu1  ;;  %v6286_v55 = vsub.f32 %v14074_v17, %v15021_v26 }
 0x394   :  { %9695 = vmatpush3.msra.mxu0 %v13945_v21  ;;  %9759 = vmatprep.subr.mxu1 %v15076_v34  ;;  %v14113_v33 = vadd.f32 %v14024_v13, %v4542_v22  ;;  %v14122_v56 = vand.u32 4294901760, %v6050_v20  ;;  %v6280_v13 = vand.u32 4294901760, %v6279_v8  ;;  %v15026_v26 = vand.u32 4294901760, %v14110_v31 }
 0x395   :  { %9696 = vmatprep.subr.mxu0 %v15076_v34  ;;  %9760 = vmatpush3.msra.mxu1 %v6266_v53  ;;  %v14129_v53 = vsub.f32 %v6051_v19, %v14105_v23  ;;  %v6293_v19 = vsub.f32 %v14093_v45, %v15025_v43  ;;  %v6047_v43 = vld [vmem:[#allocation5 + $0x108] sm:$0xff] }
 0x396   :  { %9697 = vmatpush3.msra.mxu0 %v13959_v1  ;;  %9761 = vmatprep.subr.mxu1 %v15076_v34  ;;  %v4548_v2 = vpop.f32.mrf.mxu0  ;;  %v14172_v49 = vand.u32 4294901760, %v6047_v43 }
 0x397   :  { %9612 = vmatprep.mubr.msk.f32.mxu0 %vm10142_vm0, %v15076_v34  ;;  %9677 = vmatprep.mubr.msk.f32.mxu1 %vm10142_vm0, %v15076_v34  ;;  %v4549_v22 = vadd.f32 %v4548_v2, %v13884_v48  ;;  %v14132_v52 = vpop.f32.mrf.mxu1  ;;  %v14149_v2 = vsub.f32 %v6050_v20, %v14122_v56 }
 0x398   :  { %9698 = vmatprep.subr.mxu0 %v15076_v34  ;;  %9762 = vmatpush3.msra.mxu1 %v6273_v39  ;;  %v9145_v61 = vpop.f32.mrf.mxu0  ;;  %v6287_v39 = vand.u32 4294901760, %v6286_v55  ;;  %v14161_v55 = vsub.f32 %v6049_v9, %v14136_v11  ;;  %v6046_v9 = vld [vmem:[#allocation5 + $0x100] sm:$0xff] }
 0x399   :  { %9613 = vmatmul.mubr.f32.gmra.mxu0 %v13639_v47  ;;  %9678 = vmatmul.mubr.f32.gmra.mxu1 %v13683_v10  ;;  %v9210_v48 = vpop.f32.mrf.mxu1  ;;  %v14144_v8 = vadd.f32 %v14057_v6, %v4549_v22  ;;  %15296 = vst [vmem:[#allocation50_spill] sm:$0xff] %v14149_v2  ;;  %v15030_v47 = vand.u32 4294901760, %v14129_v53  ;;  %v14153_v61 = vand.u32 4294901760, %v6048_v41  ;;  %v6300_v6 = vsub.f32 %v14110_v31, %v15026_v26 }
 0x39a   :  { %9699 = vmatpush3.msra.mxu0 %v13972_v14  ;;  %9763 = vmatprep.subr.mxu1 %v15076_v34  ;;  %v15031_v26 = vand.u32 4294901760, %v14149_v2  ;;  %v14189_v46 = vand.u32 4294901760, %v6046_v9 }
 0x39b   :  { %9700 = vmatprep.subr.mxu0 %v15076_v34  ;;  %9764 = vmatpush3.msra.mxu1 %v6280_v13  ;;  %v6294_v13 = vand.u32 4294901760, %v6293_v19  ;;  %v6307_v19 = vsub.f32 %v14129_v53, %v15030_v47 }
 0x39c   :  { %9701 = vmatpush3.msra.mxu0 %v13986_v29  ;;  %9765 = vmatprep.subr.mxu1 %v15076_v34  ;;  %v4555_v20 = vpop.f32.mrf.mxu0 }
 0x39d   :  { %9615 = vmatprep.mubr.msk.f32.mxu0 %vm10142_vm0, %v15076_v34  ;;  %9680 = vmatprep.mubr.msk.f32.mxu1 %vm10142_vm0, %v15076_v34  ;;  %v4556_v22 = vadd.f32 %v4555_v20, %v13898_v35  ;;  %v14168_v48 = vpop.f32.mrf.mxu1  ;;  %v14180_v35 = vsub.f32 %v6048_v41, %v14153_v61  ;;  %v15034_v20 = vand.u32 4294901760, %v14161_v55  ;;  %v6314_v41 = vsub.f32 %v14149_v2, %v15031_v26 }
 0x39e   :  { %9766 = vmatpush3.msra.mxu1 %v6287_v39  ;;  %9616 = vmatmul.mubr.f32.gmra.mxu0 %v13659_v37  ;;  %v9148_v28 = vpop.f32.mrf.mxu0  ;;  %v14212_v2 = vsub.f32 %v6046_v9, %v14189_v46 }
 0x39f   :  { %9681 = vmatmul.mubr.f32.gmra.mxu1 %v13710_v7  ;;  %9702 = vmatprep.subr.mxu0 %v15076_v34  ;;  %v9213_v39 = vpop.f32.mrf.mxu1  ;;  %v14183_v37 = vadd.f32 %v14095_v59, %v4556_v22  ;;  %v6301_v28 = vand.u32 4294901760, %v6300_v6  ;;  %v14198_v59 = vsub.f32 %v6047_v43, %v14172_v49  ;;  %v6321_v43 = vsub.f32 %v14161_v55, %v15034_v20 }
 0x3a0   :  { %9767 = vmatprep.subr.mxu1 %v15076_v34  ;;  %9703 = vmatpush3.msra.mxu0 %v14007_v38 }
 0x3a1   :  { %9768 = vmatpush3.msra.mxu1 %v6294_v13  ;;  %9704 = vmatprep.subr.mxu0 %v15076_v34  ;;  %v6308_v13 = vand.u32 4294901760, %v6307_v19 }
 0x3a2   :  { %9769 = vmatprep.subr.mxu1 %v15076_v34  ;;  %9618 = vmatprep.mubr.msk.f32.mxu0 %vm10142_vm0, %v15076_v34  ;;  %v4562_v6 = vpop.f32.mrf.mxu0 }
 0x3a3   :  { %9683 = vmatprep.mubr.msk.f32.mxu1 %vm10142_vm0, %v15076_v34  ;;  %9705 = vmatpush3.msra.mxu0 %v14029_v54  ;;  %v4563_v39 = vadd.f32 %v4562_v6, %v13917_v40  ;;  %v4728_v47 = vpop.f32.mrf.mxu1  ;;  %v15036_v40 = vand.u32 4294901760, %v14198_v59 }
 0x3a4   :  { %9770 = vmatpush3.msra.mxu1 %v6301_v28  ;;  %9619 = vmatmul.mubr.f32.gmra.mxu0 %v13683_v10  ;;  %v9151_v26 = vpop.f32.mrf.mxu0  ;;  %v6315_v10 = vand.u32 4294901760, %v6314_v41  ;;  %v15035_v41 = vand.u32 4294901760, %v14212_v2 }
 0x3a5   :  { %9684 = vmatmul.mubr.f32.gmra.mxu1 %v13733_v51  ;;  %9706 = vmatprep.subr.mxu0 %v15076_v34  ;;  %v9216_v19 = vpop.f32.mrf.mxu1  ;;  %v14215_v22 = vadd.f32 %v14132_v52, %v4563_v39  ;;  %v15297_v26 = vand.u32 4294901760, %v14180_v35  ;;  %v6322_v52 = vand.u32 4294901760, %v6321_v43  ;;  %v6335_v39 = vsub.f32 %v14198_v59, %v15036_v40 }
 0x3a6   :  { %9771 = vmatprep.subr.mxu1 %v15076_v34  ;;  %9707 = vmatpush3.msra.mxu0 %v14049_v16 }
 0x3a7   :  { %9772 = vmatpush3.msra.mxu1 %v6308_v13  ;;  %9708 = vmatprep.subr.mxu0 %v15076_v34  ;;  %v6328_v28 = vsub.f32 %v14180_v35, %v15297_v26 }
 0x3a8   :  { %9773 = vmatprep.subr.mxu1 %v15076_v34  ;;  %9621 = vmatprep.mubr.msk.f32.mxu0 %vm10142_vm0, %v15076_v34  ;;  %v4569_v9 = vpop.f32.mrf.mxu0  ;;  %v4736_v6 = vpop.f32.mrf.mxu1 }
 0x3a9   :  { %9686 = vmatprep.mubr.msk.f32.mxu1 %vm10142_vm0, %v15076_v34  ;;  %9709 = vmatpush3.msra.mxu0 %v14069_v25  ;;  %v4570_v13 = vadd.f32 %v4569_v9, %v13938_v32  ;;  %v6329_v26 = vand.u32 4294901760, %v6328_v28  ;;  %v15298_v32 = vld [vmem:[#allocation53_spill] sm:$0xff] }
 0x3aa   :  { %9774 = vmatpush3.msra.mxu1 %v6315_v10  ;;  %9622 = vmatmul.mubr.f32.gmra.mxu0 %v13710_v7  ;;  %v9154_v19 = vpop.f32.mrf.mxu0  ;;  %v9219_v43 = vpop.f32.mrf.mxu1  ;;  %v14243_v10 = vand.u32 4294901760, %v15298_v32  ;;  %v6342_v7 = vsub.f32 %v14212_v2, %v15035_v41 }
 0x3ab   :  { %9687 = vmatmul.mubr.f32.gmra.mxu1 %v13757_v4  ;;  %9775 = vmatprep.subr.mxu1 %v15076_v34  ;;  %v14239_v20 = vadd.f32 %v14168_v48, %v4570_v13  ;;  %v6336_v48 = vand.u32 4294901760, %v6335_v39 }
 0x3ac   :  { %9710 = vmatprep.subr.mxu0 %v15076_v34  ;;  %9776 = vmatpush3.msra.mxu1 %v6322_v52  ;;  %v14260_v43 = vsub.f32 %v15298_v32, %v14243_v10  ;;  %v6343_v39 = vand.u32 4294901760, %v6342_v7 }
 0x3ad   :  { %9711 = vmatpush3.msra.mxu0 %v14087_v60  ;;  %9777 = vmatprep.subr.mxu1 %v15076_v34 }
 0x3ae   :  { %9624 = vmatprep.mubr.msk.f32.mxu0 %vm10142_vm0, %v15076_v34  ;;  %9689 = vmatprep.mubr.msk.f32.mxu1 %vm10142_vm0, %v15076_v34  ;;  %v4576_v28 = vpop.f32.mrf.mxu0  ;;  %v4990_v52 = vpop.f32.mrf.mxu1  ;;  %v15038_v7 = vand.u32 4294901760, %v14260_v43 }
 0x3af   :  { %9712 = vmatprep.subr.mxu0 %v15076_v34  ;;  %9778 = vmatpush3.msra.mxu1 %v6329_v26  ;;  %v4577_v9 = vadd.f32 %v4576_v28, %v13966_v57 }
 0x3b0   :  { %9625 = vmatmul.mubr.f32.gmra.mxu0 %v13733_v51  ;;  %9690 = vmatmul.mubr.f32.gmra.mxu1 %v13774_v18  ;;  %v9157_v13 = vpop.f32.mrf.mxu0  ;;  %v9313_v19 = vpop.f32.mrf.mxu1  ;;  %v15299_v51 = vld [vmem:[#allocation49_spill] sm:$0xff] }
 0x3b1   :  { %9713 = vmatpush3.msra.mxu0 %v14105_v23  ;;  %9779 = vmatprep.subr.mxu1 %v15076_v34  ;;  %v14264_v41 = vadd.f32 %v4728_v47, %v4577_v9  ;;  %v14270_v26 = vand.u32 4294901760, %v15299_v51  ;;  %v6146_v19 = vsub.f32 %v14260_v43, %v15038_v7 }
 0x3b2   :  { %9714 = vmatprep.subr.mxu0 %v15076_v34  ;;  %9780 = vmatpush3.msra.mxu1 %v6336_v48  ;;  %v4583_v57 = vpop.f32.mrf.mxu0 }
 0x3b3   :  { %9715 = vmatpush3.msra.mxu0 %v14122_v56  ;;  %9781 = vmatprep.subr.mxu1 %v15076_v34  ;;  %15300 = vst [vmem:[#allocation30_spill] sm:$0xff] %v14270_v26  ;;  %v4584_v32 = vadd.f32 %v4583_v57, %v13988_v15  ;;  %v4996_v28 = vpop.f32.mrf.mxu1  ;;  %v14288_v15 = vsub.f32 %v15299_v51, %v14270_v26 }
 0x3b4   :  { %9627 = vmatprep.mubr.msk.f32.mxu0 %vm10142_vm0, %v15076_v34  ;;  %9716 = vmatprep.subr.mxu0 %v15076_v34  ;;  %v9160_v47 = vpop.f32.mrf.mxu0 }
 0x3b5   :  { %9782 = vmatpush3.msra.mxu1 %v6343_v39  ;;  %9783 = vmatprep.mubr.msk.f32.mxu1 %vm10142_vm0, %v15076_v34  ;;  %v9316_v48 = vpop.f32.mrf.mxu1  ;;  %v14279_v9 = vadd.f32 %v4736_v6, %v4584_v32  ;;  %v15301_v39 = vld [vmem:[#allocation26_spill] sm:$0xff] }
 0x3b6   :  { %9628 = vmatmul.mubr.f32.gmra.mxu0 %v13757_v4  ;;  %9784 = vmatmul.mubr.f32.vlgmr.msra.gmra.mxu1 %v14243_v10  ;;  %v14300_v57 = vand.u32 4294901760, %v15301_v39 }
 0x3b7   :  { %9717 = vmatpush3.msra.mxu0 %v14136_v11  ;;  %9630 = vmatprep.mubr.msk.f32.mxu0 %vm10142_vm0, %v15076_v34  ;;  %v4855_v13 = vpop.f32.mrf.mxu0 }
 0x3b8   :  { %9718 = vmatprep.subr.mxu0 %v15076_v34  ;;  %9786 = vmatprep.mubr.msk.f32.mxu1 %vm10142_vm0, %v15076_v34  ;;  %v4856_v6 = vadd.f32 %v4855_v13, %v14039_v50  ;;  %v5002_v4 = vpop.f32.mrf.mxu1  ;;  %15302 = vst [vmem:[#allocation27_spill] sm:$0xff] %v14300_v57  ;;  %v15037_v50 = vand.u32 4294901760, %v14288_v15  ;;  %v14315_v48 = vsub.f32 %v15301_v39, %v14300_v57 }
 0x3b9   :  { %9719 = vmatpush3.msra.mxu0 %v14153_v61  ;;  %9869 = vmatprep.subr.mxu1 %v15076_v34  ;;  %v9254_v51 = vpop.f32.mrf.mxu0 }
 0x3ba   :  { %9631 = vmatmul.mubr.f32.gmra.mxu0 %v13774_v18  ;;  %9720 = vmatprep.subr.mxu0 %v15076_v34  ;;  %v9319_v32 = vpop.f32.mrf.mxu1  ;;  %v14304_v47 = vadd.f32 %v4990_v52, %v4856_v6  ;;  %v6147_v18 = vand.u32 4294901760, %v6146_v19  ;;  %v14322_v6 = vand.u32 4294901760, %v13200_v44  ;;  %v6156_v19 = vsub.f32 %v14288_v15, %v15037_v50 }
 0x3bb   :  { %9787 = vmatmul.mubr.f32.gmra.mxu1 %v14270_v26  ;;  %9721 = vmatpush3.msra.mxu0 %v14172_v49 }
 0x3bc   :  { %9870 = vmatpush3.msra.mxu1 %v13932_v3  ;;  %9722 = vmatprep.subr.mxu0 %v15076_v34  ;;  %15303 = vst [vmem:[#allocation28_spill] sm:$0xff] %v14322_v6 }
 0x3bd   :  { %9871 = vmatprep.subr.mxu1 %v15076_v34  ;;  %9723 = vmatpush3.msra.mxu0 %v14189_v46  ;;  %v4861_v52 = vpop.f32.mrf.mxu0  ;;  %v5008_v13 = vpop.f32.mrf.mxu1 }
 0x3be   :  { %9724 = vmatprep.mubr.msk.f32.mxu0 %vm10142_vm0, %v15076_v34  ;;  %9789 = vmatprep.mubr.msk.f32.mxu1 %vm10142_vm0, %v15076_v34  ;;  %v4862_v51 = vadd.f32 %v4861_v52, %v14077_v42  ;;  %v15041_v42 = vand.u32 4294901760, %v14315_v48 }
 0x3bf   :  { %9872 = vmatpush3.msra.mxu1 %v13945_v21  ;;  %9725 = vmatmul.mubr.f32.vlgmr.msra.gmra.mxu0 %v6147_v18  ;;  %v9257_v39 = vpop.f32.mrf.mxu0  ;;  %v9322_v32 = vpop.f32.mrf.mxu1  ;;  %v14341_v18 = vsub.f32 %v13200_v44, %v14322_v6 }
 0x3c0   :  { %9790 = vmatmul.mubr.f32.gmra.mxu1 %v14300_v57  ;;  %9810 = vmatprep.subr.mxu0 %v15076_v34  ;;  %v14331_v40 = vadd.f32 %v4996_v28, %v4862_v51  ;;  %v6157_v28 = vand.u32 4294901760, %v6156_v19  ;;  %v14349_v39 = vand.u32 4294901760, %v13208_v58  ;;  %v6166_v44 = vsub.f32 %v14315_v48, %v15041_v42 }
 0x3c1   :  { %9873 = vmatprep.subr.mxu1 %v15076_v34  ;;  %9811 = vmatpush3.msra.mxu0 %v13950_v36  ;;  %v15042_v7 = vand.u32 4294901760, %v14341_v18 }
 0x3c2   :  { %9874 = vmatpush3.msra.mxu1 %v13959_v1  ;;  %9727 = vmatprep.mubr.msk.f32.mxu0 %vm10142_vm0, %v15076_v34  ;;  %15304 = vst [vmem:[#allocation33_spill] sm:$0xff] %v14349_v39 }
 0x3c3   :  { %9875 = vmatprep.subr.mxu1 %v15076_v34  ;;  %9792 = vmatprep.mubr.msk.f32.mxu1 %vm10142_vm0, %v15076_v34  ;;  %v4867_v52 = vpop.f32.mrf.mxu0  ;;  %v5014_v51 = vpop.f32.mrf.mxu1 }
 0x3c4   :  { %9812 = vmatprep.subr.mxu0 %v15076_v34  ;;  %9876 = vmatpush3.msra.mxu1 %v13972_v14  ;;  %v4868_v32 = vadd.f32 %v4867_v52, %v14113_v33  ;;  %v14367_v33 = vsub.f32 %v13208_v58, %v14349_v39  ;;  %v6176_v58 = vsub.f32 %v14341_v18, %v15042_v7 }
 0x3c5   :  { %9728 = vmatmul.mubr.f32.gmra.mxu0 %v6157_v28  ;;  %9793 = vmatmul.mubr.f32.gmra.mxu1 %v14322_v6  ;;  %v9260_v50 = vpop.f32.mrf.mxu0  ;;  %v9325_v19 = vpop.f32.mrf.mxu1 }
 0x3c6   :  { %9813 = vmatpush3.msra.mxu0 %v13964_v30  ;;  %9877 = vmatprep.subr.mxu1 %v15076_v34  ;;  %v14359_v57 = vadd.f32 %v5002_v4, %v4868_v32  ;;  %v6167_v4 = vand.u32 4294901760, %v6166_v44  ;;  %v14380_v32 = vand.u32 4294901760, %v13217_v62 }
 0x3c7   :  { %9814 = vmatprep.subr.mxu0 %v15076_v34  ;;  %9878 = vmatpush3.msra.mxu1 %v13986_v29 }
 0x3c8   :  { %9815 = vmatpush3.msra.mxu0 %v13980_v12  ;;  %9879 = vmatprep.subr.mxu1 %v15076_v34  ;;  %v4873_v50 = vpop.f32.mrf.mxu0  ;;  %15305 = vst [vmem:[#allocation31_spill] sm:$0xff] %v14380_v32 }
 0x3c9   :  { %9730 = vmatprep.mubr.msk.f32.mxu0 %vm10142_vm0, %v15076_v34  ;;  %9795 = vmatprep.mubr.msk.f32.mxu1 %vm10142_vm0, %v15076_v34  ;;  %v4874_v28 = vadd.f32 %v4873_v50, %v14144_v8  ;;  %v5020_v52 = vpop.f32.mrf.mxu1  ;;  %v15045_v8 = vand.u32 4294901760, %v14367_v33  ;;  %v6177_v50 = vand.u32 4294901760, %v6176_v58 }
 0x3ca   :  { %9816 = vmatprep.subr.mxu0 %v15076_v34  ;;  %9880 = vmatpush3.msra.mxu1 %v14007_v38  ;;  %v9263_v19 = vpop.f32.mrf.mxu0 }
 0x3cb   :  { %9731 = vmatmul.mubr.f32.gmra.mxu0 %v6167_v4  ;;  %9796 = vmatmul.mubr.f32.gmra.mxu1 %v14349_v39  ;;  %v9328_v42 = vpop.f32.mrf.mxu1  ;;  %v14383_v44 = vadd.f32 %v5008_v13, %v4874_v28  ;;  %v6186_v58 = vsub.f32 %v14367_v33, %v15045_v8 }
 0x3cc   :  { %9817 = vmatpush3.msra.mxu0 %v13999_v0  ;;  %9881 = vmatprep.subr.mxu1 %v15076_v34  ;;  %v14394_v42 = vsub.f32 %v13217_v62, %v14380_v32  ;;  %v14406_v62 = vand.u32 4294901760, %v13221_v5 }
 0x3cd   :  { %9818 = vmatprep.subr.mxu0 %v15076_v34  ;;  %9882 = vmatpush3.msra.mxu1 %v14029_v54 }
 0x3ce   :  { %9819 = vmatpush3.msra.mxu0 %v14017_v24  ;;  %9883 = vmatprep.subr.mxu1 %v15076_v34  ;;  %v4879_v13 = vpop.f32.mrf.mxu0  ;;  %15306 = vst [vmem:[#allocation34_spill] sm:$0xff] %v14406_v62 }
 0x3cf   :  { %9733 = vmatprep.mubr.msk.f32.mxu0 %vm10142_vm0, %v15076_v34  ;;  %9798 = vmatprep.mubr.msk.f32.mxu1 %vm10142_vm0, %v15076_v34  ;;  %v4880_v4 = vadd.f32 %v4879_v13, %v14183_v37  ;;  %v5026_v28 = vpop.f32.mrf.mxu1  ;;  %v15050_v37 = vand.u32 4294901760, %v14394_v42 }
 0x3d0   :  { %9884 = vmatpush3.msra.mxu1 %v14049_v16  ;;  %9734 = vmatmul.mubr.f32.gmra.mxu0 %v6177_v50  ;;  %v9266_v19 = vpop.f32.mrf.mxu0  ;;  %v6187_v50 = vand.u32 4294901760, %v6186_v58 }
 0x3d1   :  { %9799 = vmatmul.mubr.f32.gmra.mxu1 %v14380_v32  ;;  %9820 = vmatprep.subr.mxu0 %v15076_v34  ;;  %v9331_v7 = vpop.f32.mrf.mxu1  ;;  %v14410_v39 = vadd.f32 %v5014_v51, %v4880_v4  ;;  %v6196_v58 = vsub.f32 %v14394_v42, %v15050_v37  ;;  %v15307_v19 = vld [vmem:[#allocation24_spill] sm:$0xff] }
 0x3d2   :  { %9885 = vmatprep.subr.mxu1 %v15076_v34  ;;  %9821 = vmatpush3.msra.mxu0 %v14037_v27  ;;  %v14422_v7 = vsub.f32 %v13221_v5, %v14406_v62  ;;  %v14433_v8 = vand.u32 4294901760, %v15307_v19 }
 0x3d3   :  { %9886 = vmatpush3.msra.mxu1 %v14069_v25  ;;  %9822 = vmatprep.subr.mxu0 %v15076_v34 }
 0x3d4   :  { %9887 = vmatprep.subr.mxu1 %v15076_v34  ;;  %9736 = vmatprep.mubr.msk.f32.mxu0 %vm10142_vm0, %v15076_v34  ;;  %v4885_v51 = vpop.f32.mrf.mxu0  ;;  %15308 = vst [vmem:[#allocation32_spill] sm:$0xff] %v14433_v8 }
 0x3d5   :  { %9801 = vmatprep.mubr.msk.f32.mxu1 %vm10142_vm0, %v15076_v34  ;;  %9823 = vmatpush3.msra.mxu0 %v14055_v63  ;;  %v4886_v13 = vadd.f32 %v4885_v51, %v14215_v22  ;;  %v5032_v4 = vpop.f32.mrf.mxu1  ;;  %v15055_v22 = vand.u32 4294901760, %v14422_v7 }
 0x3d6   :  { %9888 = vmatpush3.msra.mxu1 %v14087_v60  ;;  %9737 = vmatmul.mubr.f32.gmra.mxu0 %v6187_v50  ;;  %v9269_v5 = vpop.f32.mrf.mxu0  ;;  %v6197_v50 = vand.u32 4294901760, %v6196_v58 }
 0x3d7   :  { %9802 = vmatmul.mubr.f32.gmra.mxu1 %v14406_v62  ;;  %9824 = vmatprep.subr.mxu0 %v15076_v34  ;;  %v9334_v32 = vpop.f32.mrf.mxu1  ;;  %v14437_v6 = vadd.f32 %v5020_v52, %v4886_v13  ;;  %v14449_v52 = vsub.f32 %v15307_v19, %v14433_v8  ;;  %v6206_v58 = vsub.f32 %v14422_v7, %v15055_v22 }
 0x3d8   :  { %9889 = vmatprep.subr.mxu1 %v15076_v34  ;;  %9825 = vmatpush3.msra.mxu0 %v14074_v17  ;;  %v15309_v32 = vld [vmem:[#allocation29_spill] sm:$0xff] }
 0x3d9   :  { %9890 = vmatpush3.msra.mxu1 %v14105_v23  ;;  %9826 = vmatprep.subr.mxu0 %v15076_v34  ;;  %v14452_v51 = vand.u32 4294901760, %v15309_v32 }
 0x3da   :  { %9891 = vmatprep.subr.mxu1 %v15076_v34  ;;  %9739 = vmatprep.mubr.msk.f32.mxu0 %vm10142_vm0, %v15076_v34  ;;  %v4891_v13 = vpop.f32.mrf.mxu0  ;;  %v5038_v5 = vpop.f32.mrf.mxu1 }
 0x3db   :  { %15310 = vst [vmem:[#allocation37_spill] sm:$0xff] %v14452_v51  ;;  %9804 = vmatprep.mubr.msk.f32.mxu1 %vm10142_vm0, %v15076_v34  ;;  %9827 = vmatpush3.msra.mxu0 %v14093_v45  ;;  %v4892_v37 = vadd.f32 %v4891_v13, %v14239_v20  ;;  %v14470_v20 = vsub.f32 %v15309_v32, %v14452_v51 }
 0x3dc   :  { %9892 = vmatpush3.msra.mxu1 %v14122_v56  ;;  %9740 = vmatmul.mubr.f32.gmra.mxu0 %v6197_v50  ;;  %v9272_v19 = vpop.f32.mrf.mxu0  ;;  %v9337_v62 = vpop.f32.mrf.mxu1  ;;  %v15058_v50 = vand.u32 4294901760, %v14449_v52 }
 0x3dd   :  { %9805 = vmatmul.mubr.f32.gmra.mxu1 %v14433_v8  ;;  %9893 = vmatprep.subr.mxu1 %v15076_v34  ;;  %v14464_v26 = vadd.f32 %v5026_v28, %v4892_v37  ;;  %v6207_v28 = vand.u32 4294901760, %v6206_v58  ;;  %v6225_v19 = vand.u32 4294901760, %v14470_v20 }
 0x3de   :  { %9828 = vmatprep.subr.mxu0 %v15076_v34  ;;  %9894 = vmatpush3.msra.mxu1 %v14136_v11  ;;  %v6216_v13 = vsub.f32 %v14449_v52, %v15058_v50 }
 0x3df   :  { %9829 = vmatpush3.msra.mxu0 %v14110_v31  ;;  %9895 = vmatprep.subr.mxu1 %v15076_v34 }
 0x3e0   :  { %9742 = vmatprep.mubr.msk.f32.mxu0 %vm10142_vm0, %v15076_v34  ;;  %9807 = vmatprep.mubr.msk.f32.mxu1 %vm10142_vm0, %v15076_v34  ;;  %v4897_v62 = vpop.f32.mrf.mxu0  ;;  %v5360_v37 = vpop.f32.mrf.mxu1 }
 0x3e1   :  { %9830 = vmatprep.subr.mxu0 %v15076_v34  ;;  %9896 = vmatpush3.msra.mxu1 %v14153_v61  ;;  %v4898_v32 = vadd.f32 %v4897_v62, %v14264_v41 }
 0x3e2   :  { %9743 = vmatmul.mubr.f32.gmra.mxu0 %v6207_v28  ;;  %9808 = vmatmul.mubr.f32.gmra.mxu1 %v14452_v51  ;;  %v9275_v22 = vpop.f32.mrf.mxu0  ;;  %v9431_v8 = vpop.f32.mrf.mxu1  ;;  %v15311_v28 = vld [vmem:[#allocation50_spill] sm:$0xff] }
 0x3e3   :  { %9831 = vmatpush3.msra.mxu0 %v14129_v53  ;;  %9897 = vmatprep.subr.mxu1 %v15076_v34  ;;  %v14489_v58 = vadd.f32 %v5032_v4, %v4898_v32  ;;  %v6217_v8 = vand.u32 4294901760, %v6216_v13  ;;  %v6226_v4 = vsub.f32 %v14470_v20, %v6225_v19 }
 0x3e4   :  { %9832 = vmatprep.subr.mxu0 %v15076_v34  ;;  %9898 = vmatpush3.msra.mxu1 %v14172_v49  ;;  %v4903_v41 = vpop.f32.mrf.mxu0 }
 0x3e5   :  { %9833 = vmatpush3.msra.mxu0 %v15311_v28  ;;  %9899 = vmatprep.subr.mxu1 %v15076_v34  ;;  %v4904_v62 = vadd.f32 %v4903_v41, %v14279_v9  ;;  %v5366_v50 = vpop.f32.mrf.mxu1  ;;  %v15312_v9 = vand.u32 4294901760, %v14260_v43  ;;  %v6227_v41 = vand.u32 4294901760, %v6226_v4 }
 0x3e6   :  { %9745 = vmatprep.mubr.msk.f32.mxu0 %vm10142_vm0, %v15076_v34  ;;  %9834 = vmatprep.subr.mxu0 %v15076_v34  ;;  %v9278_v22 = vpop.f32.mrf.mxu0 }
 0x3e7   :  { %9900 = vmatpush3.msra.mxu1 %v14189_v46  ;;  %9901 = vmatprep.mubr.msk.f32.mxu1 %vm10142_vm0, %v15076_v34  ;;  %v9434_v32 = vpop.f32.mrf.mxu1  ;;  %v14505_v51 = vadd.f32 %v5038_v5, %v4904_v62 }
 0x3e8   :  { %9746 = vmatmul.mubr.f32.gmra.mxu0 %v6217_v8  ;;  %9902 = vmatmul.mubr.f32.vlgmr.msra.gmra.mxu1 %v15312_v9  ;;  %v15313_v9 = vand.u32 4294901760, %v14288_v15 }
 0x3e9   :  { %9835 = vmatpush3.msra.mxu0 %v14161_v55  ;;  %9748 = vmatprep.mubr.msk.f32.mxu0 %vm10142_vm0, %v15076_v34  ;;  %v5129_v13 = vpop.f32.mrf.mxu0 }
 0x3ea   :  { %9836 = vmatprep.subr.mxu0 %v15076_v34  ;;  %9904 = vmatprep.mubr.msk.f32.mxu1 %vm10142_vm0, %v15076_v34  ;;  %v5130_v22 = vadd.f32 %v5129_v13, %v14304_v47  ;;  %v5372_v5 = vpop.f32.mrf.mxu1 }
 0x3eb   :  { %9837 = vmatpush3.msra.mxu0 %v14180_v35  ;;  %9987 = vmatprep.subr.mxu1 %v15076_v34  ;;  %v9372_v62 = vpop.f32.mrf.mxu0 }
 0x3ec   :  { %9749 = vmatmul.mubr.f32.gmra.mxu0 %v6227_v41  ;;  %9838 = vmatprep.subr.mxu0 %v15076_v34  ;;  %v9437_v8 = vpop.f32.mrf.mxu1  ;;  %v14519_v32 = vadd.f32 %v5360_v37, %v5130_v22  ;;  %v15314_v41 = vand.u32 4294901760, %v14315_v48  ;;  %v15315_v62 = vand.u32 4294901760, %v13950_v36  ;;  %v15316_v36 = vand.u32 4294901760, %v14341_v18 }
 0x3ed   :  { %9905 = vmatmul.mubr.f32.gmra.mxu1 %v15313_v9  ;;  %9839 = vmatpush3.msra.mxu0 %v14198_v59  ;;  %v15317_v8 = vand.u32 4294901760, %v13964_v30 }
 0x3ee   :  { %9988 = vmatpush3.msra.mxu1 %v13932_v3  ;;  %9840 = vmatprep.subr.mxu0 %v15076_v34 }
 0x3ef   :  { %9989 = vmatprep.subr.mxu1 %v15076_v34  ;;  %9841 = vmatpush3.msra.mxu0 %v14212_v2  ;;  %v5139_v47 = vpop.f32.mrf.mxu0  ;;  %v5378_v4 = vpop.f32.mrf.mxu1 }
 0x3f0   :  { %9842 = vmatprep.mubr.msk.f32.mxu0 %vm10142_vm0, %v15076_v34  ;;  %9907 = vmatprep.mubr.msk.f32.mxu1 %vm10142_vm0, %v15076_v34  ;;  %v5140_v37 = vadd.f32 %v5139_v47, %v14331_v40 }
 0x3f1   :  { %9990 = vmatpush3.msra.mxu1 %v13945_v21  ;;  %9843 = vmatmul.mubr.f32.vlgmr.msra.gmra.mxu0 %v14260_v43  ;;  %v9375_v3 = vpop.f32.mrf.mxu0  ;;  %v9440_v13 = vpop.f32.mrf.mxu1 }
 0x3f2   :  { %9908 = vmatmul.mubr.f32.gmra.mxu1 %v15314_v41  ;;  %9928 = vmatprep.subr.mxu0 %v15076_v34  ;;  %v14538_v22 = vadd.f32 %v5366_v50, %v5140_v37  ;;  %v15320_v37 = vand.u32 4294901760, %v13999_v0  ;;  %v15323_v13 = vand.u32 4294901760, %v14037_v27  ;;  %v15325_v41 = vand.u32 4294901760, %v14422_v7 }
 0x3f3   :  { %9991 = vmatprep.subr.mxu1 %v15076_v34  ;;  %9929 = vmatpush3.msra.mxu0 %v15315_v62 }
 0x3f4   :  { %9992 = vmatpush3.msra.mxu1 %v13959_v1  ;;  %9845 = vmatprep.mubr.msk.f32.mxu0 %vm10142_vm0, %v15076_v34 }
 0x3f5   :  { %9993 = vmatprep.subr.mxu1 %v15076_v34  ;;  %9910 = vmatprep.mubr.msk.f32.mxu1 %vm10142_vm0, %v15076_v34  ;;  %v5149_v21 = vpop.f32.mrf.mxu0  ;;  %v5384_v40 = vpop.f32.mrf.mxu1 }
 0x3f6   :  { %9930 = vmatprep.subr.mxu0 %v15076_v34  ;;  %9994 = vmatpush3.msra.mxu1 %v13972_v14  ;;  %v5150_v43 = vadd.f32 %v5149_v21, %v14359_v57  ;;  %v15318_v14 = vand.u32 4294901760, %v13980_v12  ;;  %v15319_v12 = vand.u32 4294901760, %v14367_v33 }
 0x3f7   :  { %9846 = vmatmul.mubr.f32.gmra.mxu0 %v14288_v15  ;;  %9911 = vmatmul.mubr.f32.gmra.mxu1 %v15316_v36  ;;  %v9378_v1 = vpop.f32.mrf.mxu0  ;;  %v9443_v50 = vpop.f32.mrf.mxu1 }
 0x3f8   :  { %9931 = vmatpush3.msra.mxu0 %v15317_v8  ;;  %9995 = vmatprep.subr.mxu1 %v15076_v34  ;;  %v14558_v9 = vadd.f32 %v5372_v5, %v5150_v43  ;;  %v15328_v43 = vand.u32 4294901760, %v14449_v52  ;;  %v15330_v1 = vand.u32 4294901760, %v14129_v53 }
 0x3f9   :  { %9932 = vmatprep.subr.mxu0 %v15076_v34  ;;  %9996 = vmatpush3.msra.mxu1 %v13986_v29 }
 0x3fa   :  { %9933 = vmatpush3.msra.mxu0 %v15318_v14  ;;  %9997 = vmatprep.subr.mxu1 %v15076_v34  ;;  %v5159_v15 = vpop.f32.mrf.mxu0 }
 0x3fb   :  { %9848 = vmatprep.mubr.msk.f32.mxu0 %vm10142_vm0, %v15076_v34  ;;  %9913 = vmatprep.mubr.msk.f32.mxu1 %vm10142_vm0, %v15076_v34  ;;  %v5160_v30 = vadd.f32 %v5159_v15, %v14383_v44  ;;  %v5390_v57 = vpop.f32.mrf.mxu1  ;;  %v15333_v15 = vand.u32 4294901760, %v14180_v35  ;;  %v15336_v35 = vand.u32 4294901760, %v14212_v2 }
 0x3fc   :  { %9934 = vmatprep.subr.mxu0 %v15076_v34  ;;  %9998 = vmatpush3.msra.mxu1 %v14007_v38  ;;  %v9381_v29 = vpop.f32.mrf.mxu0  ;;  %v15321_v38 = vand.u32 4294901760, %v14017_v24  ;;  %v15322_v24 = vand.u32 4294901760, %v14394_v42 }
 0x3fd   :  { %9849 = vmatmul.mubr.f32.gmra.mxu0 %v14315_v48  ;;  %9914 = vmatmul.mubr.f32.gmra.mxu1 %v15319_v12  ;;  %v9446_v5 = vpop.f32.mrf.mxu1  ;;  %v14575_v47 = vadd.f32 %v5378_v4, %v5160_v30  ;;  %v15335_v29 = vand.u32 4294901760, %v14198_v59 }
 0x3fe   :  { %9935 = vmatpush3.msra.mxu0 %v15320_v37  ;;  %9999 = vmatprep.subr.mxu1 %v15076_v34  ;;  %v15337_v5 = vld [vmem:[#allocation27_spill] sm:$0xff] }
 0x3ff   :  { %9936 = vmatprep.subr.mxu0 %v15076_v34  ;;  %10000 = vmatpush3.msra.mxu1 %v14029_v54 }
 0x400   :  { %9937 = vmatpush3.msra.mxu0 %v15321_v38  ;;  %10001 = vmatprep.subr.mxu1 %v15076_v34  ;;  %v5169_v48 = vpop.f32.mrf.mxu0  ;;  %v15338_v38 = vld [vmem:[#allocation28_spill] sm:$0xff] }
 0x401   :  { %9851 = vmatprep.mubr.msk.f32.mxu0 %vm10142_vm0, %v15076_v34  ;;  %9916 = vmatprep.mubr.msk.f32.mxu1 %vm10142_vm0, %v15076_v34  ;;  %v5170_v0 = vadd.f32 %v5169_v48, %v14410_v39  ;;  %v5396_v44 = vpop.f32.mrf.mxu1 }
 0x402   :  { %10002 = vmatpush3.msra.mxu1 %v14049_v16  ;;  %9852 = vmatmul.mubr.f32.gmra.mxu0 %v14341_v18  ;;  %v9384_v54 = vpop.f32.mrf.mxu0  ;;  %v15324_v18 = vand.u32 4294901760, %v14055_v63  ;;  %v15326_v63 = vand.u32 4294901760, %v14074_v17 }
 0x403   :  { %9917 = vmatmul.mubr.f32.gmra.mxu1 %v15322_v24  ;;  %9938 = vmatprep.subr.mxu0 %v15076_v34  ;;  %v9449_v4 = vpop.f32.mrf.mxu1  ;;  %v14595_v3 = vadd.f32 %v5384_v40, %v5170_v0  ;;  %v15339_v24 = vld [vmem:[#allocation33_spill] sm:$0xff] }
 0x404   :  { %10003 = vmatprep.subr.mxu1 %v15076_v34  ;;  %9939 = vmatpush3.msra.mxu0 %v15323_v13 }
 0x405   :  { %10004 = vmatpush3.msra.mxu1 %v14069_v25  ;;  %9940 = vmatprep.subr.mxu0 %v15076_v34 }
 0x406   :  { %10005 = vmatprep.subr.mxu1 %v15076_v34  ;;  %9854 = vmatprep.mubr.msk.f32.mxu0 %vm10142_vm0, %v15076_v34  ;;  %v5179_v16 = vpop.f32.mrf.mxu0 }
 0x407   :  { %9919 = vmatprep.mubr.msk.f32.mxu1 %vm10142_vm0, %v15076_v34  ;;  %9941 = vmatpush3.msra.mxu0 %v15324_v18  ;;  %v5180_v39 = vadd.f32 %v5179_v16, %v14437_v6  ;;  %v5402_v27 = vpop.f32.mrf.mxu1  ;;  %v15340_v18 = vld [vmem:[#allocation31_spill] sm:$0xff] }
 0x408   :  { %10006 = vmatpush3.msra.mxu1 %v14087_v60  ;;  %9855 = vmatmul.mubr.f32.gmra.mxu0 %v14367_v33  ;;  %v9387_v25 = vpop.f32.mrf.mxu0  ;;  %v15327_v33 = vand.u32 4294901760, %v14093_v45  ;;  %v15329_v45 = vand.u32 4294901760, %v14110_v31 }
 0x409   :  { %9920 = vmatmul.mubr.f32.gmra.mxu1 %v15325_v41  ;;  %9942 = vmatprep.subr.mxu0 %v15076_v34  ;;  %v9452_v62 = vpop.f32.mrf.mxu1  ;;  %v14615_v21 = vadd.f32 %v5390_v57, %v5180_v39  ;;  %v15334_v57 = vld [vmem:[#allocation30_spill] sm:$0xff] }
 0x40a   :  { %10007 = vmatprep.subr.mxu1 %v15076_v34  ;;  %9943 = vmatpush3.msra.mxu0 %v15326_v63  ;;  %v15341_v41 = vld [vmem:[#allocation34_spill] sm:$0xff] }
 0x40b   :  { %10008 = vmatpush3.msra.mxu1 %v14105_v23  ;;  %9944 = vmatprep.subr.mxu0 %v15076_v34 }
 0x40c   :  { %10009 = vmatprep.subr.mxu1 %v15076_v34  ;;  %9857 = vmatprep.mubr.msk.f32.mxu0 %vm10142_vm0, %v15076_v34  ;;  %v5189_v60 = vpop.f32.mrf.mxu0  ;;  %v5408_v6 = vpop.f32.mrf.mxu1 }
 0x40d   :  { %9922 = vmatprep.mubr.msk.f32.mxu1 %vm10142_vm0, %v15076_v34  ;;  %9945 = vmatpush3.msra.mxu0 %v15327_v33  ;;  %v5190_v17 = vadd.f32 %v5189_v60, %v14464_v26  ;;  %v15342_v33 = vld [vmem:[#allocation32_spill] sm:$0xff] }
 0x40e   :  { %10010 = vmatpush3.msra.mxu1 %v14122_v56  ;;  %9858 = vmatmul.mubr.f32.gmra.mxu0 %v14394_v42  ;;  %v9390_v23 = vpop.f32.mrf.mxu0  ;;  %v9455_v40 = vpop.f32.mrf.mxu1 }
 0x40f   :  { %9923 = vmatmul.mubr.f32.gmra.mxu1 %v15328_v43  ;;  %10011 = vmatprep.subr.mxu1 %v15076_v34  ;;  %v14635_v36 = vadd.f32 %v5396_v44, %v5190_v17  ;;  %v15343_v43 = vld [vmem:[#allocation37_spill] sm:$0xff] }
 0x410   :  { %9946 = vmatprep.subr.mxu0 %v15076_v34  ;;  %10012 = vmatpush3.msra.mxu1 %v14136_v11 }
 0x411   :  { %9947 = vmatpush3.msra.mxu0 %v15329_v45  ;;  %10013 = vmatprep.subr.mxu1 %v15076_v34 }
 0x412   :  { %9860 = vmatprep.mubr.msk.f32.mxu0 %vm10142_vm0, %v15076_v34  ;;  %9925 = vmatprep.mubr.msk.f32.mxu1 %vm10142_vm0, %v15076_v34  ;;  %v5199_v56 = vpop.f32.mrf.mxu0  ;;  %v5657_v26 = vpop.f32.mrf.mxu1 }
 0x413   :  { %9948 = vmatprep.subr.mxu0 %v15076_v34  ;;  %10014 = vmatpush3.msra.mxu1 %v14153_v61  ;;  %v5200_v42 = vadd.f32 %v5199_v56, %v14489_v58  ;;  %v15331_v58 = vand.u32 4294901760, %v15311_v28 }
 0x414   :  { %9861 = vmatmul.mubr.f32.gmra.mxu0 %v14422_v7  ;;  %9926 = vmatmul.mubr.f32.gmra.mxu1 %v6225_v19  ;;  %v9393_v11 = vpop.f32.mrf.mxu0  ;;  %v9549_v31 = vpop.f32.mrf.mxu1 }
 0x415   :  { %9949 = vmatpush3.msra.mxu0 %v15330_v1  ;;  %10015 = vmatprep.subr.mxu1 %v15076_v34  ;;  %v14655_v50 = vadd.f32 %v5402_v27, %v5200_v42 }
 0x416   :  { %9950 = vmatprep.subr.mxu0 %v15076_v34  ;;  %10016 = vmatpush3.msra.mxu1 %v14172_v49  ;;  %v5209_v61 = vpop.f32.mrf.mxu0 }
 0x417   :  { %9951 = vmatpush3.msra.mxu0 %v15331_v58  ;;  %10017 = vmatprep.subr.mxu1 %v15076_v34  ;;  %v5210_v7 = vadd.f32 %v5209_v61, %v14505_v51  ;;  %v5665_v19 = vpop.f32.mrf.mxu1  ;;  %v15332_v51 = vand.u32 4294901760, %v14161_v55 }
 0x418   :  { %9863 = vmatprep.mubr.msk.f32.mxu0 %vm10142_vm0, %v15076_v34  ;;  %9952 = vmatprep.subr.mxu0 %v15076_v34  ;;  %v9396_v53 = vpop.f32.mrf.mxu0 }
 0x419   :  { %10018 = vmatpush3.msra.mxu1 %v14189_v46  ;;  %10019 = vmatprep.mubr.msk.f32.mxu1 %vm10142_vm0, %v15076_v34  ;;  %v9552_v49 = vpop.f32.mrf.mxu1  ;;  %v14669_v8 = vadd.f32 %v5408_v6, %v5210_v7 }
 0x41a   :  { %9864 = vmatmul.mubr.f32.gmra.mxu0 %v14449_v52  ;;  %10020 = vmatmul.mubr.f32.vlgmr.msra.gmra.mxu1 %v14243_v10 }
 0x41b   :  { %9953 = vmatpush3.msra.mxu0 %v15332_v51  ;;  %9866 = vmatprep.mubr.msk.f32.mxu0 %vm10142_vm0, %v15076_v34  ;;  %v5512_v28 = vpop.f32.mrf.mxu0 }
 0x41c   :  { %9954 = vmatprep.subr.mxu0 %v15076_v34  ;;  %10022 = vmatprep.mubr.msk.f32.mxu1 %vm10142_vm0, %v15076_v34  ;;  %v5513_v46 = vadd.f32 %v5512_v28, %v14519_v32  ;;  %v5673_v14 = vpop.f32.mrf.mxu1 }
 0x41d   :  { %9955 = vmatpush3.msra.mxu0 %v15333_v15  ;;  %v9490_v52 = vpop.f32.mrf.mxu0 }
 0x41e   :  { %9867 = vmatmul.mubr.f32.gmra.mxu0 %v14470_v20  ;;  %9956 = vmatprep.subr.mxu0 %v15076_v34  ;;  %v9555_v55 = vpop.f32.mrf.mxu1  ;;  %v14685_v30 = vadd.f32 %v5657_v26, %v5513_v46 }
 0x41f   :  { %10023 = vmatmul.mubr.f32.gmra.mxu1 %v15334_v57  ;;  %9957 = vmatpush3.msra.mxu0 %v15335_v29 }
 0x420   :  { %9958 = vmatprep.subr.mxu0 %v15076_v34  ;;  %9960 = vmatprep.mubr.msk.f32.mxu0 %vm10142_vm0, %v15076_v34 }
 0x421   :  { %9959 = vmatpush3.msra.mxu0 %v15336_v35  ;;  %10025 = vmatprep.mubr.msk.f32.mxu1 %vm10142_vm0, %v15076_v34  ;;  %v5519_v20 = vpop.f32.mrf.mxu0  ;;  %v5681_v32 = vpop.f32.mrf.mxu1 }
 0x422   :  { %9961 = vmatmul.mubr.f32.vlgmr.msra.gmra.mxu0 %v14243_v10  ;;  %v5520_v12 = vadd.f32 %v5519_v20, %v14538_v22 }
 0x423   :  { %10026 = vmatmul.mubr.f32.gmra.mxu1 %v15337_v5  ;;  %9963 = vmatprep.mubr.msk.f32.mxu0 %vm10142_vm0, %v15076_v34  ;;  %v9493_v59 = vpop.f32.mrf.mxu0  ;;  %v9558_v37 = vpop.f32.mrf.mxu1 }
 0x424   :  { %10028 = vmatprep.mubr.msk.f32.mxu1 %vm10142_vm0, %v15076_v34  ;;  %v14704_v2 = vadd.f32 %v5665_v19, %v5520_v12 }
 0x426   :  { %9964 = vmatmul.mubr.f32.gmra.mxu0 %v15334_v57 }
 0x427   :  { %10029 = vmatmul.mubr.f32.gmra.mxu1 %v15338_v38  ;;  %9966 = vmatprep.mubr.msk.f32.mxu0 %vm10142_vm0, %v15076_v34  ;;  %v5526_v10 = vpop.f32.mrf.mxu0  ;;  %v5689_v22 = vpop.f32.mrf.mxu1 }
 0x428   :  { %10031 = vmatprep.mubr.msk.f32.mxu1 %vm10142_vm0, %v15076_v34  ;;  %v5527_v48 = vadd.f32 %v5526_v10, %v14558_v9 }
 0x429   :  { %v9496_v0 = vpop.f32.mrf.mxu0  ;;  %v9561_v44 = vpop.f32.mrf.mxu1 }
 0x42a   :  { %9967 = vmatmul.mubr.f32.gmra.mxu0 %v15337_v5  ;;  %v14714_v54 = vadd.f32 %v5673_v14, %v5527_v48 }
 0x42b   :  { %10032 = vmatmul.mubr.f32.gmra.mxu1 %v15339_v24  ;;  %9969 = vmatprep.mubr.msk.f32.mxu0 %vm10142_vm0, %v15076_v34 }
 0x42c   :  { %10034 = vmatprep.mubr.msk.f32.mxu1 %vm10142_vm0, %v15076_v34  ;;  %v5533_v4 = vpop.f32.mrf.mxu0 }
 0x42d   :  { %v5534_v13 = vadd.f32 %v5533_v4, %v14575_v47  ;;  %v5697_v16 = vpop.f32.mrf.mxu1 }
 0x42e   :  { %9970 = vmatmul.mubr.f32.gmra.mxu0 %v15338_v38  ;;  %v9499_v9 = vpop.f32.mrf.mxu0 }
 0x42f   :  { %10035 = vmatmul.mubr.f32.gmra.mxu1 %v15340_v18  ;;  %9972 = vmatprep.mubr.msk.f32.mxu0 %vm10142_vm0, %v15076_v34  ;;  %v9564_v39 = vpop.f32.mrf.mxu1  ;;  %v14726_v27 = vadd.f32 %v5681_v32, %v5534_v13 }
 0x430   :  { %10037 = vmatprep.mubr.msk.f32.mxu1 %vm10142_vm0, %v15076_v34 }
 0x432   :  { %9973 = vmatmul.mubr.f32.gmra.mxu0 %v15339_v24  ;;  %v5540_v25 = vpop.f32.mrf.mxu0 }
 0x433   :  { %10038 = vmatmul.mubr.f32.gmra.mxu1 %v15341_v41  ;;  %9975 = vmatprep.mubr.msk.f32.mxu0 %vm10142_vm0, %v15076_v34  ;;  %v5541_v47 = vadd.f32 %v5540_v25, %v14595_v3  ;;  %v5705_v62 = vpop.f32.mrf.mxu1 }
 0x434   :  { %10040 = vmatprep.mubr.msk.f32.mxu1 %vm10142_vm0, %v15076_v34  ;;  %v9502_v63 = vpop.f32.mrf.mxu0 }
 0x435   :  { %v9567_v60 = vpop.f32.mrf.mxu1  ;;  %v5690_v6 = vadd.f32 %v5689_v22, %v5541_v47 }
 0x436   :  { %9976 = vmatmul.mubr.f32.gmra.mxu0 %v15340_v18 }
 0x437   :  { %10041 = vmatmul.mubr.f32.gmra.mxu1 %v15342_v33  ;;  %9978 = vmatprep.mubr.msk.f32.mxu0 %vm10142_vm0, %v15076_v34 }
 0x438   :  { %10043 = vmatprep.mubr.msk.f32.mxu1 %vm10142_vm0, %v15076_v34  ;;  %v5547_v17 = vpop.f32.mrf.mxu0 }
 0x439   :  { %v5548_v3 = vadd.f32 %v5547_v17, %v14615_v21  ;;  %v5713_v23 = vpop.f32.mrf.mxu1 }
 0x43a   :  { %9979 = vmatmul.mubr.f32.gmra.mxu0 %v15341_v41  ;;  %v9505_v40 = vpop.f32.mrf.mxu0 }
 0x43b   :  { %10044 = vmatmul.mubr.f32.gmra.mxu1 %v15343_v43  ;;  %9981 = vmatprep.mubr.msk.f32.mxu0 %vm10142_vm0, %v15076_v34  ;;  %v9570_v45 = vpop.f32.mrf.mxu1  ;;  %v5698_v56 = vadd.f32 %v5697_v16, %v5548_v3 }
 0x43e   :  { %9982 = vmatmul.mubr.f32.gmra.mxu0 %v15342_v33  ;;  %v5554_v26 = vpop.f32.mrf.mxu0  ;;  %v5721_v42 = vpop.f32.mrf.mxu1 }
 0x43f   :  { %9984 = vmatprep.mubr.msk.f32.mxu0 %vm10142_vm0, %v15076_v34  ;;  %v5555_v21 = vadd.f32 %v5554_v26, %v14635_v36 }
 0x440   :  { %v9508_v11 = vpop.f32.mrf.mxu0  ;;  %v9573_v31 = vpop.f32.mrf.mxu1 }
 0x441   :  { %v5706_v1 = vadd.f32 %v5705_v62, %v5555_v21 }
 0x442   :  { %9985 = vmatmul.mubr.f32.gmra.mxu0 %v15343_v43 }
 0x444   :  { %v5561_v61 = vpop.f32.mrf.mxu0  ;;  %v5975_v58 = vpop.f32.mrf.mxu1 }
 0x445   :  { %v5562_v7 = vadd.f32 %v5561_v61, %v14655_v50 }
 0x446   :  { %v9511_v19 = vpop.f32.mrf.mxu0  ;;  %v9667_v53 = vpop.f32.mrf.mxu1 }
 0x447   :  { %v5714_v49 = vadd.f32 %v5713_v23, %v5562_v7 }
 0x448   :  { %v5568_v51 = vpop.f32.mrf.mxu0 }
 0x449   :  { %v5569_v28 = vadd.f32 %v5568_v51, %v14669_v8  ;;  %v5981_v46 = vpop.f32.mrf.mxu1 }
 0x44a   :  { %v9514_v14 = vpop.f32.mrf.mxu0 }
 0x44b   :  { %v9670_v34 = vpop.f32.mrf.mxu1  ;;  %v5722_v15 = vadd.f32 %v5721_v42, %v5569_v28 }
 0x44d   :  { %v5840_v36 = vpop.f32.mrf.mxu0 }
 0x44e   :  { %v5841_v52 = vadd.f32 %v5840_v36, %v14685_v30  ;;  %v5987_v55 = vpop.f32.mrf.mxu1 }
 0x44f   :  { %v9608_v57 = vpop.f32.mrf.mxu0 }
 0x450   :  { %v14756_v29 = vadd.f32 %v5975_v58, %v5841_v52  ;;  %v9673_v35 = vpop.f32.mrf.mxu1 }
 0x453   :  { %v5846_v20 = vpop.f32.mrf.mxu0  ;;  %v5993_v50 = vpop.f32.mrf.mxu1 }
 0x454   :  { %v5847_v32 = vadd.f32 %v5846_v20, %v14704_v2 }
 0x455   :  { %v9611_v12 = vpop.f32.mrf.mxu0  ;;  %v9676_v5 = vpop.f32.mrf.mxu1 }
 0x456   :  { %v14759_v59 = vadd.f32 %v5981_v46, %v5847_v32 }
 0x459   :  { %v5852_v8 = vpop.f32.mrf.mxu0  ;;  %v5999_v37 = vpop.f32.mrf.mxu1 }
 0x45a   :  { %v5853_v38 = vadd.f32 %v5852_v8, %v14714_v54 }
 0x45b   :  { %v9614_v10 = vpop.f32.mrf.mxu0  ;;  %v9679_v22 = vpop.f32.mrf.mxu1 }
 0x45c   :  { %v14762_v30 = vadd.f32 %v5987_v55, %v5853_v38 }
 0x45e   :  { %v5858_v48 = vpop.f32.mrf.mxu0 }
 0x45f   :  { %v5859_v0 = vadd.f32 %v5858_v48, %v14726_v27  ;;  %v6005_v44 = vpop.f32.mrf.mxu1 }
 0x460   :  { %v9617_v24 = vpop.f32.mrf.mxu0 }
 0x461   :  { %v14765_v4 = vadd.f32 %v5993_v50, %v5859_v0  ;;  %v9682_v2 = vpop.f32.mrf.mxu1 }
 0x464   :  { %v5864_v13 = vpop.f32.mrf.mxu0 }
 0x465   :  { %v5865_v16 = vadd.f32 %v5864_v13, %v5690_v6  ;;  %v6011_v9 = vpop.f32.mrf.mxu1 }
 0x466   :  { %v9620_v18 = vpop.f32.mrf.mxu0 }
 0x467   :  { %v14767_v39 = vadd.f32 %v5999_v37, %v5865_v16  ;;  %v9685_v25 = vpop.f32.mrf.mxu1 }
 0x46a   :  { %v5870_v54 = vpop.f32.mrf.mxu0 }
 0x46b   :  { %v5871_v41 = vadd.f32 %v5870_v54, %v5698_v56  ;;  %v6017_v47 = vpop.f32.mrf.mxu1 }
 0x46c   :  { %v9623_v62 = vpop.f32.mrf.mxu0 }
 0x46d   :  { %v14769_v63 = vadd.f32 %v6005_v44, %v5871_v41  ;;  %v9688_v60 = vpop.f32.mrf.mxu1 }
 0x470   :  { %v5876_v27 = vpop.f32.mrf.mxu0  ;;  %v6023_v33 = vpop.f32.mrf.mxu1 }
 0x471   :  { %v5877_v17 = vadd.f32 %v5876_v27, %v5706_v1 }
 0x472   :  { %v9626_v3 = vpop.f32.mrf.mxu0  ;;  %v9691_v23 = vpop.f32.mrf.mxu1 }
 0x473   :  { %v14771_v40 = vadd.f32 %v6011_v9, %v5877_v17 }
 0x476   :  { %v5882_v6 = vpop.f32.mrf.mxu0  ;;  %v6380_v43 = vpop.f32.mrf.mxu1 }
 0x477   :  { %v5883_v45 = vadd.f32 %v5882_v6, %v5714_v49 }
 0x478   :  { %v9629_v26 = vpop.f32.mrf.mxu0  ;;  %v9785_v42 = vpop.f32.mrf.mxu1 }
 0x479   :  { %v14773_v21 = vadd.f32 %v6017_v47, %v5883_v45 }
 0x47a   :  { %v5888_v56 = vpop.f32.mrf.mxu0 }
 0x47b   :  { %v5889_v11 = vadd.f32 %v5888_v56, %v5722_v15  ;;  %v6386_v31 = vpop.f32.mrf.mxu1 }
 0x47c   :  { %v9632_v61 = vpop.f32.mrf.mxu0 }
 0x47d   :  { %v14775_v58 = vadd.f32 %v6023_v33, %v5889_v11  ;;  %v9788_v7 = vpop.f32.mrf.mxu1 }
 0x47f   :  { %v6149_v19 = vpop.f32.mrf.mxu0 }
 0x480   :  { %v14777_v1 = vadd.f32 %v6380_v43, %v6149_v19  ;;  %v6392_v53 = vpop.f32.mrf.mxu1 }
 0x481   :  { %v9726_v51 = vpop.f32.mrf.mxu0 }
 0x482   :  { %v9791_v28 = vpop.f32.mrf.mxu1 }
 0x485   :  { %v6159_v46 = vpop.f32.mrf.mxu0  ;;  %v6398_v14 = vpop.f32.mrf.mxu1 }
 0x486   :  { %v14779_v49 = vadd.f32 %v6386_v31, %v6159_v46 }
 0x487   :  { %v9729_v34 = vpop.f32.mrf.mxu0  ;;  %v9794_v36 = vpop.f32.mrf.mxu1 }
 0x48b   :  { %v6169_v52 = vpop.f32.mrf.mxu0  ;;  %v6404_v55 = vpop.f32.mrf.mxu1 }
 0x48c   :  { %v14781_v15 = vadd.f32 %v6392_v53, %v6169_v52 }
 0x48d   :  { %v9732_v57 = vpop.f32.mrf.mxu0  ;;  %v9797_v35 = vpop.f32.mrf.mxu1 }
 0x490   :  { %v6179_v20 = vpop.f32.mrf.mxu0 }
 0x491   :  { %v14783_v50 = vadd.f32 %v6398_v14, %v6179_v20  ;;  %v6410_v32 = vpop.f32.mrf.mxu1 }
 0x492   :  { %v9735_v12 = vpop.f32.mrf.mxu0 }
 0x493   :  { %v9800_v5 = vpop.f32.mrf.mxu1 }
 0x496   :  { %v6189_v8 = vpop.f32.mrf.mxu0 }
 0x497   :  { %v14785_v37 = vadd.f32 %v6404_v55, %v6189_v8  ;;  %v6416_v38 = vpop.f32.mrf.mxu1 }
 0x498   :  { %v9738_v10 = vpop.f32.mrf.mxu0 }
 0x499   :  { %v9803_v22 = vpop.f32.mrf.mxu1 }
 0x49c   :  { %v6199_v48 = vpop.f32.mrf.mxu0 }
 0x49d   :  { %v14787_v0 = vadd.f32 %v6410_v32, %v6199_v48  ;;  %v6422_v44 = vpop.f32.mrf.mxu1 }
 0x49e   :  { %v9741_v24 = vpop.f32.mrf.mxu0 }
 0x49f   :  { %v9806_v2 = vpop.f32.mrf.mxu1 }
 0x4a2   :  { %v6209_v13 = vpop.f32.mrf.mxu0  ;;  %v6428_v16 = vpop.f32.mrf.mxu1 }
 0x4a3   :  { %v14789_v9 = vadd.f32 %v6416_v38, %v6209_v13 }
 0x4a4   :  { %v9744_v18 = vpop.f32.mrf.mxu0  ;;  %v9809_v25 = vpop.f32.mrf.mxu1 }
 0x4a8   :  { %v6219_v54 = vpop.f32.mrf.mxu0  ;;  %v6677_v41 = vpop.f32.mrf.mxu1 }
 0x4a9   :  { %v14791_v47 = vadd.f32 %v6422_v44, %v6219_v54 }
 0x4aa   :  { %v9747_v62 = vpop.f32.mrf.mxu0  ;;  %v9903_v60 = vpop.f32.mrf.mxu1 }
 0x4ac   :  { %v6229_v27 = vpop.f32.mrf.mxu0 }
 0x4ad   :  { %v14793_v33 = vadd.f32 %v6428_v16, %v6229_v27  ;;  %v6685_v17 = vpop.f32.mrf.mxu1 }
 0x4ae   :  { %v9750_v3 = vpop.f32.mrf.mxu0 }
 0x4af   :  { %v9906_v23 = vpop.f32.mrf.mxu1 }
 0x4b1   :  { %v6532_v6 = vpop.f32.mrf.mxu0 }
 0x4b2   :  { %v6693_v43 = vpop.f32.mrf.mxu1  ;;  %v6533_v24 = vadd.f32 %v6532_v6, %v14777_v1 }
 0x4b3   :  { %v9844_v45 = vpop.f32.mrf.mxu0 }
 0x4b4   :  { %v9909_v26 = vpop.f32.mrf.mxu1  ;;  %v6678_v54 = vadd.f32 %v6677_v41, %v6533_v24 }
 0x4b7   :  { %v6539_v42 = vpop.f32.mrf.mxu0  ;;  %v6701_v56 = vpop.f32.mrf.mxu1 }
 0x4b8   :  { %v6540_v18 = vadd.f32 %v6539_v42, %v14779_v49  ;;  %v15344_v49 = vld [vmem:[#allocation14_spill] sm:$0xff] }
 0x4b9   :  { %v9847_v11 = vpop.f32.mrf.mxu0  ;;  %v9912_v31 = vpop.f32.mrf.mxu1 }
 0x4ba   :  { %v6686_v11 = vadd.f32 %v6685_v17, %v6540_v18 }
 0x4bd   :  { %v6546_v61 = vpop.f32.mrf.mxu0  ;;  %v14795_v7 = vpop.f32.mrf.mxu1 }
 0x4be   :  { %v6547_v23 = vadd.f32 %v6546_v61, %v14781_v15 }
 0x4bf   :  { %v9850_v19 = vpop.f32.mrf.mxu0  ;;  %v9915_v53 = vpop.f32.mrf.mxu1 }
 0x4c2   :  { %v6553_v51 = vpop.f32.mrf.mxu0 }
 0x4c3   :  { %v14797_v28 = vpop.f32.mrf.mxu1 }
 0x4c4   :  { %v9853_v46 = vpop.f32.mrf.mxu0 }
 0x4c5   :  { %v9918_v14 = vpop.f32.mrf.mxu1  ;;  %v6554_v46 = vadd.f32 %v6553_v51, %v14783_v50 }
 0x4c8   :  { %v6560_v34 = vpop.f32.mrf.mxu0 }
 0x4c9   :  { %v14799_v36 = vpop.f32.mrf.mxu1 }
 0x4ca   :  { %v9856_v52 = vpop.f32.mrf.mxu0 }
 0x4cb   :  { %v9921_v55 = vpop.f32.mrf.mxu1  ;;  %v6694_v52 = vadd.f32 %v6693_v43, %v6547_v23 }
 0x4ce   :  { %v6567_v57 = vpop.f32.mrf.mxu0 }
 0x4cf   :  { %v14801_v35 = vpop.f32.mrf.mxu1 }
 0x4d0   :  { %v9859_v20 = vpop.f32.mrf.mxu0 }
 0x4d1   :  { %v9924_v32 = vpop.f32.mrf.mxu1 }
 0x4d2   :  { %v6561_v32 = vadd.f32 %v6560_v34, %v14785_v37 }
 0x4d4   :  { %v6574_v12 = vpop.f32.mrf.mxu0  ;;  %v14803_v5 = vpop.f32.mrf.mxu1  ;;  %v6710_v37 = vadd.f32 %v14795_v7, %v6561_v32 }
 0x4d6   :  { %v9862_v8 = vpop.f32.mrf.mxu0  ;;  %v9927_v38 = vpop.f32.mrf.mxu1 }
 0x4da   :  { %v14805_v10 = vpop.f32.mrf.mxu0  ;;  %v6995_v22 = vpop.f32.mrf.mxu1 }
 0x4dc   :  { %v9865_v48 = vpop.f32.mrf.mxu0  ;;  %v10021_v44 = vpop.f32.mrf.mxu1 }
 0x4dd   :  { %v6702_v48 = vadd.f32 %v6701_v56, %v6554_v46 }
 0x4de   :  { %v14808_v2 = vpop.f32.mrf.mxu0 }
 0x4df   :  { %v7001_v13 = vpop.f32.mrf.mxu1 }
 0x4e0   :  { %v9868_v16 = vpop.f32.mrf.mxu0 }
 0x4e1   :  { %v10024_v25 = vpop.f32.mrf.mxu1 }
 0x4e2   :  { %v6860_v62 = vpop.f32.mrf.mxu0 }
 0x4e3   :  { %v6861_v60 = vadd.f32 %v6860_v62, %v6678_v54  ;;  %v7007_v27 = vpop.f32.mrf.mxu1 }
 0x4e4   :  { %v9962_v3 = vpop.f32.mrf.mxu0 }
 0x4e5   :  { %v6996_v45 = vadd.f32 %v6995_v22, %v6861_v60  ;;  %v10027_v26 = vpop.f32.mrf.mxu1 }
 0x4e6   :  { %v6866_v31 = vpop.f32.mrf.mxu0 }
 0x4e7   :  { %v7047_v1 = vadd.f32 %v6996_v45, %v14756_v29  ;;  %v6867_v6 = vadd.f32 %v6866_v31, %v6686_v11  ;;  %v7013_v19 = vpop.f32.mrf.mxu1  ;;  %v15345_v29 = vld [vmem:[#allocation15_spill] sm:$0xff] }
 0x4e8   :  { %v9965_v53 = vpop.f32.mrf.mxu0 }
 0x4e9   :  { %v7056_v42 = vadd.f32 %v7047_v1, %v15344_v49  ;;  %v7002_v41 = vadd.f32 %v7001_v13, %v6867_v6  ;;  %v10030_v14 = vpop.f32.mrf.mxu1  ;;  %v6568_v13 = vadd.f32 %v6567_v57, %v14787_v0  ;;  %v15348_v1 = vld [vmem:[#allocation18_spill] sm:$0xff] }
 0x4ea   :  { %v6872_v55 = vpop.f32.mrf.mxu0 }
 0x4eb   :  { %7065 = vst [vmem:[#allocation7] sm:$0xff] %v7056_v42  ;;  %v7048_v15 = vadd.f32 %v7002_v41, %v14759_v59  ;;  %v6873_v61 = vadd.f32 %v6872_v55, %v6694_v52  ;;  %v7019_v20 = vpop.f32.mrf.mxu1  ;;  %v15346_v59 = vld [vmem:[#allocation16_spill] sm:$0xff]  ;;  %v6718_v0 = vadd.f32 %v14797_v28, %v6568_v13  ;;  %v15349_v41 = vld [vmem:[#allocation19_spill] sm:$0xff] }
 0x4ec   :  { %v9968_v17 = vpop.f32.mrf.mxu0 }
 0x4ed   :  { %v7057_v8 = vadd.f32 %v7048_v15, %v15345_v29  ;;  %v7008_v38 = vadd.f32 %v7007_v27, %v6873_v61  ;;  %v10033_v22 = vpop.f32.mrf.mxu1  ;;  %v15347_v27 = vld [vmem:[#allocation17_spill] sm:$0xff] }
 0x4ee   :  { %v6878_v50 = vpop.f32.mrf.mxu0 }
 0x4ef   :  { %7066 = vst [vmem:[#allocation7 + $0x8] sm:$0xff] %v7057_v8  ;;  %v7049_v51 = vadd.f32 %v7008_v38, %v14762_v30  ;;  %v6879_v44 = vadd.f32 %v6878_v50, %v6702_v48  ;;  %v7025_v43 = vpop.f32.mrf.mxu1  ;;  %v6575_v30 = vadd.f32 %v6574_v12, %v14789_v9  ;;  %v15351_v38 = vld [vmem:[#allocation21_spill] sm:$0xff]  ;;  %v15352_v48 = vld [vmem:[#allocation22_spill] sm:$0xff] }
 0x4f0   :  { %v9971_v24 = vpop.f32.mrf.mxu0 }
 0x4f1   :  { %v7058_v16 = vadd.f32 %v7049_v51, %v15346_v59  ;;  %v7014_v18 = vadd.f32 %v7013_v19, %v6879_v44  ;;  %v10036_v25 = vpop.f32.mrf.mxu1  ;;  %v6726_v12 = vadd.f32 %v14799_v36, %v6575_v30 }
 0x4f2   :  { %v6884_v34 = vpop.f32.mrf.mxu0 }
 0x4f3   :  { %7067 = vst [vmem:[#allocation7 + $0x10] sm:$0xff] %v7058_v16  ;;  %v7050_v54 = vadd.f32 %v7014_v18, %v14765_v4  ;;  %v6885_v56 = vadd.f32 %v6884_v34, %v6710_v37  ;;  %v7031_v62 = vpop.f32.mrf.mxu1  ;;  %v6582_v4 = vadd.f32 %v14805_v10, %v14791_v47 }
 0x4f4   :  { %v9974_v60 = vpop.f32.mrf.mxu0 }
 0x4f5   :  { %v7059_v3 = vadd.f32 %v7050_v54, %v15347_v27  ;;  %v7020_v23 = vadd.f32 %v7019_v20, %v6885_v56  ;;  %v10039_v45 = vpop.f32.mrf.mxu1  ;;  %v6734_v10 = vadd.f32 %v14801_v35, %v6582_v4  ;;  %v15350_v20 = vld [vmem:[#allocation20_spill] sm:$0xff] }
 0x4f6   :  { %v6890_v57 = vpop.f32.mrf.mxu0 }
 0x4f7   :  { %7068 = vst [vmem:[#allocation7 + $0x18] sm:$0xff] %v7059_v3  ;;  %v7051_v26 = vadd.f32 %v7020_v23, %v14767_v39  ;;  %v6891_v7 = vadd.f32 %v6890_v57, %v6718_v0  ;;  %v7037_v11 = vpop.f32.mrf.mxu1  ;;  %v6589_v39 = vadd.f32 %v14808_v2, %v14793_v33 }
 0x4f8   :  { %v9977_v31 = vpop.f32.mrf.mxu0 }
 0x4f9   :  { %v7060_v6 = vadd.f32 %v7051_v26, %v15348_v1  ;;  %v7026_v19 = vadd.f32 %v7025_v43, %v6891_v7  ;;  %v10042_v9 = vpop.f32.mrf.mxu1  ;;  %v6742_v32 = vadd.f32 %v14803_v5, %v6589_v39 }
 0x4fa   :  { %v6896_v53 = vpop.f32.mrf.mxu0 }
 0x4fb   :  { %7069 = vst [vmem:[#allocation7 + $0x20] sm:$0xff] %v7060_v6  ;;  %v7052_v28 = vadd.f32 %v7026_v19, %v14769_v63  ;;  %v6897_v46 = vadd.f32 %v6896_v53, %v6726_v12  ;;  %v7043_v49 = vpop.f32.mrf.mxu1 }
 0x4fc   :  { %v9980_v42 = vpop.f32.mrf.mxu0 }
 0x4fd   :  { %v7061_v14 = vadd.f32 %v7052_v28, %v15349_v41  ;;  %v7032_v52 = vadd.f32 %v7031_v62, %v6897_v46  ;;  %v10045_v47 = vpop.f32.mrf.mxu1 }
 0x4fe   :  { %v6902_v55 = vpop.f32.mrf.mxu0 }
 0x4ff   :  { %7070 = vst [vmem:[#allocation7 + $0x28] sm:$0xff] %v7061_v14  ;;  %v7053_v36 = vadd.f32 %v7032_v52, %v14771_v40  ;;  %v6903_v15 = vadd.f32 %v6902_v55, %v6734_v10 }
 0x500   :  { %v9983_v61 = vpop.f32.mrf.mxu0 }
 0x501   :  { %v7062_v63 = vadd.f32 %v7053_v36, %v15350_v20  ;;  %v7038_v17 = vadd.f32 %v7037_v11, %v6903_v15 }
 0x502   :  { %v6908_v29 = vpop.f32.mrf.mxu0 }
 0x503   :  { %7071 = vst [vmem:[#allocation7 + $0x30] sm:$0xff] %v7062_v63  ;;  %v7054_v33 = vadd.f32 %v7038_v17, %v14773_v21  ;;  %v6909_v2 = vadd.f32 %v6908_v29, %v6742_v32 }
 0x504   :  { %v9986_v8 = vpop.f32.mrf.mxu0 }
 0x505   :  { %v7063_v22 = vadd.f32 %v7054_v33, %v15351_v38  ;;  %v7044_v35 = vadd.f32 %v7043_v49, %v6909_v2 }
 0x507   :  { %7072 = vst [vmem:[#allocation7 + $0x38] sm:$0xff] %v7063_v22  ;;  %v7055_v40 = vadd.f32 %v7044_v35, %v14775_v58 }
 0x509   :  { %v7064_v50 = vadd.f32 %v7055_v40, %v15352_v48 }
 0x50b   :  { %7073 = vst [vmem:[#allocation7 + $0x40] sm:$0xff] %v7064_v50 }
 0x50c   :  { %10122 = shalt.err (!%p10119_p0)
}
 0x50d   :  { %7085 = dma.vmem_to_hbm [thread:$0]  %s7080_s18, 1152, %s14855_s6, [#allocation4], %s10138_s24, %s10138_s24, %s10139_s25  }
 0x50e   :  { %10135 = dma.done.wait [#allocation4], 1152  }
 0x50f   :  { %10136 = vsyncadd [#allocation4], 4294966144 }
 0x510   :  { %7089 = vsyncpa [#allocation3], 1 }
 0x511   :  { %7090 = vsyncpa [#allocation6], 1 }
 0x512   :  { %7091 = vsyncpa [#allocation4], 1 }

</bundles_post_ra>
